<compile_context>
chip_gen: v5e
topology: v5e:2x2
jax: 0.10.0
libtpu: 0.0.40
codegen_flags: <defaults>
</compile_context>

<pallas_src>
import functools
import math

import jax
import jax.numpy as jnp
from jax.experimental import pallas as pl
from jax.experimental.pallas import tpu as pltpu


def _transformer_encoder_kernel(
    x_ref,
    wqkv_ref, bqkv_ref, wout_ref, bout_ref,
    wff1_ref, bff1_ref, wff2_ref, bff2_ref,
    ln1g_ref, ln1b_ref, ln2g_ref, ln2b_ref,
    lnfg_ref, lnfb_ref,
    o_ref,
    *, num_layers, nhead, eps):
    """Fused multi-layer transformer encoder for one batch block.

    x_ref : (BB, L, D)          activations (f32)
    wqkv  : (NL, D, 3D) bf16    fused q/k/v in-projection (already transposed)
    wout  : (NL, D, D)  bf16    attention out-projection
    wff1  : (NL, D, F)  bf16    FFN up-projection
    wff2  : (NL, F, D)  bf16    FFN down-projection
    b*    : (NL, 1, *)  f32     biases;  ln* : (NL, 1, D) f32 LayerNorm params
    lnf*  : (1, D)      f32     final LayerNorm of nn.TransformerEncoder
    o_ref : (BB, L, D)          output
    """
    BB, L, D = x_ref.shape
    Dh = D // nhead
    scale = 1.0 / math.sqrt(Dh)

    def layer_norm(v, g, b):
        mu = jnp.mean(v, axis=-1, keepdims=True)
        var = jnp.mean(jnp.square(v - mu), axis=-1, keepdims=True)
        return (v - mu) * jax.lax.rsqrt(var + eps) * g + b

    x = x_ref[...].astype(jnp.float32)                       # (BB, L, D)

    for layer in range(num_layers):                          # static unroll (NL=2)
        # ---------------- multi-head self-attention ----------------
        x2d = x.reshape(BB * L, D)
        qkv = jnp.dot(x2d.astype(jnp.bfloat16), wqkv_ref[layer],
                      preferred_element_type=jnp.float32) + bqkv_ref[layer]
        q = qkv[:, 0 * D:1 * D].reshape(BB, L, D)
        k = qkv[:, 1 * D:2 * D].reshape(BB, L, D)
        v = qkv[:, 2 * D:3 * D].reshape(BB, L, D)

        # concat_h(ctx_h) @ W_out  ==  sum_h ctx_h @ W_out[h*Dh:(h+1)*Dh, :]
        attn_out = jnp.zeros((BB * L, D), jnp.float32) + bout_ref[layer]
        for h in range(nhead):                               # static unroll (H=4)
            sl = slice(h * Dh, (h + 1) * Dh)
            qh = q[:, :, sl]                                 # (BB, L, Dh)
            kh = k[:, :, sl]
            vh = v[:, :, sl]
            s = jnp.einsum('bld,bmd->blm', qh, kh,
                           preferred_element_type=jnp.float32) * scale
            s = s - jnp.max(s, axis=-1, keepdims=True)       # stable softmax
            p = jnp.exp(s)
            p = p / jnp.sum(p, axis=-1, keepdims=True)
            ctx = jnp.einsum('blm,bmd->bld', p, vh,
                             preferred_element_type=jnp.float32)
            attn_out = attn_out + jnp.dot(
                ctx.reshape(BB * L, Dh).astype(jnp.bfloat16),
                wout_ref[layer][sl, :],
                preferred_element_type=jnp.float32)

        # TODO(synk): dropout (train mode) is identity here (inference semantics).
        x = layer_norm(x + attn_out.reshape(BB, L, D),
                       ln1g_ref[layer], ln1b_ref[layer])

        # ---------------- position-wise feed-forward ----------------
        x2d = x.reshape(BB * L, D)
        hdn = jnp.maximum(
            jnp.dot(x2d.astype(jnp.bfloat16), wff1_ref[layer],
                    preferred_element_type=jnp.float32) + bff1_ref[layer],
            0.0)                                             # relu
        ff = jnp.dot(hdn.astype(jnp.bfloat16), wff2_ref[layer],
                     preferred_element_type=jnp.float32) + bff2_ref[layer]
        x = layer_norm(x + ff.reshape(BB, L, D),
                       ln2g_ref[layer], ln2b_ref[layer])

    # final LayerNorm from nn.TransformerEncoder(norm=LayerNorm(D))
    x = layer_norm(x, lnfg_ref[...], lnfb_ref[...])
    o_ref[...] = x.astype(o_ref.dtype)


def _pick_block_b(B, L, target_rows=256):
    """Divisor of B: keep >=2 grid steps (megacore) while aiming for
    block_b*L >= target_rows of matmul M per grid step."""
    divisors = [d for d in range(1, B + 1) if B % d == 0]
    cands = [d for d in divisors if B // d >= 2] or divisors
    for d in cands:
        if d * L >= target_rows:
            return d
    return cands[-1]


def transformer_encode(x, params, *, nhead, eps=1e-5, block_b=None):
    """x: (B, L, D) f32. Returns (B, L, D)."""
    B, L, D = x.shape
    NL = params['wqkv'].shape[0]
    F = params['wff1'].shape[-1]
    if block_b is None:
        block_b = _pick_block_b(B, L)
    assert B % block_b == 0
    grid = (B // block_b,)

    weight_args = [
        params['wqkv'], params['bqkv'], params['wout'], params['bout'],
        params['wff1'], params['bff1'], params['wff2'], params['bff2'],
        params['ln1g'], params['ln1b'], params['ln2g'], params['ln2b'],
        params['lnfg'], params['lnfb'],
    ]

    def const_spec(arr):
        nd = arr.ndim
        return pl.BlockSpec(arr.shape, lambda i, _nd=nd: (0,) * _nd)

    in_specs = [pl.BlockSpec((block_b, L, D), lambda i: (i, 0, 0))]
    in_specs += [const_spec(a) for a in weight_args]
    out_spec = pl.BlockSpec((block_b, L, D), lambda i: (i, 0, 0))

    # Advisory cost estimate for XLA's scheduler.
    flops = int(B * L * NL * (2 * D * 3 * D + 2 * D * D + 4 * L * D + 4 * D * F))
    transcendentals = int(NL * nhead * B * L * L + B * L * (2 * NL + 1))
    bytes_accessed = int(2 * x.size * x.dtype.itemsize
                         + sum(int(a.size) * a.dtype.itemsize for a in weight_args))
    cost = pl.CostEstimate(flops=flops, transcendentals=transcendentals,
                           bytes_accessed=bytes_accessed)

    kernel = functools.partial(_transformer_encoder_kernel,
                               num_layers=NL, nhead=nhead, eps=eps)
    return pl.pallas_call(
        kernel,
        out_shape=jax.ShapeDtypeStruct((B, L, D), x.dtype),
        grid_spec=pltpu.PrefetchScalarGridSpec(
            num_scalar_prefetch=0,
            grid=grid,
            in_specs=in_specs,
            out_specs=out_spec,
        ),
        compiler_params=pltpu.CompilerParams(
            dimension_semantics=("parallel",)),
        cost_estimate=cost,
    )(x, *weight_args)


class TransformerEncodingPallas:
    """Pallas port of TransformerEncoding (TransformerEncoder x2 + final LN)."""

    def __init__(self, hidden_dim, nhead=4, num_layers=2, dim_feedforward=2048,
                 key=None):
        D, F, NL = hidden_dim, dim_feedforward, num_layers
        assert D % nhead == 0
        self.nhead = nhead
        key = jax.random.PRNGKey(0) if key is None else key
        ks = jax.random.split(key, 7)

        def uni(k, shape, bound):
            return jax.random.uniform(k, shape, jnp.float32,
                                      minval=-bound, maxval=bound)

        # Deterministic init with PyTorch-like scales (xavier for in_proj,
        # U(-1/sqrt(fan_in), 1/sqrt(fan_in)) for Linear layers, LN gamma=1/beta=0).
        self.params = dict(
            wqkv=uni(ks[0], (NL, D, 3 * D),
                     math.sqrt(6.0 / (D + 3 * D))).astype(jnp.bfloat16),
            bqkv=jnp.zeros((NL, 1, 3 * D), jnp.float32),
            wout=uni(ks[1], (NL, D, D), 1.0 / math.sqrt(D)).astype(jnp.bfloat16),
            bout=uni(ks[2], (NL, 1, D), 1.0 / math.sqrt(D)),
            wff1=uni(ks[3], (NL, D, F), 1.0 / math.sqrt(D)).astype(jnp.bfloat16),
            bff1=uni(ks[4], (NL, 1, F), 1.0 / math.sqrt(D)),
            wff2=uni(ks[5], (NL, F, D), 1.0 / math.sqrt(F)).astype(jnp.bfloat16),
            bff2=uni(ks[6], (NL, 1, D), 1.0 / math.sqrt(F)),
            ln1g=jnp.ones((NL, 1, D), jnp.float32),
            ln1b=jnp.zeros((NL, 1, D), jnp.float32),
            ln2g=jnp.ones((NL, 1, D), jnp.float32),
            ln2b=jnp.zeros((NL, 1, D), jnp.float32),
            lnfg=jnp.ones((1, D), jnp.float32),
            lnfb=jnp.zeros((1, D), jnp.float32),
        )

    def __call__(self, x, mask=None):
        # TODO(synk): src_key_padding_mask (mask != None) not wired into the
        # kernel; only mask=None is supported here.
        return transformer_encode(x, self.params, nhead=self.nhead)


def _reference(x, params, *, nhead, eps=1e-5):
    """Pure-JAX reference with identical math (incl. bf16 matmul inputs)."""
    B, L, D = x.shape
    NL = params['wqkv'].shape[0]
    Dh = D // nhead
    scale = 1.0 / math.sqrt(Dh)

    def layer_norm(v, g, b):
        mu = jnp.mean(v, axis=-1, keepdims=True)
        var = jnp.mean(jnp.square(v - mu), axis=-1, keepdims=True)
        return (v - mu) * jax.lax.rsqrt(var + eps) * g + b

    xf = x.astype(jnp.float32)
    for layer in range(NL):
        x2d = xf.reshape(B * L, D)
        qkv = jnp.dot(x2d.astype(jnp.bfloat16), params['wqkv'][layer],
                      preferred_element_type=jnp.float32) + params['bqkv'][layer]
        q = qkv[:, :D].reshape(B, L, D)
        k = qkv[:, D:2 * D].reshape(B, L, D)
        v = qkv[:, 2 * D:].reshape(B, L, D)
        attn_out = jnp.zeros((B * L, D), jnp.float32) + params['bout'][layer]
        for h in range(nhead):
            sl = slice(h * Dh, (h + 1) * Dh)
            s = jnp.einsum('bld,bmd->blm', q[:, :, sl], k[:, :, sl],
                           preferred_element_type=jnp.float32) * scale
            s = s - jnp.max(s, axis=-1, keepdims=True)
            p = jnp.exp(s)
            p = p / jnp.sum(p, axis=-1, keepdims=True)
            ctx = jnp.einsum('blm,bmd->bld', p, v[:, :, sl],
                             preferred_element_type=jnp.float32)
            attn_out = attn_out + jnp.dot(
                ctx.reshape(B * L, Dh).astype(jnp.bfloat16),
                params['wout'][layer][sl, :],
                preferred_element_type=jnp.float32)
        xf = layer_norm(xf + attn_out.reshape(B, L, D),
                        params['ln1g'][layer], params['ln1b'][layer])
        x2d = xf.reshape(B * L, D)
        hdn = jnp.maximum(
            jnp.dot(x2d.astype(jnp.bfloat16), params['wff1'][layer],
                    preferred_element_type=jnp.float32) + params['bff1'][layer],
            0.0)
        ff = jnp.dot(hdn.astype(jnp.bfloat16), params['wff2'][layer],
                     preferred_element_type=jnp.float32) + params['bff2'][layer]
        xf = layer_norm(xf + ff.reshape(B, L, D),
                        params['ln2g'][layer], params['ln2b'][layer])
    xf = layer_norm(xf, params['lnfg'], params['lnfb'])
    return xf.astype(x.dtype)


if __name__ == "__main__":
    B, L, hidden_dim, nhead = 2, 8, 32, 4
    key = jax.random.PRNGKey(0)
    x = jax.random.normal(key, (B, L, hidden_dim), jnp.float32)

    enc = TransformerEncodingPallas(hidden_dim, nhead=nhead, num_layers=2,
                                    key=jax.random.PRNGKey(0))
    out = jax.block_until_ready(enc(x))

    ref = _reference(x, enc.params, nhead=nhead)
    assert out.shape == (B, L, hidden_dim), out.shape
    assert jnp.allclose(out, ref, rtol=2e-2, atol=2e-2), \
        float(jnp.max(jnp.abs(out - ref)))

    print("KERNEL_OK")
</pallas_src>

<mosaic_0001>
module attributes {stable_mosaic.version = 11 : i64} {
  func.func @_transformer_encoder_kernel(%arg0: i32, %arg1: memref<1x8x32xf32, #tpu.memory_space<vmem>>, %arg2: memref<2x32x96xbf16, #tpu.memory_space<vmem>>, %arg3: memref<2x1x96xf32, #tpu.memory_space<vmem>>, %arg4: memref<2x32x32xbf16, #tpu.memory_space<vmem>>, %arg5: memref<2x1x32xf32, #tpu.memory_space<vmem>>, %arg6: memref<2x32x2048xbf16, #tpu.memory_space<vmem>>, %arg7: memref<2x1x2048xf32, #tpu.memory_space<vmem>>, %arg8: memref<2x2048x32xbf16, #tpu.memory_space<vmem>>, %arg9: memref<2x1x32xf32, #tpu.memory_space<vmem>>, %arg10: memref<2x1x32xf32, #tpu.memory_space<vmem>>, %arg11: memref<2x1x32xf32, #tpu.memory_space<vmem>>, %arg12: memref<2x1x32xf32, #tpu.memory_space<vmem>>, %arg13: memref<2x1x32xf32, #tpu.memory_space<vmem>>, %arg14: memref<1x32xf32, #tpu.memory_space<vmem>>, %arg15: memref<1x32xf32, #tpu.memory_space<vmem>>, %arg16: memref<1x8x32xf32, #tpu.memory_space<vmem>>) attributes {dimension_semantics = [#tpu.dimension_semantics<parallel>], iteration_bounds = array<i64: 2>, scalar_prefetch = 0 : i64, scratch_operands = 0 : i64, tpu.core_type = #tpu.core_type<tc>, window_params = [{transform_indices = @transform_0, window_bounds = array<i64: 1, 8, 32>}, {pipeline_mode = #tpu.pipeline_mode<synchronous>, transform_indices = @transform_1, window_bounds = array<i64: 2, 32, 96>}, {pipeline_mode = #tpu.pipeline_mode<synchronous>, transform_indices = @transform_2, window_bounds = array<i64: 2, 1, 96>}, {pipeline_mode = #tpu.pipeline_mode<synchronous>, transform_indices = @transform_3, window_bounds = array<i64: 2, 32, 32>}, {pipeline_mode = #tpu.pipeline_mode<synchronous>, transform_indices = @transform_4, window_bounds = array<i64: 2, 1, 32>}, {pipeline_mode = #tpu.pipeline_mode<synchronous>, transform_indices = @transform_5, window_bounds = array<i64: 2, 32, 2048>}, {pipeline_mode = #tpu.pipeline_mode<synchronous>, transform_indices = @transform_6, window_bounds = array<i64: 2, 1, 2048>}, {pipeline_mode = #tpu.pipeline_mode<synchronous>, transform_indices = @transform_7, window_bounds = array<i64: 2, 2048, 32>}, {pipeline_mode = #tpu.pipeline_mode<synchronous>, transform_indices = @transform_8, window_bounds = array<i64: 2, 1, 32>}, {pipeline_mode = #tpu.pipeline_mode<synchronous>, transform_indices = @transform_9, window_bounds = array<i64: 2, 1, 32>}, {pipeline_mode = #tpu.pipeline_mode<synchronous>, transform_indices = @transform_10, window_bounds = array<i64: 2, 1, 32>}, {pipeline_mode = #tpu.pipeline_mode<synchronous>, transform_indices = @transform_11, window_bounds = array<i64: 2, 1, 32>}, {pipeline_mode = #tpu.pipeline_mode<synchronous>, transform_indices = @transform_12, window_bounds = array<i64: 2, 1, 32>}, {pipeline_mode = #tpu.pipeline_mode<synchronous>, transform_indices = @transform_13, window_bounds = array<i64: 1, 32>}, {pipeline_mode = #tpu.pipeline_mode<synchronous>, transform_indices = @transform_14, window_bounds = array<i64: 1, 32>}, {transform_indices = @transform_15, window_bounds = array<i64: 1, 8, 32>}]} {
    %c0 = arith.constant 0 : index
    %c0_0 = arith.constant 0 : index
    %c0_1 = arith.constant 0 : index
    %0 = vector.load %arg1[%c0, %c0_0, %c0_1] : memref<1x8x32xf32, #tpu.memory_space<vmem>>, vector<1x8x32xf32>
    %1 = vector.shape_cast %0 : vector<1x8x32xf32> to vector<8x32xf32>
    %2 = arith.truncf %1 : vector<8x32xf32> to vector<8x32xbf16>
    %c0_2 = arith.constant 0 : index
    %c0_3 = arith.constant 0 : index
    %c0_4 = arith.constant 0 : index
    %3 = vector.load %arg2[%c0_2, %c0_3, %c0_4] : memref<2x32x96xbf16, #tpu.memory_space<vmem>>, vector<1x32x96xbf16>
    %4 = vector.shape_cast %3 : vector<1x32x96xbf16> to vector<32x96xbf16>
    %cst = arith.constant dense<0.000000e+00> : vector<8x96xf32>
    %5 = tpu.matmul %2, %4, %cst {dimension_numbers = #tpu.dot_dimension_numbers<[1], [0], [0], [1], [0, 0, 1, 1], [], []>} : vector<8x32xbf16>, vector<32x96xbf16>, vector<8x96xf32> -> vector<8x96xf32>
    %c0_5 = arith.constant 0 : index
    %c0_6 = arith.constant 0 : index
    %c0_7 = arith.constant 0 : index
    %6 = vector.load %arg3[%c0_5, %c0_6, %c0_7] : memref<2x1x96xf32, #tpu.memory_space<vmem>>, vector<1x1x96xf32>
    %7 = vector.shape_cast %6 : vector<1x1x96xf32> to vector<1x96xf32>
    %8 = vector.broadcast %7 : vector<1x96xf32> to vector<8x96xf32>
    %9 = arith.addf %5, %8 : vector<8x96xf32>
    %10 = vector.extract_strided_slice %9 {offsets = [0, 0], sizes = [8, 32], strides = [1, 1]} : vector<8x96xf32> to vector<8x32xf32>
    %11 = vector.shape_cast %10 : vector<8x32xf32> to vector<1x8x32xf32>
    %12 = vector.extract_strided_slice %9 {offsets = [0, 32], sizes = [8, 32], strides = [1, 1]} : vector<8x96xf32> to vector<8x32xf32>
    %13 = vector.shape_cast %12 : vector<8x32xf32> to vector<1x8x32xf32>
    %14 = vector.extract_strided_slice %9 {offsets = [0, 64], sizes = [8, 32], strides = [1, 1]} : vector<8x96xf32> to vector<8x32xf32>
    %15 = vector.shape_cast %14 : vector<8x32xf32> to vector<1x8x32xf32>
    %cst_8 = arith.constant 0.000000e+00 : f32
    %16 = vector.broadcast %cst_8 : f32 to vector<8x32xf32>
    %c0_9 = arith.constant 0 : index
    %c0_10 = arith.constant 0 : index
    %c0_11 = arith.constant 0 : index
    %17 = vector.load %arg5[%c0_9, %c0_10, %c0_11] : memref<2x1x32xf32, #tpu.memory_space<vmem>>, vector<1x1x32xf32>
    %18 = vector.shape_cast %17 : vector<1x1x32xf32> to vector<1x32xf32>
    %19 = vector.broadcast %18 : vector<1x32xf32> to vector<8x32xf32>
    %20 = arith.addf %16, %19 : vector<8x32xf32>
    %21 = vector.extract_strided_slice %11 {offsets = [0, 0, 0], sizes = [1, 8, 8], strides = [1, 1, 1]} : vector<1x8x32xf32> to vector<1x8x8xf32>
    %22 = vector.extract_strided_slice %13 {offsets = [0, 0, 0], sizes = [1, 8, 8], strides = [1, 1, 1]} : vector<1x8x32xf32> to vector<1x8x8xf32>
    %23 = vector.extract_strided_slice %15 {offsets = [0, 0, 0], sizes = [1, 8, 8], strides = [1, 1, 1]} : vector<1x8x32xf32> to vector<1x8x8xf32>
    "tpu.trace_start"() <{level = 10 : i32, message = "bld,bmd->blm"}> : () -> ()
    %cst_12 = arith.constant dense<0.000000e+00> : vector<1x8x8xf32>
    %24 = tpu.matmul %21, %22, %cst_12 {dimension_numbers = #tpu.dot_dimension_numbers<[2], [2], [1], [1], [0, 0, 0, 1, 1, 1], [0], [0]>} : vector<1x8x8xf32>, vector<1x8x8xf32>, vector<1x8x8xf32> -> vector<1x8x8xf32>
    "tpu.trace_stop"() : () -> ()
    %cst_13 = arith.constant 0.353553385 : f32
    %25 = vector.broadcast %cst_13 : f32 to vector<1x8x8xf32>
    %26 = arith.mulf %24, %25 : vector<1x8x8xf32>
    %cst_14 = arith.constant dense<0xFF800000> : vector<1x8xf32>
    %27 = vector.multi_reduction <maximumf>, %26, %cst_14 [2] : vector<1x8x8xf32> to vector<1x8xf32>
    %28 = vector.shape_cast %27 : vector<1x8xf32> to vector<1x8x1xf32>
    %29 = vector.broadcast %28 : vector<1x8x1xf32> to vector<1x8x8xf32>
    %30 = arith.subf %26, %29 : vector<1x8x8xf32>
    %31 = math.exp %30 : vector<1x8x8xf32>
    %cst_15 = arith.constant dense<0.000000e+00> : vector<1x8xf32>
    %32 = vector.multi_reduction <add>, %31, %cst_15 [2] : vector<1x8x8xf32> to vector<1x8xf32>
    %33 = vector.shape_cast %32 : vector<1x8xf32> to vector<1x8x1xf32>
    %34 = vector.broadcast %33 : vector<1x8x1xf32> to vector<1x8x8xf32>
    %35 = arith.divf %31, %34 : vector<1x8x8xf32>
    "tpu.trace_start"() <{level = 10 : i32, message = "blm,bmd->bld"}> : () -> ()
    %cst_16 = arith.constant dense<0.000000e+00> : vector<1x8x8xf32>
    %36 = tpu.matmul %35, %23, %cst_16 {dimension_numbers = #tpu.dot_dimension_numbers<[2], [1], [1], [2], [0, 0, 0, 1, 1, 2], [0], [0]>} : vector<1x8x8xf32>, vector<1x8x8xf32>, vector<1x8x8xf32> -> vector<1x8x8xf32>
    "tpu.trace_stop"() : () -> ()
    %37 = vector.shape_cast %36 : vector<1x8x8xf32> to vector<8x8xf32>
    %38 = arith.truncf %37 : vector<8x8xf32> to vector<8x8xbf16>
    %c0_17 = arith.constant 0 : index
    %c0_18 = arith.constant 0 : index
    %c0_19 = arith.constant 0 : index
    %39 = vector.load %arg4[%c0_17, %c0_18, %c0_19] : memref<2x32x32xbf16, #tpu.memory_space<vmem>>, vector<1x32x32xbf16>
    %40 = vector.shape_cast %39 : vector<1x32x32xbf16> to vector<32x32xbf16>
    %41 = vector.extract_strided_slice %40 {offsets = [0, 0], sizes = [8, 32], strides = [1, 1]} : vector<32x32xbf16> to vector<8x32xbf16>
    %cst_20 = arith.constant dense<0.000000e+00> : vector<8x32xf32>
    %42 = tpu.matmul %38, %41, %cst_20 {dimension_numbers = #tpu.dot_dimension_numbers<[1], [0], [0], [1], [0, 0, 1, 1], [], []>} : vector<8x8xbf16>, vector<8x32xbf16>, vector<8x32xf32> -> vector<8x32xf32>
    %43 = arith.addf %20, %42 : vector<8x32xf32>
    %44 = vector.extract_strided_slice %11 {offsets = [0, 0, 8], sizes = [1, 8, 8], strides = [1, 1, 1]} : vector<1x8x32xf32> to vector<1x8x8xf32>
    %45 = vector.extract_strided_slice %13 {offsets = [0, 0, 8], sizes = [1, 8, 8], strides = [1, 1, 1]} : vector<1x8x32xf32> to vector<1x8x8xf32>
    %46 = vector.extract_strided_slice %15 {offsets = [0, 0, 8], sizes = [1, 8, 8], strides = [1, 1, 1]} : vector<1x8x32xf32> to vector<1x8x8xf32>
    "tpu.trace_start"() <{level = 10 : i32, message = "bld,bmd->blm"}> : () -> ()
    %cst_21 = arith.constant dense<0.000000e+00> : vector<1x8x8xf32>
    %47 = tpu.matmul %44, %45, %cst_21 {dimension_numbers = #tpu.dot_dimension_numbers<[2], [2], [1], [1], [0, 0, 0, 1, 1, 1], [0], [0]>} : vector<1x8x8xf32>, vector<1x8x8xf32>, vector<1x8x8xf32> -> vector<1x8x8xf32>
    "tpu.trace_stop"() : () -> ()
    %cst_22 = arith.constant 0.353553385 : f32
    %48 = vector.broadcast %cst_22 : f32 to vector<1x8x8xf32>
    %49 = arith.mulf %47, %48 : vector<1x8x8xf32>
    %cst_23 = arith.constant dense<0xFF800000> : vector<1x8xf32>
    %50 = vector.multi_reduction <maximumf>, %49, %cst_23 [2] : vector<1x8x8xf32> to vector<1x8xf32>
    %51 = vector.shape_cast %50 : vector<1x8xf32> to vector<1x8x1xf32>
    %52 = vector.broadcast %51 : vector<1x8x1xf32> to vector<1x8x8xf32>
    %53 = arith.subf %49, %52 : vector<1x8x8xf32>
    %54 = math.exp %53 : vector<1x8x8xf32>
    %cst_24 = arith.constant dense<0.000000e+00> : vector<1x8xf32>
    %55 = vector.multi_reduction <add>, %54, %cst_24 [2] : vector<1x8x8xf32> to vector<1x8xf32>
    %56 = vector.shape_cast %55 : vector<1x8xf32> to vector<1x8x1xf32>
    %57 = vector.broadcast %56 : vector<1x8x1xf32> to vector<1x8x8xf32>
    %58 = arith.divf %54, %57 : vector<1x8x8xf32>
    "tpu.trace_start"() <{level = 10 : i32, message = "blm,bmd->bld"}> : () -> ()
    %cst_25 = arith.constant dense<0.000000e+00> : vector<1x8x8xf32>
    %59 = tpu.matmul %58, %46, %cst_25 {dimension_numbers = #tpu.dot_dimension_numbers<[2], [1], [1], [2], [0, 0, 0, 1, 1, 2], [0], [0]>} : vector<1x8x8xf32>, vector<1x8x8xf32>, vector<1x8x8xf32> -> vector<1x8x8xf32>
    "tpu.trace_stop"() : () -> ()
    %60 = vector.shape_cast %59 : vector<1x8x8xf32> to vector<8x8xf32>
    %61 = arith.truncf %60 : vector<8x8xf32> to vector<8x8xbf16>
    %c0_26 = arith.constant 0 : index
    %c0_27 = arith.constant 0 : index
    %c0_28 = arith.constant 0 : index
    %62 = vector.load %arg4[%c0_26, %c0_27, %c0_28] : memref<2x32x32xbf16, #tpu.memory_space<vmem>>, vector<1x32x32xbf16>
    %63 = vector.shape_cast %62 : vector<1x32x32xbf16> to vector<32x32xbf16>
    %64 = vector.extract_strided_slice %63 {offsets = [8, 0], sizes = [8, 32], strides = [1, 1]} : vector<32x32xbf16> to vector<8x32xbf16>
    %cst_29 = arith.constant dense<0.000000e+00> : vector<8x32xf32>
    %65 = tpu.matmul %61, %64, %cst_29 {dimension_numbers = #tpu.dot_dimension_numbers<[1], [0], [0], [1], [0, 0, 1, 1], [], []>} : vector<8x8xbf16>, vector<8x32xbf16>, vector<8x32xf32> -> vector<8x32xf32>
    %66 = arith.addf %43, %65 : vector<8x32xf32>
    %67 = vector.extract_strided_slice %11 {offsets = [0, 0, 16], sizes = [1, 8, 8], strides = [1, 1, 1]} : vector<1x8x32xf32> to vector<1x8x8xf32>
    %68 = vector.extract_strided_slice %13 {offsets = [0, 0, 16], sizes = [1, 8, 8], strides = [1, 1, 1]} : vector<1x8x32xf32> to vector<1x8x8xf32>
    %69 = vector.extract_strided_slice %15 {offsets = [0, 0, 16], sizes = [1, 8, 8], strides = [1, 1, 1]} : vector<1x8x32xf32> to vector<1x8x8xf32>
    "tpu.trace_start"() <{level = 10 : i32, message = "bld,bmd->blm"}> : () -> ()
    %cst_30 = arith.constant dense<0.000000e+00> : vector<1x8x8xf32>
    %70 = tpu.matmul %67, %68, %cst_30 {dimension_numbers = #tpu.dot_dimension_numbers<[2], [2], [1], [1], [0, 0, 0, 1, 1, 1], [0], [0]>} : vector<1x8x8xf32>, vector<1x8x8xf32>, vector<1x8x8xf32> -> vector<1x8x8xf32>
    "tpu.trace_stop"() : () -> ()
    %cst_31 = arith.constant 0.353553385 : f32
    %71 = vector.broadcast %cst_31 : f32 to vector<1x8x8xf32>
    %72 = arith.mulf %70, %71 : vector<1x8x8xf32>
    %cst_32 = arith.constant dense<0xFF800000> : vector<1x8xf32>
    %73 = vector.multi_reduction <maximumf>, %72, %cst_32 [2] : vector<1x8x8xf32> to vector<1x8xf32>
    %74 = vector.shape_cast %73 : vector<1x8xf32> to vector<1x8x1xf32>
    %75 = vector.broadcast %74 : vector<1x8x1xf32> to vector<1x8x8xf32>
    %76 = arith.subf %72, %75 : vector<1x8x8xf32>
    %77 = math.exp %76 : vector<1x8x8xf32>
    %cst_33 = arith.constant dense<0.000000e+00> : vector<1x8xf32>
    %78 = vector.multi_reduction <add>, %77, %cst_33 [2] : vector<1x8x8xf32> to vector<1x8xf32>
    %79 = vector.shape_cast %78 : vector<1x8xf32> to vector<1x8x1xf32>
    %80 = vector.broadcast %79 : vector<1x8x1xf32> to vector<1x8x8xf32>
    %81 = arith.divf %77, %80 : vector<1x8x8xf32>
    "tpu.trace_start"() <{level = 10 : i32, message = "blm,bmd->bld"}> : () -> ()
    %cst_34 = arith.constant dense<0.000000e+00> : vector<1x8x8xf32>
    %82 = tpu.matmul %81, %69, %cst_34 {dimension_numbers = #tpu.dot_dimension_numbers<[2], [1], [1], [2], [0, 0, 0, 1, 1, 2], [0], [0]>} : vector<1x8x8xf32>, vector<1x8x8xf32>, vector<1x8x8xf32> -> vector<1x8x8xf32>
    "tpu.trace_stop"() : () -> ()
    %83 = vector.shape_cast %82 : vector<1x8x8xf32> to vector<8x8xf32>
    %84 = arith.truncf %83 : vector<8x8xf32> to vector<8x8xbf16>
    %c0_35 = arith.constant 0 : index
    %c0_36 = arith.constant 0 : index
    %c0_37 = arith.constant 0 : index
    %85 = vector.load %arg4[%c0_35, %c0_36, %c0_37] : memref<2x32x32xbf16, #tpu.memory_space<vmem>>, vector<1x32x32xbf16>
    %86 = vector.shape_cast %85 : vector<1x32x32xbf16> to vector<32x32xbf16>
    %87 = vector.extract_strided_slice %86 {offsets = [16, 0], sizes = [8, 32], strides = [1, 1]} : vector<32x32xbf16> to vector<8x32xbf16>
    %cst_38 = arith.constant dense<0.000000e+00> : vector<8x32xf32>
    %88 = tpu.matmul %84, %87, %cst_38 {dimension_numbers = #tpu.dot_dimension_numbers<[1], [0], [0], [1], [0, 0, 1, 1], [], []>} : vector<8x8xbf16>, vector<8x32xbf16>, vector<8x32xf32> -> vector<8x32xf32>
    %89 = arith.addf %66, %88 : vector<8x32xf32>
    %90 = vector.extract_strided_slice %11 {offsets = [0, 0, 24], sizes = [1, 8, 8], strides = [1, 1, 1]} : vector<1x8x32xf32> to vector<1x8x8xf32>
    %91 = vector.extract_strided_slice %13 {offsets = [0, 0, 24], sizes = [1, 8, 8], strides = [1, 1, 1]} : vector<1x8x32xf32> to vector<1x8x8xf32>
    %92 = vector.extract_strided_slice %15 {offsets = [0, 0, 24], sizes = [1, 8, 8], strides = [1, 1, 1]} : vector<1x8x32xf32> to vector<1x8x8xf32>
    "tpu.trace_start"() <{level = 10 : i32, message = "bld,bmd->blm"}> : () -> ()
    %cst_39 = arith.constant dense<0.000000e+00> : vector<1x8x8xf32>
    %93 = tpu.matmul %90, %91, %cst_39 {dimension_numbers = #tpu.dot_dimension_numbers<[2], [2], [1], [1], [0, 0, 0, 1, 1, 1], [0], [0]>} : vector<1x8x8xf32>, vector<1x8x8xf32>, vector<1x8x8xf32> -> vector<1x8x8xf32>
    "tpu.trace_stop"() : () -> ()
    %cst_40 = arith.constant 0.353553385 : f32
    %94 = vector.broadcast %cst_40 : f32 to vector<1x8x8xf32>
    %95 = arith.mulf %93, %94 : vector<1x8x8xf32>
    %cst_41 = arith.constant dense<0xFF800000> : vector<1x8xf32>
    %96 = vector.multi_reduction <maximumf>, %95, %cst_41 [2] : vector<1x8x8xf32> to vector<1x8xf32>
    %97 = vector.shape_cast %96 : vector<1x8xf32> to vector<1x8x1xf32>
    %98 = vector.broadcast %97 : vector<1x8x1xf32> to vector<1x8x8xf32>
    %99 = arith.subf %95, %98 : vector<1x8x8xf32>
    %100 = math.exp %99 : vector<1x8x8xf32>
    %cst_42 = arith.constant dense<0.000000e+00> : vector<1x8xf32>
    %101 = vector.multi_reduction <add>, %100, %cst_42 [2] : vector<1x8x8xf32> to vector<1x8xf32>
    %102 = vector.shape_cast %101 : vector<1x8xf32> to vector<1x8x1xf32>
    %103 = vector.broadcast %102 : vector<1x8x1xf32> to vector<1x8x8xf32>
    %104 = arith.divf %100, %103 : vector<1x8x8xf32>
    "tpu.trace_start"() <{level = 10 : i32, message = "blm,bmd->bld"}> : () -> ()
    %cst_43 = arith.constant dense<0.000000e+00> : vector<1x8x8xf32>
    %105 = tpu.matmul %104, %92, %cst_43 {dimension_numbers = #tpu.dot_dimension_numbers<[2], [1], [1], [2], [0, 0, 0, 1, 1, 2], [0], [0]>} : vector<1x8x8xf32>, vector<1x8x8xf32>, vector<1x8x8xf32> -> vector<1x8x8xf32>
    "tpu.trace_stop"() : () -> ()
    %106 = vector.shape_cast %105 : vector<1x8x8xf32> to vector<8x8xf32>
    %107 = arith.truncf %106 : vector<8x8xf32> to vector<8x8xbf16>
    %c0_44 = arith.constant 0 : index
    %c0_45 = arith.constant 0 : index
    %c0_46 = arith.constant 0 : index
    %108 = vector.load %arg4[%c0_44, %c0_45, %c0_46] : memref<2x32x32xbf16, #tpu.memory_space<vmem>>, vector<1x32x32xbf16>
    %109 = vector.shape_cast %108 : vector<1x32x32xbf16> to vector<32x32xbf16>
    %110 = vector.extract_strided_slice %109 {offsets = [24, 0], sizes = [8, 32], strides = [1, 1]} : vector<32x32xbf16> to vector<8x32xbf16>
    %cst_47 = arith.constant dense<0.000000e+00> : vector<8x32xf32>
    %111 = tpu.matmul %107, %110, %cst_47 {dimension_numbers = #tpu.dot_dimension_numbers<[1], [0], [0], [1], [0, 0, 1, 1], [], []>} : vector<8x8xbf16>, vector<8x32xbf16>, vector<8x32xf32> -> vector<8x32xf32>
    %112 = arith.addf %89, %111 : vector<8x32xf32>
    %113 = vector.shape_cast %112 : vector<8x32xf32> to vector<1x8x32xf32>
    %114 = arith.addf %0, %113 : vector<1x8x32xf32>
    %c0_48 = arith.constant 0 : index
    %c0_49 = arith.constant 0 : index
    %c0_50 = arith.constant 0 : index
    %115 = vector.load %arg10[%c0_48, %c0_49, %c0_50] : memref<2x1x32xf32, #tpu.memory_space<vmem>>, vector<1x1x32xf32>
    %116 = vector.shape_cast %115 : vector<1x1x32xf32> to vector<1x32xf32>
    %c0_51 = arith.constant 0 : index
    %c0_52 = arith.constant 0 : index
    %c0_53 = arith.constant 0 : index
    %117 = vector.load %arg11[%c0_51, %c0_52, %c0_53] : memref<2x1x32xf32, #tpu.memory_space<vmem>>, vector<1x1x32xf32>
    %118 = vector.shape_cast %117 : vector<1x1x32xf32> to vector<1x32xf32>
    %cst_54 = arith.constant dense<0.000000e+00> : vector<1x8xf32>
    %119 = vector.multi_reduction <add>, %114, %cst_54 [2] : vector<1x8x32xf32> to vector<1x8xf32>
    %120 = vector.shape_cast %119 : vector<1x8xf32> to vector<1x8x1xf32>
    %cst_55 = arith.constant 3.200000e+01 : f32
    %121 = vector.broadcast %cst_55 : f32 to vector<1x8x1xf32>
    %122 = arith.divf %120, %121 : vector<1x8x1xf32>
    %123 = vector.broadcast %122 : vector<1x8x1xf32> to vector<1x8x32xf32>
    %124 = arith.subf %114, %123 : vector<1x8x32xf32>
    %125 = arith.mulf %124, %124 : vector<1x8x32xf32>
    %cst_56 = arith.constant dense<0.000000e+00> : vector<1x8xf32>
    %126 = vector.multi_reduction <add>, %125, %cst_56 [2] : vector<1x8x32xf32> to vector<1x8xf32>
    %127 = vector.shape_cast %126 : vector<1x8xf32> to vector<1x8x1xf32>
    %cst_57 = arith.constant 3.200000e+01 : f32
    %128 = vector.broadcast %cst_57 : f32 to vector<1x8x1xf32>
    %129 = arith.divf %127, %128 : vector<1x8x1xf32>
    %130 = vector.broadcast %122 : vector<1x8x1xf32> to vector<1x8x32xf32>
    %131 = arith.subf %114, %130 : vector<1x8x32xf32>
    %cst_58 = arith.constant 9.99999974E-6 : f32
    %132 = vector.broadcast %cst_58 : f32 to vector<1x8x1xf32>
    %133 = arith.addf %129, %132 : vector<1x8x1xf32>
    %134 = math.rsqrt %133 : vector<1x8x1xf32>
    %135 = vector.broadcast %134 : vector<1x8x1xf32> to vector<1x8x32xf32>
    %136 = arith.mulf %131, %135 : vector<1x8x32xf32>
    %137 = vector.shape_cast %116 : vector<1x32xf32> to vector<1x1x32xf32>
    %138 = vector.broadcast %137 : vector<1x1x32xf32> to vector<1x8x32xf32>
    %139 = arith.mulf %136, %138 : vector<1x8x32xf32>
    %140 = vector.shape_cast %118 : vector<1x32xf32> to vector<1x1x32xf32>
    %141 = vector.broadcast %140 : vector<1x1x32xf32> to vector<1x8x32xf32>
    %142 = arith.addf %139, %141 : vector<1x8x32xf32>
    %143 = vector.shape_cast %142 : vector<1x8x32xf32> to vector<8x32xf32>
    %144 = arith.truncf %143 : vector<8x32xf32> to vector<8x32xbf16>
    %c0_59 = arith.constant 0 : index
    %c0_60 = arith.constant 0 : index
    %c0_61 = arith.constant 0 : index
    %145 = vector.load %arg6[%c0_59, %c0_60, %c0_61] : memref<2x32x2048xbf16, #tpu.memory_space<vmem>>, vector<1x32x2048xbf16>
    %146 = vector.shape_cast %145 : vector<1x32x2048xbf16> to vector<32x2048xbf16>
    %cst_62 = arith.constant dense<0.000000e+00> : vector<8x2048xf32>
    %147 = tpu.matmul %144, %146, %cst_62 {dimension_numbers = #tpu.dot_dimension_numbers<[1], [0], [0], [1], [0, 0, 1, 1], [], []>} : vector<8x32xbf16>, vector<32x2048xbf16>, vector<8x2048xf32> -> vector<8x2048xf32>
    %c0_63 = arith.constant 0 : index
    %c0_64 = arith.constant 0 : index
    %c0_65 = arith.constant 0 : index
    %148 = vector.load %arg7[%c0_63, %c0_64, %c0_65] : memref<2x1x2048xf32, #tpu.memory_space<vmem>>, vector<1x1x2048xf32>
    %149 = vector.shape_cast %148 : vector<1x1x2048xf32> to vector<1x2048xf32>
    %150 = vector.broadcast %149 : vector<1x2048xf32> to vector<8x2048xf32>
    %151 = arith.addf %147, %150 : vector<8x2048xf32>
    %cst_66 = arith.constant 0.000000e+00 : f32
    %152 = vector.broadcast %cst_66 : f32 to vector<8x2048xf32>
    %153 = arith.maximumf %151, %152 : vector<8x2048xf32>
    %154 = arith.truncf %153 : vector<8x2048xf32> to vector<8x2048xbf16>
    %c0_67 = arith.constant 0 : index
    %c0_68 = arith.constant 0 : index
    %c0_69 = arith.constant 0 : index
    %155 = vector.load %arg8[%c0_67, %c0_68, %c0_69] : memref<2x2048x32xbf16, #tpu.memory_space<vmem>>, vector<1x2048x32xbf16>
    %156 = vector.shape_cast %155 : vector<1x2048x32xbf16> to vector<2048x32xbf16>
    %cst_70 = arith.constant dense<0.000000e+00> : vector<8x32xf32>
    %157 = tpu.matmul %154, %156, %cst_70 {dimension_numbers = #tpu.dot_dimension_numbers<[1], [0], [0], [1], [0, 0, 1, 1], [], []>} : vector<8x2048xbf16>, vector<2048x32xbf16>, vector<8x32xf32> -> vector<8x32xf32>
    %c0_71 = arith.constant 0 : index
    %c0_72 = arith.constant 0 : index
    %c0_73 = arith.constant 0 : index
    %158 = vector.load %arg9[%c0_71, %c0_72, %c0_73] : memref<2x1x32xf32, #tpu.memory_space<vmem>>, vector<1x1x32xf32>
    %159 = vector.shape_cast %158 : vector<1x1x32xf32> to vector<1x32xf32>
    %160 = vector.broadcast %159 : vector<1x32xf32> to vector<8x32xf32>
    %161 = arith.addf %157, %160 : vector<8x32xf32>
    %162 = vector.shape_cast %161 : vector<8x32xf32> to vector<1x8x32xf32>
    %163 = arith.addf %142, %162 : vector<1x8x32xf32>
    %c0_74 = arith.constant 0 : index
    %c0_75 = arith.constant 0 : index
    %c0_76 = arith.constant 0 : index
    %164 = vector.load %arg12[%c0_74, %c0_75, %c0_76] : memref<2x1x32xf32, #tpu.memory_space<vmem>>, vector<1x1x32xf32>
    %165 = vector.shape_cast %164 : vector<1x1x32xf32> to vector<1x32xf32>
    %c0_77 = arith.constant 0 : index
    %c0_78 = arith.constant 0 : index
    %c0_79 = arith.constant 0 : index
    %166 = vector.load %arg13[%c0_77, %c0_78, %c0_79] : memref<2x1x32xf32, #tpu.memory_space<vmem>>, vector<1x1x32xf32>
    %167 = vector.shape_cast %166 : vector<1x1x32xf32> to vector<1x32xf32>
    %cst_80 = arith.constant dense<0.000000e+00> : vector<1x8xf32>
    %168 = vector.multi_reduction <add>, %163, %cst_80 [2] : vector<1x8x32xf32> to vector<1x8xf32>
    %169 = vector.shape_cast %168 : vector<1x8xf32> to vector<1x8x1xf32>
    %cst_81 = arith.constant 3.200000e+01 : f32
    %170 = vector.broadcast %cst_81 : f32 to vector<1x8x1xf32>
    %171 = arith.divf %169, %170 : vector<1x8x1xf32>
    %172 = vector.broadcast %171 : vector<1x8x1xf32> to vector<1x8x32xf32>
    %173 = arith.subf %163, %172 : vector<1x8x32xf32>
    %174 = arith.mulf %173, %173 : vector<1x8x32xf32>
    %cst_82 = arith.constant dense<0.000000e+00> : vector<1x8xf32>
    %175 = vector.multi_reduction <add>, %174, %cst_82 [2] : vector<1x8x32xf32> to vector<1x8xf32>
    %176 = vector.shape_cast %175 : vector<1x8xf32> to vector<1x8x1xf32>
    %cst_83 = arith.constant 3.200000e+01 : f32
    %177 = vector.broadcast %cst_83 : f32 to vector<1x8x1xf32>
    %178 = arith.divf %176, %177 : vector<1x8x1xf32>
    %179 = vector.broadcast %171 : vector<1x8x1xf32> to vector<1x8x32xf32>
    %180 = arith.subf %163, %179 : vector<1x8x32xf32>
    %cst_84 = arith.constant 9.99999974E-6 : f32
    %181 = vector.broadcast %cst_84 : f32 to vector<1x8x1xf32>
    %182 = arith.addf %178, %181 : vector<1x8x1xf32>
    %183 = math.rsqrt %182 : vector<1x8x1xf32>
    %184 = vector.broadcast %183 : vector<1x8x1xf32> to vector<1x8x32xf32>
    %185 = arith.mulf %180, %184 : vector<1x8x32xf32>
    %186 = vector.shape_cast %165 : vector<1x32xf32> to vector<1x1x32xf32>
    %187 = vector.broadcast %186 : vector<1x1x32xf32> to vector<1x8x32xf32>
    %188 = arith.mulf %185, %187 : vector<1x8x32xf32>
    %189 = vector.shape_cast %167 : vector<1x32xf32> to vector<1x1x32xf32>
    %190 = vector.broadcast %189 : vector<1x1x32xf32> to vector<1x8x32xf32>
    %191 = arith.addf %188, %190 : vector<1x8x32xf32>
    %192 = vector.shape_cast %191 : vector<1x8x32xf32> to vector<8x32xf32>
    %193 = arith.truncf %192 : vector<8x32xf32> to vector<8x32xbf16>
    %c1 = arith.constant 1 : index
    %c0_85 = arith.constant 0 : index
    %c0_86 = arith.constant 0 : index
    %194 = vector.load %arg2[%c1, %c0_85, %c0_86] : memref<2x32x96xbf16, #tpu.memory_space<vmem>>, vector<1x32x96xbf16>
    %195 = vector.shape_cast %194 : vector<1x32x96xbf16> to vector<32x96xbf16>
    %cst_87 = arith.constant dense<0.000000e+00> : vector<8x96xf32>
    %196 = tpu.matmul %193, %195, %cst_87 {dimension_numbers = #tpu.dot_dimension_numbers<[1], [0], [0], [1], [0, 0, 1, 1], [], []>} : vector<8x32xbf16>, vector<32x96xbf16>, vector<8x96xf32> -> vector<8x96xf32>
    %c1_88 = arith.constant 1 : index
    %c0_89 = arith.constant 0 : index
    %c0_90 = arith.constant 0 : index
    %197 = vector.load %arg3[%c1_88, %c0_89, %c0_90] : memref<2x1x96xf32, #tpu.memory_space<vmem>>, vector<1x1x96xf32>
    %198 = vector.shape_cast %197 : vector<1x1x96xf32> to vector<1x96xf32>
    %199 = vector.broadcast %198 : vector<1x96xf32> to vector<8x96xf32>
    %200 = arith.addf %196, %199 : vector<8x96xf32>
    %201 = vector.extract_strided_slice %200 {offsets = [0, 0], sizes = [8, 32], strides = [1, 1]} : vector<8x96xf32> to vector<8x32xf32>
    %202 = vector.shape_cast %201 : vector<8x32xf32> to vector<1x8x32xf32>
    %203 = vector.extract_strided_slice %200 {offsets = [0, 32], sizes = [8, 32], strides = [1, 1]} : vector<8x96xf32> to vector<8x32xf32>
    %204 = vector.shape_cast %203 : vector<8x32xf32> to vector<1x8x32xf32>
    %205 = vector.extract_strided_slice %200 {offsets = [0, 64], sizes = [8, 32], strides = [1, 1]} : vector<8x96xf32> to vector<8x32xf32>
    %206 = vector.shape_cast %205 : vector<8x32xf32> to vector<1x8x32xf32>
    %cst_91 = arith.constant 0.000000e+00 : f32
    %207 = vector.broadcast %cst_91 : f32 to vector<8x32xf32>
    %c1_92 = arith.constant 1 : index
    %c0_93 = arith.constant 0 : index
    %c0_94 = arith.constant 0 : index
    %208 = vector.load %arg5[%c1_92, %c0_93, %c0_94] : memref<2x1x32xf32, #tpu.memory_space<vmem>>, vector<1x1x32xf32>
    %209 = vector.shape_cast %208 : vector<1x1x32xf32> to vector<1x32xf32>
    %210 = vector.broadcast %209 : vector<1x32xf32> to vector<8x32xf32>
    %211 = arith.addf %207, %210 : vector<8x32xf32>
    %212 = vector.extract_strided_slice %202 {offsets = [0, 0, 0], sizes = [1, 8, 8], strides = [1, 1, 1]} : vector<1x8x32xf32> to vector<1x8x8xf32>
    %213 = vector.extract_strided_slice %204 {offsets = [0, 0, 0], sizes = [1, 8, 8], strides = [1, 1, 1]} : vector<1x8x32xf32> to vector<1x8x8xf32>
    %214 = vector.extract_strided_slice %206 {offsets = [0, 0, 0], sizes = [1, 8, 8], strides = [1, 1, 1]} : vector<1x8x32xf32> to vector<1x8x8xf32>
    "tpu.trace_start"() <{level = 10 : i32, message = "bld,bmd->blm"}> : () -> ()
    %cst_95 = arith.constant dense<0.000000e+00> : vector<1x8x8xf32>
    %215 = tpu.matmul %212, %213, %cst_95 {dimension_numbers = #tpu.dot_dimension_numbers<[2], [2], [1], [1], [0, 0, 0, 1, 1, 1], [0], [0]>} : vector<1x8x8xf32>, vector<1x8x8xf32>, vector<1x8x8xf32> -> vector<1x8x8xf32>
    "tpu.trace_stop"() : () -> ()
    %cst_96 = arith.constant 0.353553385 : f32
    %216 = vector.broadcast %cst_96 : f32 to vector<1x8x8xf32>
    %217 = arith.mulf %215, %216 : vector<1x8x8xf32>
    %cst_97 = arith.constant dense<0xFF800000> : vector<1x8xf32>
    %218 = vector.multi_reduction <maximumf>, %217, %cst_97 [2] : vector<1x8x8xf32> to vector<1x8xf32>
    %219 = vector.shape_cast %218 : vector<1x8xf32> to vector<1x8x1xf32>
    %220 = vector.broadcast %219 : vector<1x8x1xf32> to vector<1x8x8xf32>
    %221 = arith.subf %217, %220 : vector<1x8x8xf32>
    %222 = math.exp %221 : vector<1x8x8xf32>
    %cst_98 = arith.constant dense<0.000000e+00> : vector<1x8xf32>
    %223 = vector.multi_reduction <add>, %222, %cst_98 [2] : vector<1x8x8xf32> to vector<1x8xf32>
    %224 = vector.shape_cast %223 : vector<1x8xf32> to vector<1x8x1xf32>
    %225 = vector.broadcast %224 : vector<1x8x1xf32> to vector<1x8x8xf32>
    %226 = arith.divf %222, %225 : vector<1x8x8xf32>
    "tpu.trace_start"() <{level = 10 : i32, message = "blm,bmd->bld"}> : () -> ()
    %cst_99 = arith.constant dense<0.000000e+00> : vector<1x8x8xf32>
    %227 = tpu.matmul %226, %214, %cst_99 {dimension_numbers = #tpu.dot_dimension_numbers<[2], [1], [1], [2], [0, 0, 0, 1, 1, 2], [0], [0]>} : vector<1x8x8xf32>, vector<1x8x8xf32>, vector<1x8x8xf32> -> vector<1x8x8xf32>
    "tpu.trace_stop"() : () -> ()
    %228 = vector.shape_cast %227 : vector<1x8x8xf32> to vector<8x8xf32>
    %229 = arith.truncf %228 : vector<8x8xf32> to vector<8x8xbf16>
    %c1_100 = arith.constant 1 : index
    %c0_101 = arith.constant 0 : index
    %c0_102 = arith.constant 0 : index
    %230 = vector.load %arg4[%c1_100, %c0_101, %c0_102] : memref<2x32x32xbf16, #tpu.memory_space<vmem>>, vector<1x32x32xbf16>
    %231 = vector.shape_cast %230 : vector<1x32x32xbf16> to vector<32x32xbf16>
    %232 = vector.extract_strided_slice %231 {offsets = [0, 0], sizes = [8, 32], strides = [1, 1]} : vector<32x32xbf16> to vector<8x32xbf16>
    %cst_103 = arith.constant dense<0.000000e+00> : vector<8x32xf32>
    %233 = tpu.matmul %229, %232, %cst_103 {dimension_numbers = #tpu.dot_dimension_numbers<[1], [0], [0], [1], [0, 0, 1, 1], [], []>} : vector<8x8xbf16>, vector<8x32xbf16>, vector<8x32xf32> -> vector<8x32xf32>
    %234 = arith.addf %211, %233 : vector<8x32xf32>
    %235 = vector.extract_strided_slice %202 {offsets = [0, 0, 8], sizes = [1, 8, 8], strides = [1, 1, 1]} : vector<1x8x32xf32> to vector<1x8x8xf32>
    %236 = vector.extract_strided_slice %204 {offsets = [0, 0, 8], sizes = [1, 8, 8], strides = [1, 1, 1]} : vector<1x8x32xf32> to vector<1x8x8xf32>
    %237 = vector.extract_strided_slice %206 {offsets = [0, 0, 8], sizes = [1, 8, 8], strides = [1, 1, 1]} : vector<1x8x32xf32> to vector<1x8x8xf32>
    "tpu.trace_start"() <{level = 10 : i32, message = "bld,bmd->blm"}> : () -> ()
    %cst_104 = arith.constant dense<0.000000e+00> : vector<1x8x8xf32>
    %238 = tpu.matmul %235, %236, %cst_104 {dimension_numbers = #tpu.dot_dimension_numbers<[2], [2], [1], [1], [0, 0, 0, 1, 1, 1], [0], [0]>} : vector<1x8x8xf32>, vector<1x8x8xf32>, vector<1x8x8xf32> -> vector<1x8x8xf32>
    "tpu.trace_stop"() : () -> ()
    %cst_105 = arith.constant 0.353553385 : f32
    %239 = vector.broadcast %cst_105 : f32 to vector<1x8x8xf32>
    %240 = arith.mulf %238, %239 : vector<1x8x8xf32>
    %cst_106 = arith.constant dense<0xFF800000> : vector<1x8xf32>
    %241 = vector.multi_reduction <maximumf>, %240, %cst_106 [2] : vector<1x8x8xf32> to vector<1x8xf32>
    %242 = vector.shape_cast %241 : vector<1x8xf32> to vector<1x8x1xf32>
    %243 = vector.broadcast %242 : vector<1x8x1xf32> to vector<1x8x8xf32>
    %244 = arith.subf %240, %243 : vector<1x8x8xf32>
    %245 = math.exp %244 : vector<1x8x8xf32>
    %cst_107 = arith.constant dense<0.000000e+00> : vector<1x8xf32>
    %246 = vector.multi_reduction <add>, %245, %cst_107 [2] : vector<1x8x8xf32> to vector<1x8xf32>
    %247 = vector.shape_cast %246 : vector<1x8xf32> to vector<1x8x1xf32>
    %248 = vector.broadcast %247 : vector<1x8x1xf32> to vector<1x8x8xf32>
    %249 = arith.divf %245, %248 : vector<1x8x8xf32>
    "tpu.trace_start"() <{level = 10 : i32, message = "blm,bmd->bld"}> : () -> ()
    %cst_108 = arith.constant dense<0.000000e+00> : vector<1x8x8xf32>
    %250 = tpu.matmul %249, %237, %cst_108 {dimension_numbers = #tpu.dot_dimension_numbers<[2], [1], [1], [2], [0, 0, 0, 1, 1, 2], [0], [0]>} : vector<1x8x8xf32>, vector<1x8x8xf32>, vector<1x8x8xf32> -> vector<1x8x8xf32>
    "tpu.trace_stop"() : () -> ()
    %251 = vector.shape_cast %250 : vector<1x8x8xf32> to vector<8x8xf32>
    %252 = arith.truncf %251 : vector<8x8xf32> to vector<8x8xbf16>
    %c1_109 = arith.constant 1 : index
    %c0_110 = arith.constant 0 : index
    %c0_111 = arith.constant 0 : index
    %253 = vector.load %arg4[%c1_109, %c0_110, %c0_111] : memref<2x32x32xbf16, #tpu.memory_space<vmem>>, vector<1x32x32xbf16>
    %254 = vector.shape_cast %253 : vector<1x32x32xbf16> to vector<32x32xbf16>
    %255 = vector.extract_strided_slice %254 {offsets = [8, 0], sizes = [8, 32], strides = [1, 1]} : vector<32x32xbf16> to vector<8x32xbf16>
    %cst_112 = arith.constant dense<0.000000e+00> : vector<8x32xf32>
    %256 = tpu.matmul %252, %255, %cst_112 {dimension_numbers = #tpu.dot_dimension_numbers<[1], [0], [0], [1], [0, 0, 1, 1], [], []>} : vector<8x8xbf16>, vector<8x32xbf16>, vector<8x32xf32> -> vector<8x32xf32>
    %257 = arith.addf %234, %256 : vector<8x32xf32>
    %258 = vector.extract_strided_slice %202 {offsets = [0, 0, 16], sizes = [1, 8, 8], strides = [1, 1, 1]} : vector<1x8x32xf32> to vector<1x8x8xf32>
    %259 = vector.extract_strided_slice %204 {offsets = [0, 0, 16], sizes = [1, 8, 8], strides = [1, 1, 1]} : vector<1x8x32xf32> to vector<1x8x8xf32>
    %260 = vector.extract_strided_slice %206 {offsets = [0, 0, 16], sizes = [1, 8, 8], strides = [1, 1, 1]} : vector<1x8x32xf32> to vector<1x8x8xf32>
    "tpu.trace_start"() <{level = 10 : i32, message = "bld,bmd->blm"}> : () -> ()
    %cst_113 = arith.constant dense<0.000000e+00> : vector<1x8x8xf32>
    %261 = tpu.matmul %258, %259, %cst_113 {dimension_numbers = #tpu.dot_dimension_numbers<[2], [2], [1], [1], [0, 0, 0, 1, 1, 1], [0], [0]>} : vector<1x8x8xf32>, vector<1x8x8xf32>, vector<1x8x8xf32> -> vector<1x8x8xf32>
    "tpu.trace_stop"() : () -> ()
    %cst_114 = arith.constant 0.353553385 : f32
    %262 = vector.broadcast %cst_114 : f32 to vector<1x8x8xf32>
    %263 = arith.mulf %261, %262 : vector<1x8x8xf32>
    %cst_115 = arith.constant dense<0xFF800000> : vector<1x8xf32>
    %264 = vector.multi_reduction <maximumf>, %263, %cst_115 [2] : vector<1x8x8xf32> to vector<1x8xf32>
    %265 = vector.shape_cast %264 : vector<1x8xf32> to vector<1x8x1xf32>
    %266 = vector.broadcast %265 : vector<1x8x1xf32> to vector<1x8x8xf32>
    %267 = arith.subf %263, %266 : vector<1x8x8xf32>
    %268 = math.exp %267 : vector<1x8x8xf32>
    %cst_116 = arith.constant dense<0.000000e+00> : vector<1x8xf32>
    %269 = vector.multi_reduction <add>, %268, %cst_116 [2] : vector<1x8x8xf32> to vector<1x8xf32>
    %270 = vector.shape_cast %269 : vector<1x8xf32> to vector<1x8x1xf32>
    %271 = vector.broadcast %270 : vector<1x8x1xf32> to vector<1x8x8xf32>
    %272 = arith.divf %268, %271 : vector<1x8x8xf32>
    "tpu.trace_start"() <{level = 10 : i32, message = "blm,bmd->bld"}> : () -> ()
    %cst_117 = arith.constant dense<0.000000e+00> : vector<1x8x8xf32>
    %273 = tpu.matmul %272, %260, %cst_117 {dimension_numbers = #tpu.dot_dimension_numbers<[2], [1], [1], [2], [0, 0, 0, 1, 1, 2], [0], [0]>} : vector<1x8x8xf32>, vector<1x8x8xf32>, vector<1x8x8xf32> -> vector<1x8x8xf32>
    "tpu.trace_stop"() : () -> ()
    %274 = vector.shape_cast %273 : vector<1x8x8xf32> to vector<8x8xf32>
    %275 = arith.truncf %274 : vector<8x8xf32> to vector<8x8xbf16>
    %c1_118 = arith.constant 1 : index
    %c0_119 = arith.constant 0 : index
    %c0_120 = arith.constant 0 : index
    %276 = vector.load %arg4[%c1_118, %c0_119, %c0_120] : memref<2x32x32xbf16, #tpu.memory_space<vmem>>, vector<1x32x32xbf16>
    %277 = vector.shape_cast %276 : vector<1x32x32xbf16> to vector<32x32xbf16>
    %278 = vector.extract_strided_slice %277 {offsets = [16, 0], sizes = [8, 32], strides = [1, 1]} : vector<32x32xbf16> to vector<8x32xbf16>
    %cst_121 = arith.constant dense<0.000000e+00> : vector<8x32xf32>
    %279 = tpu.matmul %275, %278, %cst_121 {dimension_numbers = #tpu.dot_dimension_numbers<[1], [0], [0], [1], [0, 0, 1, 1], [], []>} : vector<8x8xbf16>, vector<8x32xbf16>, vector<8x32xf32> -> vector<8x32xf32>
    %280 = arith.addf %257, %279 : vector<8x32xf32>
    %281 = vector.extract_strided_slice %202 {offsets = [0, 0, 24], sizes = [1, 8, 8], strides = [1, 1, 1]} : vector<1x8x32xf32> to vector<1x8x8xf32>
    %282 = vector.extract_strided_slice %204 {offsets = [0, 0, 24], sizes = [1, 8, 8], strides = [1, 1, 1]} : vector<1x8x32xf32> to vector<1x8x8xf32>
    %283 = vector.extract_strided_slice %206 {offsets = [0, 0, 24], sizes = [1, 8, 8], strides = [1, 1, 1]} : vector<1x8x32xf32> to vector<1x8x8xf32>
    "tpu.trace_start"() <{level = 10 : i32, message = "bld,bmd->blm"}> : () -> ()
    %cst_122 = arith.constant dense<0.000000e+00> : vector<1x8x8xf32>
    %284 = tpu.matmul %281, %282, %cst_122 {dimension_numbers = #tpu.dot_dimension_numbers<[2], [2], [1], [1], [0, 0, 0, 1, 1, 1], [0], [0]>} : vector<1x8x8xf32>, vector<1x8x8xf32>, vector<1x8x8xf32> -> vector<1x8x8xf32>
    "tpu.trace_stop"() : () -> ()
    %cst_123 = arith.constant 0.353553385 : f32
    %285 = vector.broadcast %cst_123 : f32 to vector<1x8x8xf32>
    %286 = arith.mulf %284, %285 : vector<1x8x8xf32>
    %cst_124 = arith.constant dense<0xFF800000> : vector<1x8xf32>
    %287 = vector.multi_reduction <maximumf>, %286, %cst_124 [2] : vector<1x8x8xf32> to vector<1x8xf32>
    %288 = vector.shape_cast %287 : vector<1x8xf32> to vector<1x8x1xf32>
    %289 = vector.broadcast %288 : vector<1x8x1xf32> to vector<1x8x8xf32>
    %290 = arith.subf %286, %289 : vector<1x8x8xf32>
    %291 = math.exp %290 : vector<1x8x8xf32>
    %cst_125 = arith.constant dense<0.000000e+00> : vector<1x8xf32>
    %292 = vector.multi_reduction <add>, %291, %cst_125 [2] : vector<1x8x8xf32> to vector<1x8xf32>
    %293 = vector.shape_cast %292 : vector<1x8xf32> to vector<1x8x1xf32>
    %294 = vector.broadcast %293 : vector<1x8x1xf32> to vector<1x8x8xf32>
    %295 = arith.divf %291, %294 : vector<1x8x8xf32>
    "tpu.trace_start"() <{level = 10 : i32, message = "blm,bmd->bld"}> : () -> ()
    %cst_126 = arith.constant dense<0.000000e+00> : vector<1x8x8xf32>
    %296 = tpu.matmul %295, %283, %cst_126 {dimension_numbers = #tpu.dot_dimension_numbers<[2], [1], [1], [2], [0, 0, 0, 1, 1, 2], [0], [0]>} : vector<1x8x8xf32>, vector<1x8x8xf32>, vector<1x8x8xf32> -> vector<1x8x8xf32>
    "tpu.trace_stop"() : () -> ()
    %297 = vector.shape_cast %296 : vector<1x8x8xf32> to vector<8x8xf32>
    %298 = arith.truncf %297 : vector<8x8xf32> to vector<8x8xbf16>
    %c1_127 = arith.constant 1 : index
    %c0_128 = arith.constant 0 : index
    %c0_129 = arith.constant 0 : index
    %299 = vector.load %arg4[%c1_127, %c0_128, %c0_129] : memref<2x32x32xbf16, #tpu.memory_space<vmem>>, vector<1x32x32xbf16>
    %300 = vector.shape_cast %299 : vector<1x32x32xbf16> to vector<32x32xbf16>
    %301 = vector.extract_strided_slice %300 {offsets = [24, 0], sizes = [8, 32], strides = [1, 1]} : vector<32x32xbf16> to vector<8x32xbf16>
    %cst_130 = arith.constant dense<0.000000e+00> : vector<8x32xf32>
    %302 = tpu.matmul %298, %301, %cst_130 {dimension_numbers = #tpu.dot_dimension_numbers<[1], [0], [0], [1], [0, 0, 1, 1], [], []>} : vector<8x8xbf16>, vector<8x32xbf16>, vector<8x32xf32> -> vector<8x32xf32>
    %303 = arith.addf %280, %302 : vector<8x32xf32>
    %304 = vector.shape_cast %303 : vector<8x32xf32> to vector<1x8x32xf32>
    %305 = arith.addf %191, %304 : vector<1x8x32xf32>
    %c1_131 = arith.constant 1 : index
    %c0_132 = arith.constant 0 : index
    %c0_133 = arith.constant 0 : index
    %306 = vector.load %arg10[%c1_131, %c0_132, %c0_133] : memref<2x1x32xf32, #tpu.memory_space<vmem>>, vector<1x1x32xf32>
    %307 = vector.shape_cast %306 : vector<1x1x32xf32> to vector<1x32xf32>
    %c1_134 = arith.constant 1 : index
    %c0_135 = arith.constant 0 : index
    %c0_136 = arith.constant 0 : index
    %308 = vector.load %arg11[%c1_134, %c0_135, %c0_136] : memref<2x1x32xf32, #tpu.memory_space<vmem>>, vector<1x1x32xf32>
    %309 = vector.shape_cast %308 : vector<1x1x32xf32> to vector<1x32xf32>
    %cst_137 = arith.constant dense<0.000000e+00> : vector<1x8xf32>
    %310 = vector.multi_reduction <add>, %305, %cst_137 [2] : vector<1x8x32xf32> to vector<1x8xf32>
    %311 = vector.shape_cast %310 : vector<1x8xf32> to vector<1x8x1xf32>
    %cst_138 = arith.constant 3.200000e+01 : f32
    %312 = vector.broadcast %cst_138 : f32 to vector<1x8x1xf32>
    %313 = arith.divf %311, %312 : vector<1x8x1xf32>
    %314 = vector.broadcast %313 : vector<1x8x1xf32> to vector<1x8x32xf32>
    %315 = arith.subf %305, %314 : vector<1x8x32xf32>
    %316 = arith.mulf %315, %315 : vector<1x8x32xf32>
    %cst_139 = arith.constant dense<0.000000e+00> : vector<1x8xf32>
    %317 = vector.multi_reduction <add>, %316, %cst_139 [2] : vector<1x8x32xf32> to vector<1x8xf32>
    %318 = vector.shape_cast %317 : vector<1x8xf32> to vector<1x8x1xf32>
    %cst_140 = arith.constant 3.200000e+01 : f32
    %319 = vector.broadcast %cst_140 : f32 to vector<1x8x1xf32>
    %320 = arith.divf %318, %319 : vector<1x8x1xf32>
    %321 = vector.broadcast %313 : vector<1x8x1xf32> to vector<1x8x32xf32>
    %322 = arith.subf %305, %321 : vector<1x8x32xf32>
    %cst_141 = arith.constant 9.99999974E-6 : f32
    %323 = vector.broadcast %cst_141 : f32 to vector<1x8x1xf32>
    %324 = arith.addf %320, %323 : vector<1x8x1xf32>
    %325 = math.rsqrt %324 : vector<1x8x1xf32>
    %326 = vector.broadcast %325 : vector<1x8x1xf32> to vector<1x8x32xf32>
    %327 = arith.mulf %322, %326 : vector<1x8x32xf32>
    %328 = vector.shape_cast %307 : vector<1x32xf32> to vector<1x1x32xf32>
    %329 = vector.broadcast %328 : vector<1x1x32xf32> to vector<1x8x32xf32>
    %330 = arith.mulf %327, %329 : vector<1x8x32xf32>
    %331 = vector.shape_cast %309 : vector<1x32xf32> to vector<1x1x32xf32>
    %332 = vector.broadcast %331 : vector<1x1x32xf32> to vector<1x8x32xf32>
    %333 = arith.addf %330, %332 : vector<1x8x32xf32>
    %334 = vector.shape_cast %333 : vector<1x8x32xf32> to vector<8x32xf32>
    %335 = arith.truncf %334 : vector<8x32xf32> to vector<8x32xbf16>
    %c1_142 = arith.constant 1 : index
    %c0_143 = arith.constant 0 : index
    %c0_144 = arith.constant 0 : index
    %336 = vector.load %arg6[%c1_142, %c0_143, %c0_144] : memref<2x32x2048xbf16, #tpu.memory_space<vmem>>, vector<1x32x2048xbf16>
    %337 = vector.shape_cast %336 : vector<1x32x2048xbf16> to vector<32x2048xbf16>
    %cst_145 = arith.constant dense<0.000000e+00> : vector<8x2048xf32>
    %338 = tpu.matmul %335, %337, %cst_145 {dimension_numbers = #tpu.dot_dimension_numbers<[1], [0], [0], [1], [0, 0, 1, 1], [], []>} : vector<8x32xbf16>, vector<32x2048xbf16>, vector<8x2048xf32> -> vector<8x2048xf32>
    %c1_146 = arith.constant 1 : index
    %c0_147 = arith.constant 0 : index
    %c0_148 = arith.constant 0 : index
    %339 = vector.load %arg7[%c1_146, %c0_147, %c0_148] : memref<2x1x2048xf32, #tpu.memory_space<vmem>>, vector<1x1x2048xf32>
    %340 = vector.shape_cast %339 : vector<1x1x2048xf32> to vector<1x2048xf32>
    %341 = vector.broadcast %340 : vector<1x2048xf32> to vector<8x2048xf32>
    %342 = arith.addf %338, %341 : vector<8x2048xf32>
    %cst_149 = arith.constant 0.000000e+00 : f32
    %343 = vector.broadcast %cst_149 : f32 to vector<8x2048xf32>
    %344 = arith.maximumf %342, %343 : vector<8x2048xf32>
    %345 = arith.truncf %344 : vector<8x2048xf32> to vector<8x2048xbf16>
    %c1_150 = arith.constant 1 : index
    %c0_151 = arith.constant 0 : index
    %c0_152 = arith.constant 0 : index
    %346 = vector.load %arg8[%c1_150, %c0_151, %c0_152] : memref<2x2048x32xbf16, #tpu.memory_space<vmem>>, vector<1x2048x32xbf16>
    %347 = vector.shape_cast %346 : vector<1x2048x32xbf16> to vector<2048x32xbf16>
    %cst_153 = arith.constant dense<0.000000e+00> : vector<8x32xf32>
    %348 = tpu.matmul %345, %347, %cst_153 {dimension_numbers = #tpu.dot_dimension_numbers<[1], [0], [0], [1], [0, 0, 1, 1], [], []>} : vector<8x2048xbf16>, vector<2048x32xbf16>, vector<8x32xf32> -> vector<8x32xf32>
    %c1_154 = arith.constant 1 : index
    %c0_155 = arith.constant 0 : index
    %c0_156 = arith.constant 0 : index
    %349 = vector.load %arg9[%c1_154, %c0_155, %c0_156] : memref<2x1x32xf32, #tpu.memory_space<vmem>>, vector<1x1x32xf32>
    %350 = vector.shape_cast %349 : vector<1x1x32xf32> to vector<1x32xf32>
    %351 = vector.broadcast %350 : vector<1x32xf32> to vector<8x32xf32>
    %352 = arith.addf %348, %351 : vector<8x32xf32>
    %353 = vector.shape_cast %352 : vector<8x32xf32> to vector<1x8x32xf32>
    %354 = arith.addf %333, %353 : vector<1x8x32xf32>
    %c1_157 = arith.constant 1 : index
    %c0_158 = arith.constant 0 : index
    %c0_159 = arith.constant 0 : index
    %355 = vector.load %arg12[%c1_157, %c0_158, %c0_159] : memref<2x1x32xf32, #tpu.memory_space<vmem>>, vector<1x1x32xf32>
    %356 = vector.shape_cast %355 : vector<1x1x32xf32> to vector<1x32xf32>
    %c1_160 = arith.constant 1 : index
    %c0_161 = arith.constant 0 : index
    %c0_162 = arith.constant 0 : index
    %357 = vector.load %arg13[%c1_160, %c0_161, %c0_162] : memref<2x1x32xf32, #tpu.memory_space<vmem>>, vector<1x1x32xf32>
    %358 = vector.shape_cast %357 : vector<1x1x32xf32> to vector<1x32xf32>
    %cst_163 = arith.constant dense<0.000000e+00> : vector<1x8xf32>
    %359 = vector.multi_reduction <add>, %354, %cst_163 [2] : vector<1x8x32xf32> to vector<1x8xf32>
    %360 = vector.shape_cast %359 : vector<1x8xf32> to vector<1x8x1xf32>
    %cst_164 = arith.constant 3.200000e+01 : f32
    %361 = vector.broadcast %cst_164 : f32 to vector<1x8x1xf32>
    %362 = arith.divf %360, %361 : vector<1x8x1xf32>
    %363 = vector.broadcast %362 : vector<1x8x1xf32> to vector<1x8x32xf32>
    %364 = arith.subf %354, %363 : vector<1x8x32xf32>
    %365 = arith.mulf %364, %364 : vector<1x8x32xf32>
    %cst_165 = arith.constant dense<0.000000e+00> : vector<1x8xf32>
    %366 = vector.multi_reduction <add>, %365, %cst_165 [2] : vector<1x8x32xf32> to vector<1x8xf32>
    %367 = vector.shape_cast %366 : vector<1x8xf32> to vector<1x8x1xf32>
    %cst_166 = arith.constant 3.200000e+01 : f32
    %368 = vector.broadcast %cst_166 : f32 to vector<1x8x1xf32>
    %369 = arith.divf %367, %368 : vector<1x8x1xf32>
    %370 = vector.broadcast %362 : vector<1x8x1xf32> to vector<1x8x32xf32>
    %371 = arith.subf %354, %370 : vector<1x8x32xf32>
    %cst_167 = arith.constant 9.99999974E-6 : f32
    %372 = vector.broadcast %cst_167 : f32 to vector<1x8x1xf32>
    %373 = arith.addf %369, %372 : vector<1x8x1xf32>
    %374 = math.rsqrt %373 : vector<1x8x1xf32>
    %375 = vector.broadcast %374 : vector<1x8x1xf32> to vector<1x8x32xf32>
    %376 = arith.mulf %371, %375 : vector<1x8x32xf32>
    %377 = vector.shape_cast %356 : vector<1x32xf32> to vector<1x1x32xf32>
    %378 = vector.broadcast %377 : vector<1x1x32xf32> to vector<1x8x32xf32>
    %379 = arith.mulf %376, %378 : vector<1x8x32xf32>
    %380 = vector.shape_cast %358 : vector<1x32xf32> to vector<1x1x32xf32>
    %381 = vector.broadcast %380 : vector<1x1x32xf32> to vector<1x8x32xf32>
    %382 = arith.addf %379, %381 : vector<1x8x32xf32>
    %c0_168 = arith.constant 0 : index
    %c0_169 = arith.constant 0 : index
    %383 = vector.load %arg14[%c0_168, %c0_169] : memref<1x32xf32, #tpu.memory_space<vmem>>, vector<1x32xf32>
    %c0_170 = arith.constant 0 : index
    %c0_171 = arith.constant 0 : index
    %384 = vector.load %arg15[%c0_170, %c0_171] : memref<1x32xf32, #tpu.memory_space<vmem>>, vector<1x32xf32>
    %cst_172 = arith.constant dense<0.000000e+00> : vector<1x8xf32>
    %385 = vector.multi_reduction <add>, %382, %cst_172 [2] : vector<1x8x32xf32> to vector<1x8xf32>
    %386 = vector.shape_cast %385 : vector<1x8xf32> to vector<1x8x1xf32>
    %cst_173 = arith.constant 3.200000e+01 : f32
    %387 = vector.broadcast %cst_173 : f32 to vector<1x8x1xf32>
    %388 = arith.divf %386, %387 : vector<1x8x1xf32>
    %389 = vector.broadcast %388 : vector<1x8x1xf32> to vector<1x8x32xf32>
    %390 = arith.subf %382, %389 : vector<1x8x32xf32>
    %391 = arith.mulf %390, %390 : vector<1x8x32xf32>
    %cst_174 = arith.constant dense<0.000000e+00> : vector<1x8xf32>
    %392 = vector.multi_reduction <add>, %391, %cst_174 [2] : vector<1x8x32xf32> to vector<1x8xf32>
    %393 = vector.shape_cast %392 : vector<1x8xf32> to vector<1x8x1xf32>
    %cst_175 = arith.constant 3.200000e+01 : f32
    %394 = vector.broadcast %cst_175 : f32 to vector<1x8x1xf32>
    %395 = arith.divf %393, %394 : vector<1x8x1xf32>
    %396 = vector.broadcast %388 : vector<1x8x1xf32> to vector<1x8x32xf32>
    %397 = arith.subf %382, %396 : vector<1x8x32xf32>
    %cst_176 = arith.constant 9.99999974E-6 : f32
    %398 = vector.broadcast %cst_176 : f32 to vector<1x8x1xf32>
    %399 = arith.addf %395, %398 : vector<1x8x1xf32>
    %400 = math.rsqrt %399 : vector<1x8x1xf32>
    %401 = vector.broadcast %400 : vector<1x8x1xf32> to vector<1x8x32xf32>
    %402 = arith.mulf %397, %401 : vector<1x8x32xf32>
    %403 = vector.shape_cast %383 : vector<1x32xf32> to vector<1x1x32xf32>
    %404 = vector.broadcast %403 : vector<1x1x32xf32> to vector<1x8x32xf32>
    %405 = arith.mulf %402, %404 : vector<1x8x32xf32>
    %406 = vector.shape_cast %384 : vector<1x32xf32> to vector<1x1x32xf32>
    %407 = vector.broadcast %406 : vector<1x1x32xf32> to vector<1x8x32xf32>
    %408 = arith.addf %405, %407 : vector<1x8x32xf32>
    %c0_177 = arith.constant 0 : index
    %c0_178 = arith.constant 0 : index
    %c0_179 = arith.constant 0 : index
    %409 = vector.load %arg16[%c0_177, %c0_178, %c0_179] : memref<1x8x32xf32, #tpu.memory_space<vmem>>, vector<1x8x32xf32>
    tpu.vector_store %arg16[%c0_177, %c0_178, %c0_179], %408 {strides = array<i32>} : memref<1x8x32xf32, #tpu.memory_space<vmem>>, vector<1x8x32xf32>,
    return
  }
  func.func @transform_0(%arg0: i32) -> (i32, i32, i32) {
    %c0_i32 = arith.constant 0 : i32
    %c0_i32_0 = arith.constant 0 : i32
    %c0_i32_1 = arith.constant 0 : i32
    return %arg0, %c0_i32, %c0_i32_0 : i32, i32, i32
  }
  func.func @transform_1(%arg0: i32) -> (i32, i32, i32) {
    %c0_i32 = arith.constant 0 : i32
    %c0_i32_0 = arith.constant 0 : i32
    %c0_i32_1 = arith.constant 0 : i32
    %c0_i32_2 = arith.constant 0 : i32
    return %c0_i32, %c0_i32_0, %c0_i32_1 : i32, i32, i32
  }
  func.func @transform_2(%arg0: i32) -> (i32, i32, i32) {
    %c0_i32 = arith.constant 0 : i32
    %c0_i32_0 = arith.constant 0 : i32
    %c0_i32_1 = arith.constant 0 : i32
    %c0_i32_2 = arith.constant 0 : i32
    return %c0_i32, %c0_i32_0, %c0_i32_1 : i32, i32, i32
  }
  func.func @transform_3(%arg0: i32) -> (i32, i32, i32) {
    %c0_i32 = arith.constant 0 : i32
    %c0_i32_0 = arith.constant 0 : i32
    %c0_i32_1 = arith.constant 0 : i32
    %c0_i32_2 = arith.constant 0 : i32
    return %c0_i32, %c0_i32_0, %c0_i32_1 : i32, i32, i32
  }
  func.func @transform_4(%arg0: i32) -> (i32, i32, i32) {
    %c0_i32 = arith.constant 0 : i32
    %c0_i32_0 = arith.constant 0 : i32
    %c0_i32_1 = arith.constant 0 : i32
    %c0_i32_2 = arith.constant 0 : i32
    return %c0_i32, %c0_i32_0, %c0_i32_1 : i32, i32, i32
  }
  func.func @transform_5(%arg0: i32) -> (i32, i32, i32) {
    %c0_i32 = arith.constant 0 : i32
    %c0_i32_0 = arith.constant 0 : i32
    %c0_i32_1 = arith.constant 0 : i32
    %c0_i32_2 = arith.constant 0 : i32
    return %c0_i32, %c0_i32_0, %c0_i32_1 : i32, i32, i32
  }
  func.func @transform_6(%arg0: i32) -> (i32, i32, i32) {
    %c0_i32 = arith.constant 0 : i32
    %c0_i32_0 = arith.constant 0 : i32
    %c0_i32_1 = arith.constant 0 : i32
    %c0_i32_2 = arith.constant 0 : i32
    return %c0_i32, %c0_i32_0, %c0_i32_1 : i32, i32, i32
  }
  func.func @transform_7(%arg0: i32) -> (i32, i32, i32) {
    %c0_i32 = arith.constant 0 : i32
    %c0_i32_0 = arith.constant 0 : i32
    %c0_i32_1 = arith.constant 0 : i32
    %c0_i32_2 = arith.constant 0 : i32
    return %c0_i32, %c0_i32_0, %c0_i32_1 : i32, i32, i32
  }
  func.func @transform_8(%arg0: i32) -> (i32, i32, i32) {
    %c0_i32 = arith.constant 0 : i32
    %c0_i32_0 = arith.constant 0 : i32
    %c0_i32_1 = arith.constant 0 : i32
    %c0_i32_2 = arith.constant 0 : i32
    return %c0_i32, %c0_i32_0, %c0_i32_1 : i32, i32, i32
  }
  func.func @transform_9(%arg0: i32) -> (i32, i32, i32) {
    %c0_i32 = arith.constant 0 : i32
    %c0_i32_0 = arith.constant 0 : i32
    %c0_i32_1 = arith.constant 0 : i32
    %c0_i32_2 = arith.constant 0 : i32
    return %c0_i32, %c0_i32_0, %c0_i32_1 : i32, i32, i32
  }
  func.func @transform_10(%arg0: i32) -> (i32, i32, i32) {
    %c0_i32 = arith.constant 0 : i32
    %c0_i32_0 = arith.constant 0 : i32
    %c0_i32_1 = arith.constant 0 : i32
    %c0_i32_2 = arith.constant 0 : i32
    return %c0_i32, %c0_i32_0, %c0_i32_1 : i32, i32, i32
  }
  func.func @transform_11(%arg0: i32) -> (i32, i32, i32) {
    %c0_i32 = arith.constant 0 : i32
    %c0_i32_0 = arith.constant 0 : i32
    %c0_i32_1 = arith.constant 0 : i32
    %c0_i32_2 = arith.constant 0 : i32
    return %c0_i32, %c0_i32_0, %c0_i32_1 : i32, i32, i32
  }
  func.func @transform_12(%arg0: i32) -> (i32, i32, i32) {
    %c0_i32 = arith.constant 0 : i32
    %c0_i32_0 = arith.constant 0 : i32
    %c0_i32_1 = arith.constant 0 : i32
    %c0_i32_2 = arith.constant 0 : i32
    return %c0_i32, %c0_i32_0, %c0_i32_1 : i32, i32, i32
  }
  func.func @transform_13(%arg0: i32) -> (i32, i32) {
    %c0_i32 = arith.constant 0 : i32
    %c0_i32_0 = arith.constant 0 : i32
    %c0_i32_1 = arith.constant 0 : i32
    return %c0_i32, %c0_i32_0 : i32, i32
  }
  func.func @transform_14(%arg0: i32) -> (i32, i32) {
    %c0_i32 = arith.constant 0 : i32
    %c0_i32_0 = arith.constant 0 : i32
    %c0_i32_1 = arith.constant 0 : i32
    return %c0_i32, %c0_i32_0 : i32, i32
  }
  func.func @transform_15(%arg0: i32) -> (i32, i32, i32) {
    %c0_i32 = arith.constant 0 : i32
    %c0_i32_0 = arith.constant 0 : i32
    %c0_i32_1 = arith.constant 0 : i32
    return %arg0, %c0_i32, %c0_i32_0 : i32, i32, i32
  }
}

</mosaic_0001>

<bundles_post_ra>
// kernel: tpu_custom_call.1
= control target key start
LH: loop header
LB: loop body
LE: loop exit
PB: predicated region body
PF: predicated region fallthrough
CT: control target
= control target key end

     0   :  { %s8943_s0 = inlined_call_operand.vmem [shape: f32[2,8,32], index: 0, kind: input, shape index: {}]   ;;  %s8944_s1 = inlined_call_operand.vmem [shape: bf16[2,32,96], index: 1, kind: input, shape index: {}]   ;;  %s8945_s2 = inlined_call_operand.vmem [shape: f32[2,1,96], index: 2, kind: input, shape index: {}]   ;;  %s8946_s3 = inlined_call_operand.vmem [shape: bf16[2,32,32], index: 3, kind: input, shape index: {}]   ;;  %s8947_s4 = inlined_call_operand.vmem [shape: f32[2,1,32], index: 4, kind: input, shape index: {}]   ;;  %s8948_s5 = inlined_call_operand.vmem [shape: bf16[2,32,2048], index: 5, kind: input, shape index: {}]   ;;  %s8949_s6 = inlined_call_operand.vmem [shape: f32[2,1,2048], index: 6, kind: input, shape index: {}]   ;;  %s8950_s7 = inlined_call_operand.vmem [shape: bf16[2,2048,32], index: 7, kind: input, shape index: {}]   ;;  %s8951_s8 = inlined_call_operand.vmem [shape: f32[2,1,32], index: 8, kind: input, shape index: {}]   ;;  %s8952_s9 = inlined_call_operand.vmem [shape: f32[2,1,32], index: 9, kind: input, shape index: {}]   ;;  %s8953_s10 = inlined_call_operand.vmem [shape: f32[2,1,32], index: 10, kind: input, shape index: {}]   ;;  %s8954_s11 = inlined_call_operand.vmem [shape: f32[2,1,32], index: 11, kind: input, shape index: {}]   ;;  %s8955_s12 = inlined_call_operand.vmem [shape: f32[2,1,32], index: 12, kind: input, shape index: {}]   ;;  %s8956_s13 = inlined_call_operand.vmem [shape: f32[1,32], index: 13, kind: input, shape index: {}]   ;;  %s8957_s14 = inlined_call_operand.vmem [shape: f32[1,32], index: 14, kind: input, shape index: {}]   ;;  %s8958_s15 = inlined_call_operand.hbm [shape: f32[2,8,32], index: 15, kind: output, shape index: {}]  }
   0x1   :  { %8975 = sst [smem:[#allocation10_spill]] %s8943_s0 }
   0x2   :  { %20 = vsyncpa [#allocation3], 0 }
   0x3   :  { %22 = vsyncpa [#allocation3 + $0x1], 0  ;;  %s7328_s18 = smov 0   ;;  %s7330_s19 = smov 0  }
   0x4   :  { %s7332_s20 = smov 0   ;;  %s7334_s21 = smov 0  }
   0x5 LB: > { %8976 = sst [smem:[#allocation5_spill]] %s7222_s18  ;;  %s7349_s22 = sadd.s32 4294967295, %s7234_s21   ;;  %s7234_s21 = sphi %s7334_s21, %s8997_s21   ;;  %s7230_s20 = sphi %s7332_s20, %s9002_s20   ;;  %s7226_s19 = sphi %s7330_s19, %s9001_s19   ;;  %s7222_s18 = sphi %s7328_s18, %s9000_s18  }
   0x6   : > { %8977 = sst [smem:[#allocation6_spill]] %s7230_s20  ;;  %s5060_s23 = sadd.s32 4294967294, %s7234_s21  }
   0x7   : > { %s7353_s24 = sadd.s32 1, %s7234_s21   ;;  %s355_s25 = sadd.s32 1, %s7230_s20 }
   0x8   : > { %8978 = sst [smem:[#allocation7_spill]] %s7353_s24  ;;  %s352_s26 = ssub.s32 %s7234_s21, %s7353_s24 }
   0x9   : > { %p365_p0 = scmp.ne.s32.totalorder %s7230_s20, %s7226_s19  ;;  %p353_p1 = scmp.eq.s32.totalorder %s352_s26, 0 }
   0xa   : > { %p366_p2 = scmp.eq.s32.totalorder %s7349_s22, 1  ;;  %p371_p3 = scmp.ne.s32.totalorder %s7226_s19, %s7222_s18 }
   0xb   : > { %p372_p4 = scmp.eq.s32.totalorder %s5060_s23, 1  ;;  %p5063_p7 = scmp.ge.s32.totalorder %s7234_s21, 1 }
   0xc   : > { %s7364_s27 = scalar_select %p353_p1, %s7230_s20, %s355_s25  }
   0xd   : > { %p7366_p5 = por %p366_p2, %p365_p0  ;;  %p7370_p6 = por %p372_p4, %p371_p3 }
   0xe   : > { %8979 = sst [smem:[#allocation8_spill]] %s7364_s27  ;;  %p439_p8 = scmp.lt.s32.totalorder %s7234_s21, 3 }
   0xf   : > { %s8981_s29 = scalar_select %p7370_p6, 1, 0 }
  0x10   : > { %p440_p9 = pnand %p5063_p7, %p439_p8 }
  0x11   : > { %8982 = sst [smem:[#allocation9_spill]] %s8981_s29  ;;  %p486_p10 = scmp.lt.s32.totalorder (!%p440_p9), %s7349_s22, 1 }
  0x12   : > { %443 = sbr.rel (%p440_p9) target bundleno = 5126 (0x1406), region = 80  ;;  %s8983_s0 = sld [smem:[#allocation10_spill]] (!%p440_p9) }
  0x13   : > { %s8972_s17 = smov (!%p440_p9), 88   ;;  %s8970_s20 = smov (!%p440_p9), 96  }
  0x14   : > { %s8962_s27 = smov (!%p440_p9), 56   ;;  %s8964_s23 = smov (!%p440_p9), 112  }
  0x15   : > { %s8963_s30 = smov (!%p440_p9), 72   ;;  %s8986_s29 = smov (!%p440_p9), 96  }
  0x16   : > { %s8988_s18 = smov (!%p440_p9), 80   ;;  %s8990_s16 = smov (!%p440_p9), 112  }
  0x17   : > { %v6738_v0 = vld [vmem:[%s8944_s1 + $0x8] sm:$0xff]  ;;  %v6737_v1 = vld [vmem:[%s8944_s1] sm:$0xff]  ;;  %s487_s25 = scalar_select %p486_p10, %s7349_s22, 1  ;;  %vm513_vm0 = vcmask 261120   ;;  %vm538_vm1 = vcmask 64512   ;;  %vm619_vm6 = vcmask 1043456  }
  0x18   : > { %523 = vmatpush.bf16.msra.mxu0 %v6738_v0  ;;  %v7112_v4 = vld [vmem:[%s8945_s2] ss:$0 sm:$0xff]  ;;  %v717_v63 = vld [vmem:[%s8946_s3 + $0x4] sm:$0xf] }
  0x19   : > { %s5065_s26 = sshll.u32 %s487_s25, 3  ;;  %s8967_s25 = smov 104   ;;  %v615_v33 = vld [vmem:[%s8946_s3] sm:$0xf]  ;;  %v722_v0 = vsel %vm619_vm6, %v717_v63, 0 }
  0x1a   : > { %s489_s24 = scalar_lea.vmem %s8983_s0, %s5065_s26  ;;  %s8971_s26 = smov 64   ;;  %v621_v34 = vsel %vm619_vm6, %v615_v33, 0 }
  0x1b   : > { %v7387_v2 = vld [vmem:[%s489_s24] sm:$0xff]  ;;  %s8969_s24 = smov 120   ;;  %630 = vmatpush.bf16.msra.mxu3 %v621_v34  ;;  %s8984_s0 = smov 88  }
  0x1c   : > { %524 = vmatpush.bf16.msra.mxu0 %v6737_v1  ;;  %v492_v3 = vpack.c.bf16 %v7387_v2, %v7387_v2 }
  0x1f   : > { %5074 = vmatmul.msk.bf16.vlgmr.msra.gmra.mxu0 %vm513_vm0, %v492_v3 }
  0x9c   : > { %v526_v5 = vpop.f32.mrf.mxu0 }
  0x9d   : > { %v7395_v6 = vadd.f32 %v7112_v4, %v526_v5 }
  0x9f   : > { %639 = vrot.lane.b32.xlu2 %v7395_v6, %s8972_s17  ;;  %536 = vrot.lane.b32.xlu0 %v7395_v6, %s8970_s20  ;;  %s8985_s17 = smov 64   ;;  %s8987_s20 = smov 120  }
  0xa4   : > { %v528_v7 = vpop.f32.mrf.mxu0 }
  0xa7   : > { %637 = vrot.lane.b32.xlu2 %v7395_v6, %s8969_s24  ;;  %s8992_s24 = smov 40  }
  0xf9   : > { %v640_v29 = vpop.permute.xlu2 %639 }
 0x101   : > { %v638_v32 = vpop.permute.xlu2 %637 }
 0x111   : > { %v537_v8 = vpop.permute.xlu0 %536 }
 0x112   : > { %5075 = vmatpush.xpose.msk.msrb.mxu0 %vm538_vm1, %v537_v8 }
 0x115   : > { %5076 = vmatmul.msk.f32.vlgmr.msrb.gmra.mxu0 %vm538_vm1, %v7395_v6 }
 0x192   : > { %v560_v9 = vpop.f32.mrf.mxu0 }
 0x193   : > { %v563_v10 = vmul.f32 0.35355338, %v560_v9 }
 0x195   : > { %v564_v11 = vsel %vm538_vm1, %v563_v10, -inf }
 0x196   : > { %565 = vmax.xlane.f32.xlu0 %v564_v11 }
 0x1aa   : > { %690 = vrot.lane.b32.xlu0 %v7395_v6, %s8962_s27  ;;  %s8968_s27 = smov 80  }
 0x1b2   : > { %738 = vrot.lane.b32.xlu0 %v7395_v6, %s8964_s23  ;;  %s8965_s23 = smov 48  }
 0x1ba   : > { %839 = vrot.lane.b32.xlu0 %v7395_v6, %s8967_s25  ;;  %s8991_s25 = smov 72  }
 0x209   : > { %v566_v12 = vpop.xlane.xlu0 %565 }
 0x20a   : > { %v567_v13 = vsub.f32 %v563_v10, %v566_v12 }
 0x20c   : > { %v568_v14 = vmul.f32 1.442695, %v567_v13 }
 0x20e   : > { %7128 = vpow2.f32 %v568_v14 }
 0x214   : > { %v7129_v15 = vpop.eup %7128 }
 0x215   : > { %v570_v16 = vsel %vm538_vm1, %v7129_v15, 0.0 }
 0x216   : > { %571 = vadd.xlane.f32.xlu1 %v570_v16 }
 0x21c   : > { %v691_v17 = vpop.permute.xlu0 %690 }
 0x21d   : > { %711 = vmatpush.msra.mxu1 %v691_v17 }
 0x224   : > { %v739_v61 = vpop.permute.xlu0 %738 }
 0x22c   : > { %v840_v62 = vpop.permute.xlu0 %839 }
 0x22f   : > { %588 = vrot.lane.b32.xlu1 %v7395_v6, %s8971_s26  ;;  %s8989_s26 = smov 104  }
 0x289   : > { %v572_v18 = vpop.xlane.xlu1 %571 }
 0x28a   : > { %7130 = vrcp.f32 %v572_v18  ;;  %v584_v24 = vand.u32 2147483648, %v572_v18  ;;  %vm578_vm3 = vweird.f32 %v572_v18  ;;  %v582_v25 = vand.u32 2147483647, %v572_v18 }
 0x28c   : > { %v585_v27 = vor.u32 1.1754944e-38, %v584_v24  ;;  %vm583_vm5 = vcmp.eq.f32.partialorder %v582_v25, 8.507059e+37 }
 0x290   : > { %v7131_v19 = vpop.eup %7130 }
 0x291   : > { %v574_v20 = vmul.f32 %v7131_v19, %v572_v18  ;;  %vm579_vm2 = vweird.f32 %v7131_v19 }
 0x292   : > { %vm580_vm4 = vmor %vm578_vm3, %vm579_vm2 }
 0x293   : > { %v575_v21 = vsub.f32 1.0, %v574_v20 }
 0x295   : > { %v576_v22 = vmul.f32 %v7131_v19, %v575_v21 }
 0x297   : > { %v577_v23 = vadd.f32 %v7131_v19, %v576_v22 }
 0x299   : > { %v581_v26 = vsel %vm580_vm4, %v7131_v19, %v577_v23 }
 0x29a   : > { %v586_v28 = vsel %vm583_vm5, %v585_v27, %v581_v26 }
 0x29b   : > { %v587_v31 = vmul.f32 %v7129_v15, %v586_v28 }
 0x2a1   : > { %v589_v30 = vpop.permute.xlu1 %588 }
 0x2a2   : > { %609 = vmatpush.msra.mxu2 %v589_v30 }
 0x2a3   : > { %5077 = vmatmul.msk.f32.vlgmr.msra.gmra.mxu2 %vm538_vm1, %v587_v31 }
 0x2a4   : > { %5079 = vmatpush.xpose.msk.msrb.mxu2 %vm538_vm1, %v640_v29 }
 0x2a8   : > { %731 = vmatpush.bf16.msra.mxu2 %v722_v0 }
 0x2ab   : > { %5080 = vmatmul.msk.f32.vlgmr.msrb.gmra.mxu2 %vm538_vm1, %v638_v32 }
 0x326   : > { %v611_v35 = vpop.f32.mrf.mxu2 }
 0x327   : > { %v614_v36 = vpack.c.bf16 %v611_v35, %v611_v35 }
 0x329   : > { %5078 = vmatmul.msk.bf16.vlgmr.msra.gmra.mxu3 %vm538_vm1, %v614_v36 }
 0x32e   : > { %v662_v37 = vpop.f32.mrf.mxu2 }
 0x32f   : > { %v665_v38 = vmul.f32 0.35355338, %v662_v37 }
 0x331   : > { %v666_v39 = vsel %vm538_vm1, %v665_v38, -inf }
 0x332   : > { %667 = vmax.xlane.f32.xlu2 %v666_v39 }
 0x34a   : > { %740 = vrot.lane.b32.xlu2 %v7395_v6, %s8968_s27  ;;  %s8993_s27 = smov 56  }
 0x3a5   : > { %v668_v40 = vpop.xlane.xlu2 %667 }
 0x3a6   : > { %v669_v41 = vsub.f32 %v665_v38, %v668_v40 }
 0x3a8   : > { %v670_v42 = vmul.f32 1.442695, %v669_v41 }
 0x3aa   : > { %7132 = vpow2.f32 %v670_v42 }
 0x3ac   : > { %v7427_v43 = vpop.f32.mrf.mxu3 }
 0x3ad   : > { %v741_v44 = vpop.permute.xlu2 %740 }
 0x3ae   : > { %5083 = vmatpush.xpose.msk.msrb.mxu1 %vm538_vm1, %v741_v44 }
 0x3b0   : > { %v7133_v45 = vpop.eup %7132 }
 0x3b1   : > { %v672_v46 = vsel %vm538_vm1, %v7133_v45, 0.0 }
 0x3b2   : > { %673 = vadd.xlane.f32.xlu1 %v672_v46 }
 0x3b4   : > { %v634_v47 = vpop.f32.mrf.mxu3 }
 0x3cb   : > { %841 = vrot.lane.b32.xlu1 %v7395_v6, %s8963_s30  ;;  %s8966_s30 = smov 40  }
 0x425   : > { %v674_v48 = vpop.xlane.xlu1 %673 }
 0x426   : > { %7134 = vrcp.f32 %v674_v48  ;;  %v686_v52 = vand.u32 2147483648, %v674_v48  ;;  %v684_v54 = vand.u32 2147483647, %v674_v48  ;;  %vm680_vm8 = vweird.f32 %v674_v48 }
 0x428   : > { %v687_v56 = vor.u32 1.1754944e-38, %v686_v52  ;;  %vm685_vm10 = vcmp.eq.f32.partialorder %v684_v54, 8.507059e+37 }
 0x42c   : > { %v7135_v49 = vpop.eup %7134 }
 0x42d   : > { %v676_v50 = vmul.f32 %v7135_v49, %v674_v48  ;;  %vm681_vm7 = vweird.f32 %v7135_v49 }
 0x42e   : > { %vm682_vm9 = vmor %vm680_vm8, %vm681_vm7 }
 0x42f   : > { %v677_v51 = vsub.f32 1.0, %v676_v50 }
 0x431   : > { %v678_v53 = vmul.f32 %v7135_v49, %v677_v51  ;;  %v919_v51 = vld [vmem:[%s8946_s3 + $0xc] sm:$0xf] }
 0x432   : > { %v924_v52 = vsel %vm619_vm6, %v919_v51, 0  ;;  %v6758_v51 = vld [vmem:[%s8948_s5 + $0x9c] sm:$0xf] }
 0x433   : > { %v679_v55 = vadd.f32 %v7135_v49, %v678_v53  ;;  %933 = vmatpush.bf16.msrb.mxu2 %v924_v52  ;;  %v5183_v52 = vld [vmem:[%s8948_s5 + $0xd8] sm:$0xf0] }
 0x435   : > { %v683_v57 = vsel %vm682_vm9, %v7135_v49, %v679_v55  ;;  %v818_v49 = vld [vmem:[%s8946_s3 + $0x8] sm:$0xf] }
 0x436   : > { %v688_v58 = vsel %vm685_vm10, %v687_v56, %v683_v57  ;;  %v823_v50 = vsel %vm619_vm6, %v818_v49, 0 }
 0x437   : > { %v689_v59 = vmul.f32 %v7133_v45, %v688_v58  ;;  %832 = vmatpush.bf16.msra.mxu0 %v823_v50  ;;  %v7113_v58 = vld [vmem:[%s8947_s4] ss:$0 sm:$0xff] }
 0x439   : > { %5081 = vmatmul.msk.f32.vlgmr.msra.gmra.mxu1 %vm538_vm1, %v689_v59 }
 0x43d   : > { %v842_v60 = vpop.permute.xlu1 %841 }
 0x43e   : > { %5087 = vmatpush.xpose.msk.msra.mxu1 %vm538_vm1, %v842_v60  ;;  %v636_v60 = vadd.f32 %v7113_v58, %v7427_v43 }
 0x441   : > { %5084 = vmatmul.msk.f32.vlgmr.msrb.gmra.mxu1 %vm538_vm1, %v739_v61 }
 0x449   : > { %5088 = vmatmul.msk.f32.vlgmr.msra.gmra.mxu1 %vm538_vm1, %v840_v62 }
 0x4b6   : > { %v713_v1 = vpop.f32.mrf.mxu1 }
 0x4b7   : > { %v716_v3 = vpack.c.bf16 %v713_v1, %v713_v1 }
 0x4b9   : > { %5082 = vmatmul.msk.bf16.vlgmr.msra.gmra.mxu2 %vm538_vm1, %v716_v3 }
 0x4be   : > { %v763_v4 = vpop.f32.mrf.mxu1 }
 0x4bf   : > { %v766_v5 = vmul.f32 0.35355338, %v763_v4 }
 0x4c1   : > { %v767_v7 = vsel %vm538_vm1, %v766_v5, -inf }
 0x4c2   : > { %768 = vmax.xlane.f32.xlu2 %v767_v7 }
 0x4c6   : > { %v864_v8 = vpop.f32.mrf.mxu1 }
 0x4c7   : > { %v867_v9 = vmul.f32 0.35355338, %v864_v8 }
 0x4c9   : > { %v868_v10 = vsel %vm538_vm1, %v867_v9, -inf }
 0x4ca   : > { %869 = vmax.xlane.f32.xlu0 %v868_v10 }
 0x4de   : > { %791 = vrot.lane.b32.xlu0 %v7395_v6, %s8965_s23 }
 0x535   : > { %v769_v11 = vpop.xlane.xlu2 %768 }
 0x536   : > { %v770_v12 = vsub.f32 %v766_v5, %v769_v11  ;;  %v7247_v5 = vmov 32.0  }
 0x538   : > { %v771_v13 = vmul.f32 1.442695, %v770_v12 }
 0x53a   : > { %7136 = vpow2.f32 %v771_v13 }
 0x53c   : > { %v7446_v14 = vpop.f32.mrf.mxu2 }
 0x53d   : > { %v870_v15 = vpop.xlane.xlu0 %869  ;;  %v737_v61 = vadd.f32 %v7446_v14, %v636_v60  ;;  %v5117_v60 = vld [vmem:[%s8948_s5 + $0x18] sm:$0xf] }
 0x53e   : > { %v871_v16 = vsub.f32 %v867_v9, %v870_v15 }
 0x540   : > { %v7137_v17 = vpop.eup %7136  ;;  %v872_v18 = vmul.f32 1.442695, %v871_v16  ;;  %v5157_v16 = vld [vmem:[%s8948_s5 + $0x80] sm:$0xf] }
 0x541   : > { %v773_v19 = vsel %vm538_vm1, %v7137_v17, 0.0 }
 0x542   : > { %7138 = vpow2.f32 %v872_v18  ;;  %774 = vadd.xlane.f32.xlu1 %v773_v19  ;;  %v6755_v18 = vld [vmem:[%s8948_s5 + $0x84] sm:$0xf] }
 0x544   : > { %v735_v20 = vpop.f32.mrf.mxu2 }
 0x545   : > { %v5159_v20 = vld [vmem:[%s8948_s5 + $0xc0] sm:$0xf0] }
 0x548   : > { %v7139_v21 = vpop.eup %7138 }
 0x549   : > { %v874_v22 = vsel %vm538_vm1, %v7139_v21, 0.0 }
 0x54a   : > { %875 = vadd.xlane.f32.xlu2 %v874_v22  ;;  %v6764_v22 = vld [vmem:[%s8948_s5 + $0xc4] sm:$0xf0] }
 0x550   : > { %v792_v23 = vpop.permute.xlu0 %791 }
 0x551   : > { %812 = vmatpush.msrb.mxu3 %v792_v23  ;;  %v5162_v23 = vor.u32 %v6755_v18, %v5159_v20  ;;  %v6759_v18 = vld [vmem:[%s8948_s5 + $0xa4] sm:$0xf] }
 0x562   : > { %892 = vrot.lane.b32.xlu2 %v7395_v6, %s8966_s30 }
 0x5b5   : > { %v775_v24 = vpop.xlane.xlu1 %774 }
 0x5b6   : > { %7140 = vrcp.f32 %v775_v24  ;;  %v787_v29 = vand.u32 2147483648, %v775_v24  ;;  %v785_v31 = vand.u32 2147483647, %v775_v24  ;;  %vm781_vm12 = vweird.f32 %v775_v24 }
 0x5b8   : > { %v788_v34 = vor.u32 1.1754944e-38, %v787_v29  ;;  %vm786_vm14 = vcmp.eq.f32.partialorder %v785_v31, 8.507059e+37  ;;  %v6747_v29 = vld [vmem:[%s8948_s5 + $0x3c] sm:$0xf0] }
 0x5bc   : > { %v7141_v25 = vpop.eup %7140 }
 0x5bd   : > { %v777_v26 = vmul.f32 %v7141_v25, %v775_v24  ;;  %v876_v27 = vpop.xlane.xlu2 %875  ;;  %vm782_vm11 = vweird.f32 %v7141_v25 }
 0x5be   : > { %7142 = vrcp.f32 %v876_v27  ;;  %vm783_vm13 = vmor %vm781_vm12, %vm782_vm11  ;;  %v888_v40 = vand.u32 2147483648, %v876_v27  ;;  %v886_v42 = vand.u32 2147483647, %v876_v27  ;;  %vm882_vm2 = vweird.f32 %v876_v27 }
 0x5bf   : > { %v778_v28 = vsub.f32 1.0, %v777_v26  ;;  %7144 = vrcp.f32 %v7247_v5  ;;  %v5167_v26 = vld [vmem:[%s8948_s5 + $0xc8] sm:$0xf0] }
 0x5c0   : > { %v889_v45 = vor.u32 1.1754944e-38, %v888_v40  ;;  %vm887_vm4 = vcmp.eq.f32.partialorder %v886_v42, 8.507059e+37  ;;  %v5173_v40 = vld [vmem:[%s8948_s5 + $0x90] sm:$0xf]  ;;  %v6757_v42 = vld [vmem:[%s8948_s5 + $0x94] sm:$0xf] }
 0x5c1   : > { %v779_v30 = vmul.f32 %v7141_v25, %v778_v28  ;;  %v5093_v28 = vld [vmem:[%s8948_s5] sm:$0xf] }
 0x5c2   : > { %v5094_v31 = vor.u32 %v6747_v29, %v5093_v28  ;;  %v6751_v28 = vld [vmem:[%s8948_s5 + $0x5c] sm:$0xf0] }
 0x5c3   : > { %v780_v32 = vadd.f32 %v7141_v25, %v779_v30  ;;  %v6739_v30 = vld [vmem:[%s8948_s5 + $0x4] sm:$0xf] }
 0x5c4   : > { %v7143_v33 = vpop.eup %7142 }
 0x5c5   : > { %v878_v35 = vmul.f32 %v7143_v33, %v876_v27  ;;  %v893_v36 = vpop.permute.xlu2 %892  ;;  %v784_v6 = vsel %vm783_vm13, %v7141_v25, %v780_v32  ;;  %vm883_vm15 = vweird.f32 %v7143_v33  ;;  %v7145_v7 = vpop.eup %7144  ;;  %v6756_v25 = vld [vmem:[%s8948_s5 + $0x8c] sm:$0xf]  ;;  %v5095_v32 = vld [vmem:[%s8948_s5 + $0x40] sm:$0xf0] }
 0x5c6   : > { %913 = vmatpush.msra.mxu3 %v893_v36  ;;  %v789_v37 = vsel %vm786_vm14, %v788_v34, %v784_v6  ;;  %vm884_vm3 = vmor %vm882_vm2, %vm883_vm15  ;;  %v947_v8 = vmul.f32 32.0, %v7145_v7  ;;  %vm951_vm5 = vweird.f32 %v7145_v7  ;;  %v5170_v27 = vor.u32 %v6756_v25, %v5167_v26  ;;  %v6748_v34 = vld [vmem:[%s8948_s5 + $0x44] sm:$0xf0]  ;;  %v6740_v6 = vld [vmem:[%s8948_s5 + $0xc] sm:$0xf] }
 0x5c7   : > { %v879_v38 = vsub.f32 1.0, %v878_v35  ;;  %v790_v39 = vmul.f32 %v7137_v17, %v789_v37  ;;  %v6763_v17 = vld [vmem:[%s8948_s5 + $0xbc] sm:$0xf0]  ;;  %v5098_v35 = vor.u32 %v6739_v30, %v5095_v32  ;;  %v5103_v37 = vld [vmem:[%s8948_s5 + $0x48] sm:$0xf0] }
 0x5c8   : > { %v948_v9 = vsub.f32 1.0, %v947_v8  ;;  %v5158_v19 = vor.u32 %v6763_v17, %v5157_v16  ;;  %1257 = vmatpush.bf16.msra.mxu2 %v5170_v27  ;;  %v5189_v16 = vld [vmem:[%s8948_s5 + $0xa0] sm:$0xf]  ;;  %v5127_v32 = vld [vmem:[%s8948_s5 + $0x60] sm:$0xf0] }
 0x5c9   : > { %v880_v41 = vmul.f32 %v7143_v33, %v879_v38  ;;  %5085 = vmatmul.msk.f32.vlgmr.msrb.gmra.mxu3 %vm538_vm1, %v790_v39  ;;  %v5106_v38 = vor.u32 %v6740_v6, %v5103_v37  ;;  %v6767_v17 = vld [vmem:[%s8948_s5 + $0xdc] sm:$0xf0] }
 0x5ca   : > { %v949_v10 = vmul.f32 %v7145_v7, %v948_v9  ;;  %1218 = vmatpush.bf16.msrb.mxu1 %v5158_v19  ;;  %1231 = vmatpush.bf16.msrb.mxu3 %v5162_v23  ;;  %v5191_v19 = vld [vmem:[%s8948_s5 + $0xe0] sm:$0xf0]  ;;  %v5199_v23 = vld [vmem:[%s8948_s5 + $0xe8] sm:$0xf0]  ;;  %v5190_v25 = vor.u32 %v6767_v17, %v5189_v16  ;;  %v5125_v27 = vld [vmem:[%s8948_s5 + $0x20] sm:$0xf] }
 0x5cb   : > { %v881_v44 = vadd.f32 %v7143_v33, %v880_v41  ;;  %v6765_v41 = vld [vmem:[%s8948_s5 + $0xcc] sm:$0xf0]  ;;  %v5194_v26 = vor.u32 %v6759_v18, %v5191_v19  ;;  %v5126_v6 = vor.u32 %v6751_v28, %v5125_v27  ;;  %v6791_v16 = vld [vmem:[%s8950_s7 + $0xa0] sm:$0xff]  ;;  %v6774_v19 = vld [vmem:[%s8950_s7 + $0x18] sm:$0xff] }
 0x5cc   : > { %v950_v11 = vadd.f32 %v7145_v7, %v949_v10  ;;  %1258 = vmatpush.bf16.msra.mxu2 %v5106_v38  ;;  %v6783_v17 = vld [vmem:[%s8950_s7 + $0x60] sm:$0xff]  ;;  %v6772_v27 = vld [vmem:[%s8950_s7 + $0x8] sm:$0xff] }
 0x5cd   : > { %v885_v46 = vsel %vm884_vm3, %v7143_v33, %v881_v44  ;;  %v5101_v33 = vld [vmem:[%s8948_s5 + $0x8] sm:$0xf]  ;;  %v6799_v18 = vld [vmem:[%s8950_s7 + $0xe0] sm:$0xff] }
 0x5ce   : > { %v890_v47 = vsel %vm887_vm4, %v889_v45, %v885_v46  ;;  %v7471_v43 = vsel %vm951_vm5, %v7145_v7, %v950_v11  ;;  %v5102_v36 = vor.u32 %v6748_v34, %v5101_v33  ;;  %1219 = vmatpush.bf16.msrb.mxu1 %v5094_v31  ;;  %1232 = vmatpush.bf16.msrb.mxu3 %v5098_v35  ;;  %v5175_v46 = vld [vmem:[%s8948_s5 + $0xd0] sm:$0xf0]  ;;  %v7114_v11 = vld [vmem:[%s8952_s9] ss:$0 sm:$0xff]  ;;  %v6743_v31 = vld [vmem:[%s8948_s5 + $0x24] sm:$0xf] }
 0x5cf   : > { %v891_v48 = vmul.f32 %v7139_v21, %v890_v47  ;;  %v5165_v21 = vld [vmem:[%s8948_s5 + $0x88] sm:$0xf]  ;;  %v5174_v45 = vor.u32 %v6765_v41, %v5173_v40  ;;  %v5181_v47 = vld [vmem:[%s8948_s5 + $0x98] sm:$0xf]  ;;  %v5178_v49 = vor.u32 %v6757_v42, %v5175_v46  ;;  %v6744_v35 = vld [vmem:[%s8948_s5 + $0x2c] sm:$0xf]  ;;  %v5130_v37 = vor.u32 %v6743_v31, %v5127_v32 }
 0x5d0   : > { %v5166_v24 = vor.u32 %v6764_v22, %v5165_v21  ;;  %v6768_v21 = vld [vmem:[%s8948_s5 + $0xe4] sm:$0xf0]  ;;  %v6760_v22 = vld [vmem:[%s8948_s5 + $0xac] sm:$0xf]  ;;  %v5205_v40 = vld [vmem:[%s8948_s5 + $0xb0] sm:$0xf] }
 0x5d1   : > { %5089 = vmatmul.msk.f32.vlgmr.msra.gmra.mxu3 %vm538_vm1, %v891_v48  ;;  %v6766_v48 = vld [vmem:[%s8948_s5 + $0xd4] sm:$0xf0]  ;;  %v5202_v30 = vor.u32 %v6760_v22, %v5199_v23  ;;  %v5133_v33 = vld [vmem:[%s8948_s5 + $0x28] sm:$0xf]  ;;  %v6769_v41 = vld [vmem:[%s8948_s5 + $0xec] sm:$0xf0] }
 0x5d2   : > { %1244 = vmatpush.bf16.msrb.mxu0 %v5166_v24  ;;  %v5182_v50 = vor.u32 %v6766_v48, %v5181_v47  ;;  %1270 = vmatpush.bf16.msra.mxu1 %v5174_v45  ;;  %v6752_v34 = vld [vmem:[%s8948_s5 + $0x64] sm:$0xf0]  ;;  %v6761_v42 = vld [vmem:[%s8948_s5 + $0xb4] sm:$0xf]  ;;  %v5213_v45 = vld [vmem:[%s8948_s5 + $0xb8] sm:$0xf] }
 0x5d3   : > { %1283 = vmatpush.bf16.msra.mxu3 %v5178_v49  ;;  %v5134_v38 = vor.u32 %v6752_v34, %v5133_v33  ;;  %v6770_v46 = vld [vmem:[%s8948_s5 + $0xf4] sm:$0xf0]  ;;  %v6762_v47 = vld [vmem:[%s8948_s5 + $0xbc] sm:$0xf]  ;;  %v5206_v49 = vor.u32 %v6769_v41, %v5205_v40  ;;  %v6773_v23 = vld [vmem:[%s8950_s7 + $0x10] sm:$0xff] }
 0x5d4   : > { %v5215_v48 = vld [vmem:[%s8948_s5 + $0xf8] sm:$0xf0]  ;;  %v6788_v28 = vld [vmem:[%s8950_s7 + $0x88] sm:$0xff]  ;;  %v6771_v31 = vld [vmem:[%s8950_s7] sm:$0xff] }
 0x5d5   : > { %v6798_v22 = vld [vmem:[%s8950_s7 + $0xd8] sm:$0xff]  ;;  %v6787_v32 = vld [vmem:[%s8950_s7 + $0x80] sm:$0xff]  ;;  %v6817_v40 = vld [vmem:[%s8950_s7 + $0x170] sm:$0xff] }
 0x5d6   : > { %1245 = vmatpush.bf16.msrb.mxu0 %v5102_v36  ;;  %v5135_v36 = vld [vmem:[%s8948_s5 + $0x68] sm:$0xf0]  ;;  %v6810_v33 = vld [vmem:[%s8950_s7 + $0x138] sm:$0xff]  ;;  %v6833_v41 = vld [vmem:[%s8950_s7 + $0x1f0] sm:$0xff] }
 0x5d7   : > { %v6826_v34 = vld [vmem:[%s8950_s7 + $0x1b8] sm:$0xff] }
 0x64c   : > { %v814_v53 = vpop.f32.mrf.mxu3 }
 0x64d   : > { %v817_v54 = vpack.c.bf16 %v814_v53, %v814_v53  ;;  %v5109_v53 = vld [vmem:[%s8948_s5 + $0x10] sm:$0xf] }
 0x64f   : > { %5086 = vmatmul.msk.bf16.vlgmr.msra.gmra.mxu0 %vm538_vm1, %v817_v54 }
 0x650   : > { %1296 = vmatpush.bf16.msra.mxu0 %v5182_v50 }
 0x654   : > { %v915_v55 = vpop.f32.mrf.mxu3 }
 0x655   : > { %v918_v56 = vpack.c.bf16 %v915_v55, %v915_v55  ;;  %v5186_v55 = vor.u32 %v6758_v51, %v5183_v52  ;;  %v5141_v51 = vld [vmem:[%s8948_s5 + $0x30] sm:$0xf] }
 0x656   : > { %v6753_v52 = vld [vmem:[%s8948_s5 + $0x6c] sm:$0xf0] }
 0x657   : > { %5090 = vmatmul.msk.bf16.vlgmr.msrb.gmra.mxu2 %vm538_vm1, %v918_v56  ;;  %v6749_v56 = vld [vmem:[%s8948_s5 + $0x4c] sm:$0xf0] }
 0x658   : > { %v5110_v58 = vor.u32 %v6749_v56, %v5109_v53  ;;  %1309 = vmatpush.bf16.msrb.mxu2 %v5186_v55  ;;  %v5214_v53 = vor.u32 %v6770_v46, %v5213_v45  ;;  %v6745_v55 = vld [vmem:[%s8948_s5 + $0x34] sm:$0xf]  ;;  %v6816_v45 = vld [vmem:[%s8950_s7 + $0x168] sm:$0xff] }
 0x659   : > { %v5143_v56 = vld [vmem:[%s8948_s5 + $0x70] sm:$0xf0]  ;;  %v6832_v46 = vld [vmem:[%s8950_s7 + $0x1e8] sm:$0xff] }
 0x65a   : > { %1271 = vmatpush.bf16.msra.mxu1 %v5110_v58  ;;  %v6754_v58 = vld [vmem:[%s8948_s5 + $0x74] sm:$0xf0] }
 0x6cc   : > { %v834_v57 = vpop.f32.mrf.mxu0 }
 0x6cd   : > { %v838_v62 = vadd.f32 %v834_v57, %v737_v61  ;;  %v6741_v57 = vld [vmem:[%s8948_s5 + $0x14] sm:$0xf]  ;;  %v6750_v61 = vld [vmem:[%s8948_s5 + $0x54] sm:$0xf0] }
 0x6d4   : > { %v836_v59 = vpop.f32.mrf.mxu0 }
 0x6d5   : > { %v5111_v59 = vld [vmem:[%s8948_s5 + $0x50] sm:$0xf0] }
 0x6da   : > { %v935_v63 = vpop.f32.mrf.mxu2 }
 0x6db   : > { %v939_v0 = vadd.f32 %v935_v63, %v838_v62  ;;  %v5114_v62 = vor.u32 %v6741_v57, %v5111_v59  ;;  %v5118_v63 = vor.u32 %v6750_v61, %v5117_v60  ;;  %v5149_v57 = vld [vmem:[%s8948_s5 + $0x38] sm:$0xf]  ;;  %v6746_v59 = vld [vmem:[%s8948_s5 + $0x3c] sm:$0xf]  ;;  %v5142_v61 = vor.u32 %v6753_v52, %v5141_v51 }
 0x6dc   : > { %v5151_v60 = vld [vmem:[%s8948_s5 + $0x78] sm:$0xf0] }
 0x6dd   : > { %v940_v1 = vadd.f32 %v939_v0, %v7387_v2  ;;  %v6742_v0 = vld [vmem:[%s8948_s5 + $0x1c] sm:$0xf]  ;;  %1284 = vmatpush.bf16.msra.mxu3 %v5114_v62  ;;  %1297 = vmatpush.bf16.msra.mxu0 %v5118_v63  ;;  %v5146_v62 = vor.u32 %v6745_v55, %v5143_v56  ;;  %v5150_v63 = vor.u32 %v6754_v58, %v5149_v57  ;;  %v6804_v57 = vld [vmem:[%s8950_s7 + $0x108] sm:$0xff] }
 0x6de   : > { %v6806_v51 = vld [vmem:[%s8950_s7 + $0x118] sm:$0xff]  ;;  %v6820_v58 = vld [vmem:[%s8950_s7 + $0x188] sm:$0xff] }
 0x6df   : > { %v943_v3 = vsel %vm513_vm0, %v940_v1, 0.0  ;;  %v6822_v52 = vld [vmem:[%s8950_s7 + $0x198] sm:$0xff] }
 0x6e0   : > { %944 = vadd.xlane.f32.xlu1 %v943_v3  ;;  %v6814_v55 = vld [vmem:[%s8950_s7 + $0x158] sm:$0xff] }
 0x6e1   : > { %v6830_v56 = vld [vmem:[%s8950_s7 + $0x1d8] sm:$0xff] }
 0x6e2   : > { %v937_v4 = vpop.f32.mrf.mxu2 }
 0x753   : > { %v945_v12 = vpop.xlane.xlu1 %944 }
 0x754   : > { %v953_v13 = vmul.f32 %v7471_v43, %v945_v12 }
 0x756   : > { %v7474_v14 = vsub.f32 %v940_v1, %v953_v13  ;;  %v5119_v1 = vld [vmem:[%s8948_s5 + $0x58] sm:$0xf0]  ;;  %v7115_v13 = vld [vmem:[%s8953_s10] ss:$0 sm:$0xff] }
 0x757   : > { %v5122_v3 = vor.u32 %v6742_v0, %v5119_v1  ;;  %v5154_v0 = vor.u32 %v6746_v59, %v5151_v60  ;;  %v6778_v1 = vld [vmem:[%s8950_s7 + $0x38] sm:$0xff]  ;;  %v6813_v59 = vld [vmem:[%s8950_s7 + $0x150] sm:$0xff] }
 0x758   : > { %v955_v2 = vmul.f32 %v7474_v14, %v7474_v14  ;;  %v6829_v60 = vld [vmem:[%s8950_s7 + $0x1d0] sm:$0xff] }
 0x759   : > { %1310 = vmatpush.bf16.msrb.mxu2 %v5122_v3  ;;  %v6794_v3 = vld [vmem:[%s8950_s7 + $0xb8] sm:$0xff] }
 0x75a   : > { %v956_v15 = vsel %vm513_vm0, %v955_v2, 0.0 }
 0x75b   : > { %957 = vadd.xlane.f32.xlu0 %v956_v15 }
 0x7ce   : > { %v958_v39 = vpop.xlane.xlu0 %957 }
 0x7cf   : > { %v959_v44 = vmul.f32 %v958_v39, %v7471_v43  ;;  %v5138_v39 = vor.u32 %v6744_v35, %v5135_v36  ;;  %v6779_v35 = vld [vmem:[%s8950_s7 + $0x40] sm:$0xff] }
 0x7d0   : > { %v6795_v36 = vld [vmem:[%s8950_s7 + $0xc0] sm:$0xff] }
 0x7d1   : > { %v960_v54 = vadd.f32 1e-05, %v959_v44  ;;  %v5207_v44 = vld [vmem:[%s8948_s5 + $0xf0] sm:$0xf0] }
 0x7d2   : > { %v5210_v50 = vor.u32 %v6761_v42, %v5207_v44  ;;  %v6808_v42 = vld [vmem:[%s8950_s7 + $0x128] sm:$0xff] }
 0x7d3   : > { %7146 = vrsqrt.f32 %v960_v54  ;;  %vm967_vm8 = vweird.f32 %v960_v54  ;;  %v6824_v44 = vld [vmem:[%s8950_s7 + $0x1a8] sm:$0xff] }
 0x7d9   : > { %v7147_v4 = vpop.eup %7146 }
 0x7da   : > { %v962_v5 = vmul.f32 %v7147_v4, %v960_v54  ;;  %vm968_vm7 = vweird.f32 %v7147_v4  ;;  %v5218_v54 = vor.u32 %v6762_v47, %v5215_v48  ;;  %v6807_v47 = vld [vmem:[%s8950_s7 + $0x120] sm:$0xff] }
 0x7db   : > { %vm969_vm9 = vmor %vm967_vm8, %vm968_vm7  ;;  %v6823_v48 = vld [vmem:[%s8950_s7 + $0x1a0] sm:$0xff] }
 0x7dc   : > { %v963_v7 = vmul.f32 %v7147_v4, %v962_v5  ;;  %v6802_v5 = vld [vmem:[%s8950_s7 + $0xf8] sm:$0xff] }
 0x7de   : > { %v964_v8 = vmul.f32 0.5, %v963_v7  ;;  %v6777_v7 = vld [vmem:[%s8950_s7 + $0x30] sm:$0xff] }
 0x7e0   : > { %v965_v9 = vsub.f32 1.5, %v964_v8  ;;  %v6793_v8 = vld [vmem:[%s8950_s7 + $0xb0] sm:$0xff] }
 0x7e2   : > { %v966_v10 = vmul.f32 %v7147_v4, %v965_v9  ;;  %v6785_v9 = vld [vmem:[%s8950_s7 + $0x70] sm:$0xff] }
 0x7e4   : > { %v970_v12 = vsel %vm969_vm9, %v7147_v4, %v966_v10  ;;  %v6786_v4 = vld [vmem:[%s8950_s7 + $0x78] sm:$0xff]  ;;  %v6801_v10 = vld [vmem:[%s8950_s7 + $0xf0] sm:$0xff] }
 0x7e5   : > { %v971_v2 = vmul.f32 %v970_v12, %v7474_v14  ;;  %v5197_v14 = vld [vmem:[%s8948_s5 + $0xa8] sm:$0xf] }
 0x7e6   : > { %v5198_v29 = vor.u32 %v6768_v21, %v5197_v14  ;;  %v6792_v12 = vld [vmem:[%s8950_s7 + $0xa8] sm:$0xff]  ;;  %v6790_v14 = vld [vmem:[%s8950_s7 + $0x98] sm:$0xff] }
 0x7e7   : > { %v975_v15 = vmul.f32 %v7114_v11, %v971_v2  ;;  %v6776_v11 = vld [vmem:[%s8950_s7 + $0x28] sm:$0xff]  ;;  %v6782_v21 = vld [vmem:[%s8950_s7 + $0x58] sm:$0xff] }
 0x7e8   : > { %v6800_v2 = vld [vmem:[%s8950_s7 + $0xe8] sm:$0xff] }
 0x7e9   : > { %v7598_v20 = vadd.f32 %v7115_v13, %v975_v15  ;;  %v6784_v13 = vld [vmem:[%s8950_s7 + $0x68] sm:$0xff]  ;;  %v6775_v15 = vld [vmem:[%s8950_s7 + $0x20] sm:$0xff] }
 0x7eb   : > { %v7611_v24 = vpack.c.bf16 %v7598_v20, %v7598_v20 }
 0x7ed   : > { %5219 = vmatmul.msk.bf16.vlgmr.msrb.gmra.mxu1 %vm513_vm0, %v7611_v24  ;;  %5220 = vmatmul.msk.bf16.vlgmr.msrb.gmra.mxu3 %vm513_vm0, %v7611_v24 }
 0x7ee   : > { %5221 = vmatmul.msk.bf16.vlgmr.msrb.gmra.mxu0 %vm513_vm0, %v7611_v24  ;;  %5222 = vmatmul.msk.bf16.vlgmr.msra.gmra.mxu2 %vm513_vm0, %v7611_v24 }
 0x7ef   : > { %1322 = vmatpush.bf16.msrb.mxu1 %v5190_v25  ;;  %1335 = vmatpush.bf16.msrb.mxu3 %v5194_v26  ;;  %v6789_v25 = vld [vmem:[%s8950_s7 + $0x90] sm:$0xff] }
 0x7f0   : > { %1348 = vmatpush.bf16.msrb.mxu0 %v5198_v29  ;;  %1361 = vmatpush.bf16.msra.mxu2 %v5202_v30  ;;  %v6781_v26 = vld [vmem:[%s8950_s7 + $0x50] sm:$0xff]  ;;  %v6780_v29 = vld [vmem:[%s8950_s7 + $0x48] sm:$0xff] }
 0x7f1   : > { %v6796_v30 = vld [vmem:[%s8950_s7 + $0xc8] sm:$0xff] }
 0x7f3   : > { %1323 = vmatpush.bf16.msrb.mxu1 %v5126_v6  ;;  %1336 = vmatpush.bf16.msrb.mxu3 %v5130_v37  ;;  %v6818_v6 = vld [vmem:[%s8950_s7 + $0x178] sm:$0xff] }
 0x7f4   : > { %1349 = vmatpush.bf16.msrb.mxu0 %v5134_v38  ;;  %1362 = vmatpush.bf16.msra.mxu2 %v5138_v39  ;;  %v6834_v37 = vld [vmem:[%s8950_s7 + $0x1f8] sm:$0xff]  ;;  %v6809_v38 = vld [vmem:[%s8950_s7 + $0x130] sm:$0xff] }
 0x7f5   : > { %v6825_v39 = vld [vmem:[%s8950_s7 + $0x1b0] sm:$0xff] }
 0x7fd   : > { %5223 = vmatmul.msk.bf16.vlgmr.msra.gmra.mxu1 %vm513_vm0, %v7611_v24  ;;  %5224 = vmatmul.msk.bf16.vlgmr.msra.gmra.mxu3 %vm513_vm0, %v7611_v24 }
 0x7fe   : > { %5225 = vmatmul.msk.bf16.vlgmr.msra.gmra.mxu0 %vm513_vm0, %v7611_v24  ;;  %5226 = vmatmul.msk.bf16.vlgmr.msrb.gmra.mxu2 %vm513_vm0, %v7611_v24 }
 0x7ff   : > { %1374 = vmatpush.bf16.msra.mxu1 %v5206_v49  ;;  %1387 = vmatpush.bf16.msra.mxu3 %v5210_v50  ;;  %v6815_v49 = vld [vmem:[%s8950_s7 + $0x160] sm:$0xff] }
 0x800   : > { %1400 = vmatpush.bf16.msra.mxu0 %v5214_v53  ;;  %1413 = vmatpush.bf16.msrb.mxu2 %v5218_v54  ;;  %v6831_v50 = vld [vmem:[%s8950_s7 + $0x1e0] sm:$0xff]  ;;  %v6805_v53 = vld [vmem:[%s8950_s7 + $0x110] sm:$0xff] }
 0x801   : > { %v6821_v54 = vld [vmem:[%s8950_s7 + $0x190] sm:$0xff] }
 0x803   : > { %1375 = vmatpush.bf16.msra.mxu1 %v5142_v61  ;;  %1388 = vmatpush.bf16.msra.mxu3 %v5146_v62  ;;  %v6803_v61 = vld [vmem:[%s8950_s7 + $0x100] sm:$0xff] }
 0x804   : > { %1401 = vmatpush.bf16.msra.mxu0 %v5150_v63  ;;  %1414 = vmatpush.bf16.msrb.mxu2 %v5154_v0  ;;  %v6819_v62 = vld [vmem:[%s8950_s7 + $0x180] sm:$0xff]  ;;  %v6812_v63 = vld [vmem:[%s8950_s7 + $0x148] sm:$0xff] }
 0x805   : > { %v6828_v0 = vld [vmem:[%s8950_s7 + $0x1c8] sm:$0xff] }
 0x80d   : > { %5227 = vmatmul.msk.bf16.vlgmr.msrb.gmra.mxu1 %vm513_vm0, %v7611_v24  ;;  %5228 = vmatmul.msk.bf16.vlgmr.msrb.gmra.mxu3 %vm513_vm0, %v7611_v24 }
 0x80e   : > { %5229 = vmatmul.msk.bf16.vlgmr.msrb.gmra.mxu0 %vm513_vm0, %v7611_v24  ;;  %5230 = vmatmul.msk.bf16.vlgmr.msra.gmra.mxu2 %vm513_vm0, %v7611_v24 }
 0x80f   : > { %2480 = vmatpush.bf16.msrb.mxu1 %v6778_v1  ;;  %2506 = vmatpush.bf16.msrb.mxu0 %v6794_v3  ;;  %v6811_v1 = vld [vmem:[%s8950_s7 + $0x140] sm:$0xff] }
 0x810   : > { %2493 = vmatpush.bf16.msrb.mxu3 %v6786_v4  ;;  %2519 = vmatpush.bf16.msra.mxu2 %v6802_v5  ;;  %v6827_v3 = vld [vmem:[%s8950_s7 + $0x1c0] sm:$0xff] }
 0x811   : > { %v7912_v4 = vld [vmem:[%s8949_s6] sm:$0xff] }
 0x812   : > { %v1017_v5 = vperm.slane %v7912_v4, 0 }
 0x813   : > { %2481 = vmatpush.bf16.msrb.mxu1 %v6777_v7  ;;  %2507 = vmatpush.bf16.msrb.mxu0 %v6793_v8  ;;  %v1019_v7 = vperm.slane %v7912_v4, 2 }
 0x814   : > { %2494 = vmatpush.bf16.msrb.mxu3 %v6785_v9  ;;  %2520 = vmatpush.bf16.msra.mxu2 %v6801_v10 }
 0x817   : > { %2482 = vmatpush.bf16.msrb.mxu1 %v6776_v11  ;;  %2508 = vmatpush.bf16.msrb.mxu0 %v6792_v12 }
 0x818   : > { %2495 = vmatpush.bf16.msrb.mxu3 %v6784_v13  ;;  %2521 = vmatpush.bf16.msra.mxu2 %v6800_v2  ;;  %v1018_v13 = vperm.slane %v7912_v4, 1 }
 0x81b   : > { %2483 = vmatpush.bf16.msrb.mxu1 %v6775_v15  ;;  %2509 = vmatpush.bf16.msrb.mxu0 %v6791_v16  ;;  %v1020_v15 = vperm.slane %v7912_v4, 3  ;;  %v6842_v16 = vld [vmem:[%s8950_s7 + $0x238] sm:$0xff] }
 0x81c   : > { %2496 = vmatpush.bf16.msrb.mxu3 %v6783_v17  ;;  %2522 = vmatpush.bf16.msra.mxu2 %v6799_v18  ;;  %v6858_v18 = vld [vmem:[%s8950_s7 + $0x2b8] sm:$0xff] }
 0x81d   : > { %5231 = vmatmul.msk.bf16.vlgmr.msra.gmra.mxu1 %vm513_vm0, %v7611_v24  ;;  %5232 = vmatmul.msk.bf16.vlgmr.msra.gmra.mxu3 %vm513_vm0, %v7611_v24 }
 0x81e   : > { %5233 = vmatmul.msk.bf16.vlgmr.msra.gmra.mxu0 %vm513_vm0, %v7611_v24  ;;  %5234 = vmatmul.msk.bf16.vlgmr.msrb.gmra.mxu2 %vm513_vm0, %v7611_v24  ;;  %v6797_v24 = vld [vmem:[%s8950_s7 + $0xd0] sm:$0xff] }
 0x81f   : > { %2484 = vmatpush.bf16.msrb.mxu1 %v6774_v19  ;;  %2510 = vmatpush.bf16.msrb.mxu0 %v6790_v14 }
 0x820   : > { %2497 = vmatpush.bf16.msrb.mxu3 %v6782_v21  ;;  %2523 = vmatpush.bf16.msra.mxu2 %v6798_v22 }
 0x823   : > { %2485 = vmatpush.bf16.msrb.mxu1 %v6773_v23  ;;  %2511 = vmatpush.bf16.msrb.mxu0 %v6789_v25 }
 0x824   : > { %2498 = vmatpush.bf16.msrb.mxu3 %v6781_v26  ;;  %2524 = vmatpush.bf16.msra.mxu2 %v6797_v24  ;;  %v6841_v26 = vld [vmem:[%s8950_s7 + $0x230] sm:$0xff] }
 0x827   : > { %2486 = vmatpush.bf16.msrb.mxu1 %v6772_v27  ;;  %2512 = vmatpush.bf16.msrb.mxu0 %v6788_v28  ;;  %v6857_v28 = vld [vmem:[%s8950_s7 + $0x2b0] sm:$0xff] }
 0x828   : > { %2499 = vmatpush.bf16.msrb.mxu3 %v6780_v29  ;;  %2525 = vmatpush.bf16.msra.mxu2 %v6796_v30  ;;  %v6850_v30 = vld [vmem:[%s8950_s7 + $0x278] sm:$0xff] }
 0x82b   : > { %2487 = vmatpush.bf16.msrb.mxu1 %v6771_v31  ;;  %2513 = vmatpush.bf16.msrb.mxu0 %v6787_v32  ;;  %v6866_v32 = vld [vmem:[%s8950_s7 + $0x2f8] sm:$0xff] }
 0x82c   : > { %2500 = vmatpush.bf16.msrb.mxu3 %v6779_v35  ;;  %2526 = vmatpush.bf16.msra.mxu2 %v6795_v36  ;;  %v6856_v35 = vld [vmem:[%s8950_s7 + $0x2a8] sm:$0xff]  ;;  %v1021_v36 = vperm.slane %v7912_v4, 4 }
 0x82f   : > { %2532 = vmatpush.bf16.msra.mxu1 %v6810_v33  ;;  %2558 = vmatpush.bf16.msra.mxu0 %v6826_v34  ;;  %v6840_v34 = vld [vmem:[%s8950_s7 + $0x228] sm:$0xff] }
 0x830   : > { %2545 = vmatpush.bf16.msra.mxu3 %v6818_v6  ;;  %2571 = vmatpush.bf16.msrb.mxu2 %v6834_v37  ;;  %v1023_v37 = vperm.slane %v7912_v4, 6 }
 0x833   : > { %2533 = vmatpush.bf16.msra.mxu1 %v6809_v38  ;;  %2559 = vmatpush.bf16.msra.mxu0 %v6825_v39  ;;  %v6849_v38 = vld [vmem:[%s8950_s7 + $0x270] sm:$0xff] }
 0x834   : > { %2546 = vmatpush.bf16.msra.mxu3 %v6817_v40  ;;  %2572 = vmatpush.bf16.msrb.mxu2 %v6833_v41  ;;  %v6865_v40 = vld [vmem:[%s8950_s7 + $0x2f0] sm:$0xff] }
 0x837   : > { %2534 = vmatpush.bf16.msra.mxu1 %v6808_v42  ;;  %2560 = vmatpush.bf16.msra.mxu0 %v6824_v44  ;;  %v6839_v42 = vld [vmem:[%s8950_s7 + $0x220] sm:$0xff] }
 0x838   : > { %2547 = vmatpush.bf16.msra.mxu3 %v6816_v45  ;;  %2573 = vmatpush.bf16.msrb.mxu2 %v6832_v46  ;;  %v6855_v46 = vld [vmem:[%s8950_s7 + $0x2a0] sm:$0xff] }
 0x83b   : > { %2535 = vmatpush.bf16.msra.mxu1 %v6807_v47  ;;  %2561 = vmatpush.bf16.msra.mxu0 %v6823_v48  ;;  %v6848_v48 = vld [vmem:[%s8950_s7 + $0x268] sm:$0xff] }
 0x83c   : > { %2548 = vmatpush.bf16.msra.mxu3 %v6815_v49  ;;  %2574 = vmatpush.bf16.msrb.mxu2 %v6831_v50  ;;  %v6864_v50 = vld [vmem:[%s8950_s7 + $0x2e8] sm:$0xff] }
 0x83f   : > { %2536 = vmatpush.bf16.msra.mxu1 %v6806_v51  ;;  %2562 = vmatpush.bf16.msra.mxu0 %v6822_v52  ;;  %v1022_v51 = vperm.slane %v7912_v4, 5 }
 0x840   : > { %2549 = vmatpush.bf16.msra.mxu3 %v6814_v55  ;;  %2575 = vmatpush.bf16.msrb.mxu2 %v6830_v56  ;;  %v6854_v56 = vld [vmem:[%s8950_s7 + $0x298] sm:$0xff] }
 0x843   : > { %2537 = vmatpush.bf16.msra.mxu1 %v6805_v53  ;;  %2563 = vmatpush.bf16.msra.mxu0 %v6821_v54  ;;  %v1024_v53 = vperm.slane %v7912_v4, 7  ;;  %v6838_v54 = vld [vmem:[%s8950_s7 + $0x218] sm:$0xff] }
 0x844   : > { %2550 = vmatpush.bf16.msra.mxu3 %v6813_v59  ;;  %2576 = vmatpush.bf16.msrb.mxu2 %v6829_v60  ;;  %v6847_v59 = vld [vmem:[%s8950_s7 + $0x260] sm:$0xff] }
 0x847   : > { %2538 = vmatpush.bf16.msra.mxu1 %v6804_v57  ;;  %2564 = vmatpush.bf16.msra.mxu0 %v6820_v58 }
 0x848   : > { %2551 = vmatpush.bf16.msra.mxu3 %v6812_v63  ;;  %2577 = vmatpush.bf16.msrb.mxu2 %v6828_v0 }
 0x84b   : > { %2539 = vmatpush.bf16.msra.mxu1 %v6803_v61  ;;  %2565 = vmatpush.bf16.msra.mxu0 %v6819_v62  ;;  %v6863_v62 = vld [vmem:[%s8950_s7 + $0x2e0] sm:$0xff] }
 0x84c   : > { %2552 = vmatpush.bf16.msra.mxu3 %v6811_v1  ;;  %2578 = vmatpush.bf16.msrb.mxu2 %v6827_v3  ;;  %v6837_v1 = vld [vmem:[%s8950_s7 + $0x210] sm:$0xff] }
 0x86a   : > { %v1221_v8 = vpop.f32.mrf.mxu1 }
 0x86b   : > { %v1222_v9 = vadd.f32 %v1221_v8, %v1017_v5  ;;  %v1247_v10 = vpop.f32.mrf.mxu0  ;;  %v6853_v5 = vld [vmem:[%s8950_s7 + $0x290] sm:$0xff]  ;;  %v6846_v8 = vld [vmem:[%s8950_s7 + $0x258] sm:$0xff] }
 0x86c   : > { %v1248_v11 = vadd.f32 %v1247_v10, %v1019_v7 }
 0x86d   : > { %v1420_v12 = vmax.f32 %v1222_v9, 0.0  ;;  %v7988_v9 = vld [vmem:[%s8949_s6 + $0x8] sm:$0xff] }
 0x86e   : > { %v1422_v2 = vmax.f32 %v1248_v11, 0.0  ;;  %v6862_v11 = vld [vmem:[%s8950_s7 + $0x2d8] sm:$0xff] }
 0x86f   : > { %v1436_v17 = vpack.c.bf16 %v1420_v12, %v1420_v12 }
 0x870   : > { %v1438_v19 = vpack.c.bf16 %v1422_v2, %v1422_v2  ;;  %v1234_v14 = vpop.f32.mrf.mxu3  ;;  %v6852_v2 = vld [vmem:[%s8950_s7 + $0x288] sm:$0xff] }
 0x871   : > { %v1235_v21 = vadd.f32 %v1234_v14, %v1018_v13  ;;  %v1260_v22 = vpop.f32.mrf.mxu2  ;;  %2488 = vmatmul.bf16.vlgmr.msrb.gmra.mxu1 %v1436_v17  ;;  %v6836_v13 = vld [vmem:[%s8950_s7 + $0x208] sm:$0xff]  ;;  %v1027_v17 = vperm.slane %v7988_v9, 2  ;;  %v6861_v14 = vld [vmem:[%s8950_s7 + $0x2d0] sm:$0xff] }
 0x872   : > { %v1261_v23 = vadd.f32 %v1260_v22, %v1020_v15  ;;  %2514 = vmatmul.bf16.vlgmr.msrb.gmra.mxu0 %v1438_v19  ;;  %2584 = vmatpush.bf16.msrb.mxu1 %v6842_v16  ;;  %v1223_v25 = vpop.f32.mrf.mxu1  ;;  %v1025_v15 = vperm.slane %v7988_v9, 0  ;;  %v6835_v22 = vld [vmem:[%s8950_s7 + $0x200] sm:$0xff] }
 0x873   : > { %v1421_v24 = vmax.f32 %v1235_v21, 0.0  ;;  %2610 = vmatpush.bf16.msrb.mxu0 %v6858_v18  ;;  %v1249_v27 = vpop.f32.mrf.mxu0  ;;  %v6845_v18 = vld [vmem:[%s8950_s7 + $0x250] sm:$0xff] }
 0x874   : > { %v1423_v29 = vmax.f32 %v1261_v23, 0.0 }
 0x875   : > { %v1437_v31 = vpack.c.bf16 %v1421_v24, %v1421_v24  ;;  %v6874_v24 = vld [vmem:[%s8950_s7 + $0x338] sm:$0xff] }
 0x876   : > { %v1439_v33 = vpack.c.bf16 %v1423_v29, %v1423_v29  ;;  %2585 = vmatpush.bf16.msrb.mxu1 %v6841_v26  ;;  %v6851_v26 = vld [vmem:[%s8950_s7 + $0x280] sm:$0xff]  ;;  %v6844_v29 = vld [vmem:[%s8950_s7 + $0x248] sm:$0xff] }
 0x877   : > { %2611 = vmatpush.bf16.msrb.mxu0 %v6857_v28  ;;  %2501 = vmatmul.bf16.vlgmr.msrb.gmra.mxu3 %v1437_v31  ;;  %v6890_v28 = vld [vmem:[%s8950_s7 + $0x3b8] sm:$0xff]  ;;  %v6860_v31 = vld [vmem:[%s8950_s7 + $0x2c8] sm:$0xff] }
 0x878   : > { %2527 = vmatmul.bf16.vlgmr.msra.gmra.mxu2 %v1439_v33  ;;  %2597 = vmatpush.bf16.msrb.mxu3 %v6850_v30  ;;  %v1236_v6 = vpop.f32.mrf.mxu3 }
 0x879   : > { %2623 = vmatpush.bf16.msra.mxu2 %v6866_v32  ;;  %v1262_v39 = vpop.f32.mrf.mxu2  ;;  %v1026_v32 = vperm.slane %v7988_v9, 1 }
 0x87a   : > { %2586 = vmatpush.bf16.msrb.mxu1 %v6840_v34  ;;  %v1273_v41 = vpop.f32.mrf.mxu1  ;;  %v1028_v34 = vperm.slane %v7988_v9, 3  ;;  %v6843_v39 = vld [vmem:[%s8950_s7 + $0x240] sm:$0xff] }
 0x87b   : > { %2612 = vmatpush.bf16.msrb.mxu0 %v6856_v35  ;;  %v1274_v44 = vadd.f32 %v1273_v41, %v1021_v36  ;;  %v1299_v45 = vpop.f32.mrf.mxu0  ;;  %v6873_v36 = vld [vmem:[%s8950_s7 + $0x330] sm:$0xff] }
 0x87c   : > { %v1300_v47 = vadd.f32 %v1299_v45, %v1023_v37  ;;  %2598 = vmatpush.bf16.msrb.mxu3 %v6849_v38  ;;  %v6889_v38 = vld [vmem:[%s8950_s7 + $0x3b0] sm:$0xff] }
 0x87d   : > { %v1424_v49 = vmax.f32 %v1274_v44, 0.0  ;;  %2624 = vmatpush.bf16.msra.mxu2 %v6865_v40  ;;  %v6882_v44 = vld [vmem:[%s8950_s7 + $0x378] sm:$0xff] }
 0x87e   : > { %v1426_v52 = vmax.f32 %v1300_v47, 0.0  ;;  %2587 = vmatpush.bf16.msrb.mxu1 %v6839_v42  ;;  %v6859_v42 = vld [vmem:[%s8950_s7 + $0x2c0] sm:$0xff]  ;;  %v6898_v47 = vld [vmem:[%s8950_s7 + $0x3f8] sm:$0xff] }
 0x87f   : > { %v1440_v55 = vpack.c.bf16 %v1424_v49, %v1424_v49  ;;  %2613 = vmatpush.bf16.msrb.mxu0 %v6855_v46 }
 0x880   : > { %v1442_v57 = vpack.c.bf16 %v1426_v52, %v1426_v52  ;;  %2599 = vmatpush.bf16.msrb.mxu3 %v6848_v48  ;;  %v1286_v58 = vpop.f32.mrf.mxu3  ;;  %v6888_v52 = vld [vmem:[%s8950_s7 + $0x3a8] sm:$0xff] }
 0x881   : > { %2625 = vmatpush.bf16.msra.mxu2 %v6864_v50  ;;  %v1287_v60 = vadd.f32 %v1286_v58, %v1022_v51  ;;  %v1312_v61 = vpop.f32.mrf.mxu2  ;;  %2540 = vmatmul.bf16.vlgmr.msra.gmra.mxu1 %v1440_v55  ;;  %v6872_v50 = vld [vmem:[%s8950_s7 + $0x328] sm:$0xff] }
 0x882   : > { %v1313_v63 = vadd.f32 %v1312_v61, %v1024_v53  ;;  %2566 = vmatmul.bf16.vlgmr.msra.gmra.mxu0 %v1442_v57  ;;  %2588 = vmatpush.bf16.msrb.mxu1 %v6838_v54  ;;  %v1275_v0 = vpop.f32.mrf.mxu1  ;;  %v6881_v54 = vld [vmem:[%s8950_s7 + $0x370] sm:$0xff]  ;;  %v6871_v57 = vld [vmem:[%s8950_s7 + $0x320] sm:$0xff]  ;;  %v6880_v61 = vld [vmem:[%s8950_s7 + $0x368] sm:$0xff] }
 0x883   : > { %v1425_v3 = vmax.f32 %v1287_v60, 0.0  ;;  %2614 = vmatpush.bf16.msrb.mxu0 %v6854_v56  ;;  %v1301_v4 = vpop.f32.mrf.mxu0  ;;  %v6897_v56 = vld [vmem:[%s8950_s7 + $0x3f0] sm:$0xff] }
 0x884   : > { %v1427_v7 = vmax.f32 %v1313_v63, 0.0  ;;  %2600 = vmatpush.bf16.msrb.mxu3 %v6847_v59  ;;  %v6887_v59 = vld [vmem:[%s8950_s7 + $0x3a0] sm:$0xff]  ;;  %v6896_v63 = vld [vmem:[%s8950_s7 + $0x3e8] sm:$0xff] }
 0x885   : > { %v1441_v10 = vpack.c.bf16 %v1425_v3, %v1425_v3  ;;  %2626 = vmatpush.bf16.msra.mxu2 %v6863_v62  ;;  %v6886_v3 = vld [vmem:[%s8950_s7 + $0x398] sm:$0xff]  ;;  %v6879_v4 = vld [vmem:[%s8950_s7 + $0x360] sm:$0xff] }
 0x886   : > { %v1443_v12 = vpack.c.bf16 %v1427_v7, %v1427_v7  ;;  %2589 = vmatpush.bf16.msrb.mxu1 %v6837_v1  ;;  %v6870_v1 = vld [vmem:[%s8950_s7 + $0x318] sm:$0xff]  ;;  %v6869_v7 = vld [vmem:[%s8950_s7 + $0x310] sm:$0xff] }
 0x887   : > { %2615 = vmatpush.bf16.msrb.mxu0 %v6853_v5  ;;  %2553 = vmatmul.bf16.vlgmr.msra.gmra.mxu3 %v1441_v10  ;;  %v6895_v5 = vld [vmem:[%s8950_s7 + $0x3e0] sm:$0xff] }
 0x888   : > { %2579 = vmatmul.bf16.vlgmr.msrb.gmra.mxu2 %v1443_v12  ;;  %2601 = vmatpush.bf16.msrb.mxu3 %v6846_v8  ;;  %v1288_v16 = vpop.f32.mrf.mxu3  ;;  %v1029_v8 = vperm.slane %v7988_v9, 4  ;;  %v1031_v12 = vperm.slane %v7988_v9, 6 }
 0x889   : > { %2627 = vmatpush.bf16.msra.mxu2 %v6862_v11  ;;  %v1314_v19 = vpop.f32.mrf.mxu2  ;;  %v6885_v11 = vld [vmem:[%s8950_s7 + $0x390] sm:$0xff]  ;;  %v6894_v16 = vld [vmem:[%s8950_s7 + $0x3d8] sm:$0xff] }
 0x88a   : > { %2590 = vmatpush.bf16.msrb.mxu1 %v6836_v13  ;;  %v1325_v21 = vpop.f32.mrf.mxu1 }
 0x88b   : > { %2616 = vmatpush.bf16.msrb.mxu0 %v6852_v2  ;;  %v1326_v23 = vadd.f32 %v1325_v21, %v1025_v15  ;;  %v1351_v25 = vpop.f32.mrf.mxu0  ;;  %v6878_v2 = vld [vmem:[%s8950_s7 + $0x358] sm:$0xff] }
 0x88c   : > { %v1352_v27 = vadd.f32 %v1351_v25, %v1027_v17  ;;  %2602 = vmatpush.bf16.msrb.mxu3 %v6845_v18  ;;  %v6868_v18 = vld [vmem:[%s8950_s7 + $0x308] sm:$0xff]  ;;  %v6893_v25 = vld [vmem:[%s8950_s7 + $0x3d0] sm:$0xff] }
 0x88d   : > { %v1428_v30 = vmax.f32 %v1326_v23, 0.0  ;;  %2628 = vmatpush.bf16.msra.mxu2 %v6861_v14  ;;  %v6884_v14 = vld [vmem:[%s8950_s7 + $0x388] sm:$0xff]  ;;  %v1030_v23 = vperm.slane %v7988_v9, 5 }
 0x88e   : > { %v1430_v33 = vmax.f32 %v1352_v27, 0.0  ;;  %2591 = vmatpush.bf16.msrb.mxu1 %v6835_v22  ;;  %v6877_v22 = vld [vmem:[%s8950_s7 + $0x350] sm:$0xff] }
 0x88f   : > { %v1444_v35 = vpack.c.bf16 %v1428_v30, %v1428_v30  ;;  %2617 = vmatpush.bf16.msrb.mxu0 %v6851_v26  ;;  %v1032_v26 = vperm.slane %v7988_v9, 7 }
 0x890   : > { %v1446_v6 = vpack.c.bf16 %v1430_v33, %v1430_v33  ;;  %2603 = vmatpush.bf16.msrb.mxu3 %v6844_v29  ;;  %v1338_v37 = vpop.f32.mrf.mxu3  ;;  %v6883_v29 = vld [vmem:[%s8950_s7 + $0x380] sm:$0xff]  ;;  %v6892_v33 = vld [vmem:[%s8950_s7 + $0x3c8] sm:$0xff] }
 0x891   : > { %2629 = vmatpush.bf16.msra.mxu2 %v6860_v31  ;;  %v1339_v40 = vadd.f32 %v1338_v37, %v1026_v32  ;;  %v1364_v41 = vpop.f32.mrf.mxu2  ;;  %2592 = vmatmul.bf16.vlgmr.msrb.gmra.mxu1 %v1444_v35  ;;  %v6876_v32 = vld [vmem:[%s8950_s7 + $0x348] sm:$0xff] }
 0x892   : > { %2636 = vmatpush.bf16.msra.mxu1 %v6874_v24  ;;  %v1365_v45 = vadd.f32 %v1364_v41, %v1028_v34  ;;  %2618 = vmatmul.bf16.vlgmr.msrb.gmra.mxu0 %v1446_v6  ;;  %v1327_v46 = vpop.f32.mrf.mxu1  ;;  %v6867_v24 = vld [vmem:[%s8950_s7 + $0x300] sm:$0xff] }
 0x893   : > { %2662 = vmatpush.bf16.msra.mxu0 %v6890_v28  ;;  %v1429_v48 = vmax.f32 %v1339_v40, 0.0  ;;  %v1353_v49 = vpop.f32.mrf.mxu0  ;;  %v6875_v6 = vld [vmem:[%s8950_s7 + $0x340] sm:$0xff] }
 0x894   : > { %v1431_v51 = vmax.f32 %v1365_v45, 0.0  ;;  %2604 = vmatpush.bf16.msrb.mxu3 %v6843_v39 }
 0x895   : > { %v1445_v53 = vpack.c.bf16 %v1429_v48, %v1429_v48  ;;  %2630 = vmatpush.bf16.msra.mxu2 %v6859_v42 }
 0x896   : > { %2637 = vmatpush.bf16.msra.mxu1 %v6873_v36  ;;  %v1447_v55 = vpack.c.bf16 %v1431_v51, %v1431_v51 }
 0x897   : > { %2663 = vmatpush.bf16.msra.mxu0 %v6889_v38  ;;  %2605 = vmatmul.bf16.vlgmr.msrb.gmra.mxu3 %v1445_v53  ;;  %v6891_v38 = vld [vmem:[%s8950_s7 + $0x3c0] sm:$0xff] }
 0x898   : > { %2649 = vmatpush.bf16.msra.mxu3 %v6882_v44  ;;  %2631 = vmatmul.bf16.vlgmr.msra.gmra.mxu2 %v1447_v55  ;;  %v1340_v58 = vpop.f32.mrf.mxu3  ;;  %v7116_v55 = vld [vmem:[%s8951_s8] ss:$0 sm:$0xff] }
 0x899   : > { %2675 = vmatpush.bf16.msrb.mxu2 %v6898_v47  ;;  %v1366_v60 = vpop.f32.mrf.mxu2 }
 0x89a   : > { %2638 = vmatpush.bf16.msra.mxu1 %v6872_v50  ;;  %v1377_v62 = vpop.f32.mrf.mxu1 }
 0x89b   : > { %2664 = vmatpush.bf16.msra.mxu0 %v6888_v52  ;;  %v1403_v0 = vpop.f32.mrf.mxu0  ;;  %v1378_v19 = vadd.f32 %v1377_v62, %v1029_v8 }
 0x89c   : > { %2650 = vmatpush.bf16.msra.mxu3 %v6881_v54  ;;  %v1404_v21 = vadd.f32 %v1403_v0, %v1031_v12 }
 0x89d   : > { %2676 = vmatpush.bf16.msrb.mxu2 %v6897_v56  ;;  %v1432_v27 = vmax.f32 %v1378_v19, 0.0 }
 0x89e   : > { %2639 = vmatpush.bf16.msra.mxu1 %v6871_v57  ;;  %v1434_v30 = vmax.f32 %v1404_v21, 0.0 }
 0x89f   : > { %2665 = vmatpush.bf16.msra.mxu0 %v6887_v59  ;;  %v1448_v35 = vpack.c.bf16 %v1432_v27, %v1432_v27 }
 0x8a0   : > { %2651 = vmatpush.bf16.msra.mxu3 %v6880_v61  ;;  %v1390_v10 = vpop.f32.mrf.mxu3  ;;  %v1450_v36 = vpack.c.bf16 %v1434_v30, %v1434_v30 }
 0x8a1   : > { %2677 = vmatpush.bf16.msrb.mxu2 %v6896_v63  ;;  %v1416_v13 = vpop.f32.mrf.mxu2  ;;  %v1391_v9 = vadd.f32 %v1390_v10, %v1030_v23 }
 0x8a2   : > { %2640 = vmatpush.bf16.msra.mxu1 %v6870_v1  ;;  %v1379_v15 = vpop.f32.mrf.mxu1  ;;  %v1417_v34 = vadd.f32 %v1416_v13, %v1032_v26 }
 0x8a3   : > { %2666 = vmatpush.bf16.msra.mxu0 %v6886_v3  ;;  %v1405_v17 = vpop.f32.mrf.mxu0  ;;  %v1433_v37 = vmax.f32 %v1391_v9, 0.0 }
 0x8a4   : > { %2652 = vmatpush.bf16.msra.mxu3 %v6879_v4  ;;  %v1435_v39 = vmax.f32 %v1417_v34, 0.0 }
 0x8a5   : > { %2678 = vmatpush.bf16.msrb.mxu2 %v6895_v5  ;;  %v1449_v40 = vpack.c.bf16 %v1433_v37, %v1433_v37 }
 0x8a6   : > { %2641 = vmatpush.bf16.msra.mxu1 %v6869_v7  ;;  %v1451_v41 = vpack.c.bf16 %v1435_v39, %v1435_v39 }
 0x8a7   : > { %2667 = vmatpush.bf16.msra.mxu0 %v6885_v11 }
 0x8a8   : > { %2653 = vmatpush.bf16.msra.mxu3 %v6878_v2  ;;  %v1392_v28 = vpop.f32.mrf.mxu3 }
 0x8a9   : > { %2679 = vmatpush.bf16.msrb.mxu2 %v6894_v16  ;;  %v1418_v31 = vpop.f32.mrf.mxu2 }
 0x8aa   : > { %2642 = vmatpush.bf16.msra.mxu1 %v6868_v18 }
 0x8ab   : > { %2668 = vmatpush.bf16.msra.mxu0 %v6884_v14 }
 0x8ac   : > { %2654 = vmatpush.bf16.msra.mxu3 %v6877_v22 }
 0x8ad   : > { %2680 = vmatpush.bf16.msrb.mxu2 %v6893_v25 }
 0x8ae   : > { %2643 = vmatpush.bf16.msra.mxu1 %v6867_v24 }
 0x8af   : > { %2669 = vmatpush.bf16.msra.mxu0 %v6883_v29 }
 0x8b0   : > { %2655 = vmatpush.bf16.msra.mxu3 %v6876_v32 }
 0x8b1   : > { %2681 = vmatpush.bf16.msrb.mxu2 %v6892_v33  ;;  %2644 = vmatmul.bf16.vlgmr.msra.gmra.mxu1 %v1448_v35 }
 0x8b2   : > { %2670 = vmatmul.bf16.vlgmr.msra.gmra.mxu0 %v1450_v36 }
 0x8b4   : > { %2656 = vmatpush.bf16.msra.mxu3 %v6875_v6  ;;  %v6900_v6 = vld [vmem:[%s8944_s1 + $0x18] sm:$0xff] }
 0x8b5   : > { %2682 = vmatpush.bf16.msrb.mxu2 %v6891_v38  ;;  %2753 = vmatpush.bf16.msrb.mxu1 %v6900_v6 }
 0x8b7   : > { %2657 = vmatmul.bf16.vlgmr.msra.gmra.mxu3 %v1449_v40 }
 0x8b8   : > { %2683 = vmatmul.bf16.vlgmr.msrb.gmra.mxu2 %v1451_v41 }
 0x8ee   : > { %v2489_v42 = vpop.f32.mrf.mxu1 }
 0x8ef   : > { %v2515_v44 = vpop.f32.mrf.mxu0  ;;  %v2490_v58 = vadd.f32 %v7116_v55, %v2489_v42 }
 0x8f6   : > { %v2491_v45 = vpop.f32.mrf.mxu1 }
 0x8f7   : > { %v2517_v46 = vpop.f32.mrf.mxu0 }
 0x8fa   : > { %v2502_v47 = vpop.f32.mrf.mxu3 }
 0x8fb   : > { %v2528_v48 = vpop.f32.mrf.mxu2  ;;  %v2503_v61 = vadd.f32 %v2502_v47, %v2490_v58  ;;  %v7117_v47 = vld [vmem:[%s8954_s11] ss:$0 sm:$0xff] }
 0x8fd   : > { %v2516_v0 = vadd.f32 %v2515_v44, %v2503_v61 }
 0x8fe   : > { %v2541_v49 = vpop.f32.mrf.mxu1 }
 0x8ff   : > { %v2567_v50 = vpop.f32.mrf.mxu0  ;;  %v2529_v4 = vadd.f32 %v2528_v48, %v2516_v0 }
 0x901   : > { %v2542_v8 = vadd.f32 %v2541_v49, %v2529_v4  ;;  %v7118_v49 = vld [vmem:[%s8955_s12] ss:$0 sm:$0xff] }
 0x902   : > { %v2504_v51 = vpop.f32.mrf.mxu3 }
 0x903   : > { %v2530_v52 = vpop.f32.mrf.mxu2 }
 0x906   : > { %v2543_v53 = vpop.f32.mrf.mxu1 }
 0x907   : > { %v2569_v54 = vpop.f32.mrf.mxu0 }
 0x908   : > { %v7119_v54 = vld [vmem:[%s8945_s2 + $0x1] ss:$0 sm:$0xff] }
 0x90a   : > { %v2554_v56 = vpop.f32.mrf.mxu3 }
 0x90b   : > { %v2580_v57 = vpop.f32.mrf.mxu2  ;;  %v2555_v10 = vadd.f32 %v2554_v56, %v2542_v8 }
 0x90d   : > { %v2568_v11 = vadd.f32 %v2567_v50, %v2555_v10 }
 0x90e   : > { %v2593_v59 = vpop.f32.mrf.mxu1 }
 0x90f   : > { %v2619_v60 = vpop.f32.mrf.mxu0  ;;  %v2581_v2 = vadd.f32 %v2580_v57, %v2568_v11 }
 0x911   : > { %v2594_v15 = vadd.f32 %v2593_v59, %v2581_v2 }
 0x912   : > { %v2556_v62 = vpop.f32.mrf.mxu3 }
 0x913   : > { %v2582_v63 = vpop.f32.mrf.mxu2 }
 0x916   : > { %v2595_v1 = vpop.f32.mrf.mxu1 }
 0x917   : > { %v2621_v3 = vpop.f32.mrf.mxu0 }
 0x91a   : > { %v2606_v5 = vpop.f32.mrf.mxu3 }
 0x91b   : > { %v2632_v7 = vpop.f32.mrf.mxu2  ;;  %v2607_v17 = vadd.f32 %v2606_v5, %v2594_v15 }
 0x91d   : > { %v2620_v19 = vadd.f32 %v2619_v60, %v2607_v17 }
 0x91f   : > { %v2633_v21 = vadd.f32 %v2632_v7, %v2620_v19 }
 0x922   : > { %v2608_v12 = vpop.f32.mrf.mxu3 }
 0x923   : > { %v2634_v13 = vpop.f32.mrf.mxu2 }
 0x92e   : > { %v2645_v16 = vpop.f32.mrf.mxu1 }
 0x92f   : > { %v2671_v18 = vpop.f32.mrf.mxu0  ;;  %v2646_v23 = vadd.f32 %v2645_v16, %v2633_v21 }
 0x936   : > { %v2647_v14 = vpop.f32.mrf.mxu1 }
 0x937   : > { %v2673_v22 = vpop.f32.mrf.mxu0 }
 0x93a   : > { %v2658_v25 = vpop.f32.mrf.mxu3 }
 0x93b   : > { %v2659_v26 = vadd.f32 %v2658_v25, %v2646_v23  ;;  %v2684_v24 = vpop.f32.mrf.mxu2 }
 0x93d   : > { %v2672_v27 = vadd.f32 %v2671_v18, %v2659_v26  ;;  %v5765_v26 = vld [vmem:[%s8946_s3 + $0x10] sm:$0xf] }
 0x93f   : > { %v2685_v28 = vadd.f32 %v2684_v24, %v2672_v27  ;;  %v2851_v24 = vsel %vm619_vm6, %v5765_v26, 0 }
 0x941   : > { %v2688_v29 = vadd.f32 %v2685_v28, %v7598_v20  ;;  %v6899_v20 = vld [vmem:[%s8944_s1 + $0x10] sm:$0xff] }
 0x942   : > { %v2660_v30 = vpop.f32.mrf.mxu3  ;;  %2754 = vmatpush.bf16.msrb.mxu1 %v6899_v20 }
 0x943   : > { %v2686_v31 = vpop.f32.mrf.mxu2  ;;  %v2691_v32 = vsel %vm513_vm0, %v2688_v29, 0.0 }
 0x944   : > { %2692 = vadd.xlane.f32.xlu1 %v2691_v32 }
 0x9b7   : > { %v2693_v9 = vpop.xlane.xlu1 %2692 }
 0x9b8   : > { %v2694_v33 = vmul.f32 %v2693_v9, %v7471_v43 }
 0x9ba   : > { %v2695_v34 = vsub.f32 %v2688_v29, %v2694_v33 }
 0x9bc   : > { %v2696_v35 = vmul.f32 %v2695_v34, %v2695_v34 }
 0x9be   : > { %v2697_v36 = vsel %vm513_vm0, %v2696_v35, 0.0 }
 0x9bf   : > { %2698 = vadd.xlane.f32.xlu2 %v2697_v36 }
 0xa32   : > { %v2699_v37 = vpop.xlane.xlu2 %2698 }
 0xa33   : > { %v2700_v38 = vmul.f32 %v2699_v37, %v7471_v43 }
 0xa35   : > { %v2701_v39 = vadd.f32 1e-05, %v2700_v38 }
 0xa37   : > { %7148 = vrsqrt.f32 %v2701_v39  ;;  %vm2708_vm11 = vweird.f32 %v2701_v39 }
 0xa3d   : > { %v7149_v40 = vpop.eup %7148 }
 0xa3e   : > { %v2703_v41 = vmul.f32 %v7149_v40, %v2701_v39  ;;  %vm2709_vm10 = vweird.f32 %v7149_v40 }
 0xa3f   : > { %vm2710_vm12 = vmor %vm2708_vm11, %vm2709_vm10 }
 0xa40   : > { %v2704_v42 = vmul.f32 %v7149_v40, %v2703_v41 }
 0xa42   : > { %v2705_v44 = vmul.f32 0.5, %v2704_v42 }
 0xa44   : > { %v2706_v45 = vsub.f32 1.5, %v2705_v44 }
 0xa46   : > { %v2707_v46 = vmul.f32 %v7149_v40, %v2706_v45 }
 0xa48   : > { %v2711_v48 = vsel %vm2710_vm12, %v7149_v40, %v2707_v46 }
 0xa49   : > { %v2712_v50 = vmul.f32 %v2711_v48, %v2695_v34 }
 0xa4b   : > { %v2716_v51 = vmul.f32 %v7117_v47, %v2712_v50 }
 0xa4d   : > { %v8147_v52 = vadd.f32 %v7118_v49, %v2716_v51 }
 0xa4f   : > { %v2721_v53 = vpack.c.bf16 %v8147_v52, %v8147_v52 }
 0xa51   : > { %5760 = vmatmul.msk.bf16.vlgmr.msrb.gmra.mxu1 %vm513_vm0, %v2721_v53 }
 0xace   : > { %v2756_v55 = vpop.f32.mrf.mxu1 }
 0xacf   : > { %v8155_v56 = vadd.f32 %v7119_v54, %v2756_v55 }
 0xad1   : > { %2869 = vrot.lane.b32.xlu0 %v8155_v56, %s8984_s0  ;;  %2818 = vrot.lane.b32.xlu2 %v8155_v56, %s8985_s17  ;;  %s8994_s0 = smov 48   ;;  %s6734_s17 = sshll.u32 %s7349_s22, 3 }
 0xad2   : > { %2767 = vrot.lane.b32.xlu1 %v8155_v56, %s8986_s29 }
 0xad6   : > { %v2758_v57 = vpop.f32.mrf.mxu1 }
 0xad9   : > { %2867 = vrot.lane.b32.xlu0 %v8155_v56, %s8987_s20  ;;  %2970 = vrot.lane.b32.xlu2 %v8155_v56, %s8988_s18 }
 0xae1   : > { %3069 = vrot.lane.b32.xlu2 %v8155_v56, %s8989_s26 }
 0xb2b   : > { %v2819_v58 = vpop.permute.xlu2 %2818 }
 0xb2c   : > { %2839 = vmatpush.msrb.mxu0 %v2819_v58 }
 0xb33   : > { %v2971_v21 = vpop.permute.xlu2 %2970 }
 0xb3b   : > { %v3070_v25 = vpop.permute.xlu2 %3069 }
 0xb43   : > { %v2870_v59 = vpop.permute.xlu0 %2869 }
 0xb44   : > { %v2768_v60 = vpop.permute.xlu1 %2767  ;;  %5767 = vmatpush.xpose.msk.msra.mxu0 %vm538_vm1, %v2870_v59 }
 0xb45   : > { %5762 = vmatpush.xpose.msk.msrb.mxu3 %vm538_vm1, %v2768_v60 }
 0xb48   : > { %5763 = vmatmul.msk.f32.vlgmr.msrb.gmra.mxu3 %vm538_vm1, %v8155_v56 }
 0xb49   : > { %2860 = vmatpush.bf16.msra.mxu3 %v2851_v24 }
 0xb4b   : > { %v2868_v7 = vpop.permute.xlu0 %2867 }
 0xbcb   : > { %v2790_v61 = vpop.f32.mrf.mxu3 }
 0xbcc   : > { %v2793_v62 = vmul.f32 0.35355338, %v2790_v61 }
 0xbce   : > { %v2794_v63 = vsel %vm538_vm1, %v2793_v62, -inf }
 0xbcf   : > { %2795 = vmax.xlane.f32.xlu1 %v2794_v63 }
 0xbe8   : > { %2968 = vrot.lane.b32.xlu1 %v8155_v56, %s8990_s16  ;;  %s4996_s16 = scalar_lea.hbm %s8958_s15, %s6734_s17 }
 0xc42   : > { %v2796_v0 = vpop.xlane.xlu1 %2795 }
 0xc43   : > { %v2797_v1 = vsub.f32 %v2793_v62, %v2796_v0 }
 0xc45   : > { %v2798_v3 = vmul.f32 1.442695, %v2797_v1 }
 0xc47   : > { %7150 = vpow2.f32 %v2798_v3 }
 0xc4d   : > { %v7151_v4 = vpop.eup %7150 }
 0xc4e   : > { %v2800_v5 = vsel %vm538_vm1, %v7151_v4, 0.0 }
 0xc4f   : > { %2801 = vadd.xlane.f32.xlu0 %v2800_v5 }
 0xc5a   : > { %v2969_v23 = vpop.permute.xlu1 %2968 }
 0xc63   : > { %3071 = vrot.lane.b32.xlu0 %v8155_v56, %s8991_s25 }
 0xcc2   : > { %v2802_v8 = vpop.xlane.xlu0 %2801 }
 0xcc3   : > { %7152 = vrcp.f32 %v2802_v8  ;;  %v2814_v13 = vand.u32 2147483648, %v2802_v8  ;;  %v2812_v15 = vand.u32 2147483647, %v2802_v8  ;;  %vm2808_vm14 = vweird.f32 %v2802_v8 }
 0xcc5   : > { %v2815_v17 = vor.u32 1.1754944e-38, %v2814_v13  ;;  %vm2813_vm2 = vcmp.eq.f32.partialorder %v2812_v15, 8.507059e+37 }
 0xcc9   : > { %v7153_v10 = vpop.eup %7152 }
 0xcca   : > { %v2804_v11 = vmul.f32 %v7153_v10, %v2802_v8  ;;  %vm2809_vm13 = vweird.f32 %v7153_v10 }
 0xccb   : > { %vm2810_vm15 = vmor %vm2808_vm14, %vm2809_vm13 }
 0xccc   : > { %v2805_v12 = vsub.f32 1.0, %v2804_v11 }
 0xcce   : > { %v2806_v2 = vmul.f32 %v7153_v10, %v2805_v12 }
 0xcd0   : > { %v2807_v16 = vadd.f32 %v7153_v10, %v2806_v2 }
 0xcd2   : > { %v2811_v18 = vsel %vm2810_vm15, %v7153_v10, %v2807_v16 }
 0xcd3   : > { %v2816_v19 = vsel %vm2813_vm2, %v2815_v17, %v2811_v18 }
 0xcd4   : > { %v2817_v14 = vmul.f32 %v7151_v4, %v2816_v19 }
 0xcd5   : > { %v3072_v22 = vpop.permute.xlu0 %3071 }
 0xcd6   : > { %5764 = vmatmul.msk.f32.vlgmr.msrb.gmra.mxu0 %vm538_vm1, %v2817_v14 }
 0xcd7   : > { %5772 = vmatpush.xpose.msk.msrb.mxu0 %vm538_vm1, %v2971_v21 }
 0xcde   : > { %5768 = vmatmul.msk.f32.vlgmr.msra.gmra.mxu0 %vm538_vm1, %v2868_v7 }
 0xcdf   : > { %5777 = vmatpush.xpose.msk.msra.mxu0 %vm538_vm1, %v3072_v22 }
 0xce6   : > { %5773 = vmatmul.msk.f32.vlgmr.msrb.gmra.mxu0 %vm538_vm1, %v2969_v23 }
 0xcee   : > { %5778 = vmatmul.msk.f32.vlgmr.msra.gmra.mxu0 %vm538_vm1, %v3070_v25 }
 0xd53   : > { %v2841_v27 = vpop.f32.mrf.mxu0 }
 0xd54   : > { %v2844_v28 = vpack.c.bf16 %v2841_v27, %v2841_v27 }
 0xd56   : > { %5766 = vmatmul.msk.bf16.vlgmr.msra.gmra.mxu3 %vm538_vm1, %v2844_v28 }
 0xd5b   : > { %v2892_v29 = vpop.f32.mrf.mxu0 }
 0xd5c   : > { %v2895_v30 = vmul.f32 0.35355338, %v2892_v29 }
 0xd5e   : > { %v2896_v31 = vsel %vm538_vm1, %v2895_v30, -inf }
 0xd5f   : > { %2897 = vmax.xlane.f32.xlu0 %v2896_v31 }
 0xd63   : > { %v2993_v32 = vpop.f32.mrf.mxu0 }
 0xd64   : > { %v2996_v9 = vmul.f32 0.35355338, %v2993_v32  ;;  %v5770_v32 = vld [vmem:[%s8946_s3 + $0x14] sm:$0xf] }
 0xd66   : > { %v2997_v33 = vsel %vm538_vm1, %v2996_v9, -inf }
 0xd67   : > { %2998 = vmax.xlane.f32.xlu2 %v2997_v33  ;;  %v5775_v33 = vld [vmem:[%s8946_s3 + $0x18] sm:$0xf] }
 0xd6b   : > { %v3094_v34 = vpop.f32.mrf.mxu0 }
 0xd6c   : > { %v3097_v35 = vmul.f32 0.35355338, %v3094_v34  ;;  %v3053_v34 = vsel %vm619_vm6, %v5775_v33, 0  ;;  %v6920_v33 = vld [vmem:[%s8948_s5 + $0x19c] sm:$0xf] }
 0xd6d   : > { %3062 = vmatpush.bf16.msrb.mxu3 %v3053_v34  ;;  %v5910_v34 = vld [vmem:[%s8948_s5 + $0x1d8] sm:$0xf0] }
 0xd6e   : > { %v3098_v36 = vsel %vm538_vm1, %v3097_v35, -inf }
 0xd6f   : > { %3099 = vmax.xlane.f32.xlu1 %v3098_v36 }
 0xd88   : > { %3122 = vrot.lane.b32.xlu1 %v8155_v56, %s8992_s24  ;;  %s5000_s24 = sshll.u32 %s4996_s16, 4  ;;  %s5001_s24 = int_to_ptr.hbm [resolvable:$true] %s5000_s24 }
 0xd89   : > { %s7186_s20 = sshra.s32 %s5001_s24, 4  ;;  %s7187_s20 = int_to_ptr.hbm [resolvable:$true] %s7186_s20 }
 0xd8a   : > { %s7188_s17 = scalar_lea.hbm %s7187_s20, 8  ;;  %p7193_p0 = scmp.lt.s32.totalorder %s7187_s20, %s8958_s15 }
 0xd8b   : > { %p7189_p11 = scmp.ne.s32.totalorder %s7187_s20, %s7188_s17 }
 0xd8d   : > { %p7190_p12 = pnand %p7189_p11, %p7366_p5 }
 0xd8f   : > { %p7191_p13 = pneg %p7190_p12 }
 0xdd2   : > { %v2898_v6 = vpop.xlane.xlu0 %2897 }
 0xdd3   : > { %v2899_v20 = vsub.f32 %v2895_v30, %v2898_v6 }
 0xdd5   : > { %v2900_v37 = vmul.f32 1.442695, %v2899_v20 }
 0xdd7   : > { %7154 = vpow2.f32 %v2900_v37 }
 0xdd9   : > { %v8195_v38 = vpop.f32.mrf.mxu3 }
 0xdda   : > { %v2999_v39 = vpop.xlane.xlu2 %2998 }
 0xddb   : > { %v3000_v40 = vsub.f32 %v2996_v9, %v2999_v39  ;;  %v2952_v9 = vsel %vm619_vm6, %v5770_v32, 0 }
 0xddc   : > { %2961 = vmatpush.bf16.msra.mxu1 %v2952_v9 }
 0xddd   : > { %v7155_v41 = vpop.eup %7154  ;;  %v3001_v42 = vmul.f32 1.442695, %v3000_v40 }
 0xdde   : > { %v2902_v44 = vsel %vm538_vm1, %v7155_v41, 0.0 }
 0xddf   : > { %7156 = vpow2.f32 %v3001_v42  ;;  %2903 = vadd.xlane.f32.xlu0 %v2902_v44 }
 0xde1   : > { %v2864_v45 = vpop.f32.mrf.mxu3 }
 0xde2   : > { %v3100_v46 = vpop.xlane.xlu1 %3099  ;;  %v7120_v45 = vld [vmem:[%s8947_s4 + $0x1] ss:$0 sm:$0xff] }
 0xde3   : > { %v3101_v47 = vsub.f32 %v3097_v35, %v3100_v46  ;;  %v5780_v35 = vld [vmem:[%s8946_s3 + $0x1c] sm:$0xf]  ;;  %v2866_v46 = vadd.f32 %v7120_v45, %v8195_v38 }
 0xde4   : > { %v3154_v36 = vsel %vm619_vm6, %v5780_v35, 0  ;;  %v5836_v35 = vld [vmem:[%s8948_s5 + $0x110] sm:$0xf] }
 0xde5   : > { %v7157_v48 = vpop.eup %7156  ;;  %v3102_v49 = vmul.f32 1.442695, %v3101_v47  ;;  %3163 = vmatpush.bf16.msrb.mxu1 %v3154_v36 }
 0xde6   : > { %v3003_v50 = vsel %vm538_vm1, %v7157_v48, 0.0 }
 0xde7   : > { %7158 = vpow2.f32 %v3102_v49  ;;  %3004 = vadd.xlane.f32.xlu2 %v3003_v50 }
 0xded   : > { %v8199_v51 = vpop.eup %7158 }
 0xdee   : > { %v3104_v53 = vsel %vm538_vm1, %v8199_v51, 0.0 }
 0xdef   : > { %3105 = vadd.xlane.f32.xlu0 %v3104_v53 }
 0xdfa   : > { %v3123_v27 = vpop.permute.xlu1 %3122 }
 0xdff   : > { %2920 = vrot.lane.b32.xlu2 %v8155_v56, %s8993_s27  ;;  %s483_s27 = sand.u32 1, %s7226_s19  }
 0xe00   : > { %s4986_s29 = scalar_lea.sflag [#allocation3], %s483_s27 }
 0xe03   : > { %3021 = vrot.lane.b32.xlu0 %v8155_v56, %s8994_s0  ;;  %s5064_s0 = sshll.u32 %s483_s27, 3 }
 0xe04   : > { %s485_s23 = scalar_lea.vmem [#allocation2], %s5064_s0  ;;  %s7192_s0 = scalar_lea.hbm %s8958_s15, 16 }
 0xe05   : > { %s4998_s22 = sshll.u32 %s485_s23, 4  ;;  %p7194_p1 = scmp.lt.s32.totalorder %s7192_s0, %s7188_s17  ;;  %s4999_s22 = int_to_ptr.vmem [resolvable:$true] %s4998_s22 }
 0xe07   : > { %p7195_p2 = por %p7194_p1, %p7193_p0 }
 0xe09   : > { %p7196_p3 = pnand %p7195_p2, %p7191_p13 }
 0xe52   : > { %v2904_v54 = vpop.xlane.xlu0 %2903 }
 0xe53   : > { %7160 = vrcp.f32 %v2904_v54  ;;  %v2916_v60 = vand.u32 2147483648, %v2904_v54  ;;  %v2914_v62 = vand.u32 2147483647, %v2904_v54  ;;  %vm2910_vm4 = vweird.f32 %v2904_v54 }
 0xe55   : > { %v2917_v1 = vor.u32 1.1754944e-38, %v2916_v60  ;;  %vm2915_vm7 = vcmp.eq.f32.partialorder %v2914_v62, 8.507059e+37  ;;  %v6925_v62 = vld [vmem:[%s8948_s5 + $0x1bc] sm:$0xf0] }
 0xe59   : > { %v7161_v55 = vpop.eup %7160 }
 0xe5a   : > { %v2906_v57 = vmul.f32 %v7161_v55, %v2904_v54  ;;  %v3005_v58 = vpop.xlane.xlu2 %3004  ;;  %vm2911_vm3 = vweird.f32 %v7161_v55 }
 0xe5b   : > { %7162 = vrcp.f32 %v3005_v58  ;;  %vm2912_vm5 = vmor %vm2910_vm4, %vm2911_vm3  ;;  %v3017_v15 = vand.u32 2147483648, %v3005_v58  ;;  %vm3011_vm9 = vweird.f32 %v3005_v58  ;;  %v3015_v17 = vand.u32 2147483647, %v3005_v58 }
 0xe5c   : > { %v2907_v59 = vsub.f32 1.0, %v2906_v57 }
 0xe5d   : > { %v3018_v14 = vor.u32 1.1754944e-38, %v3017_v15  ;;  %vm3016_vm11 = vcmp.eq.f32.partialorder %v3015_v17, 8.507059e+37  ;;  %v5822_v15 = vld [vmem:[%s8948_s5 + $0x140] sm:$0xf0]  ;;  %v6910_v17 = vld [vmem:[%s8948_s5 + $0x144] sm:$0xf0] }
 0xe5e   : > { %v2908_v61 = vmul.f32 %v7161_v55, %v2907_v59 }
 0xe60   : > { %v2909_v63 = vadd.f32 %v7161_v55, %v2908_v61 }
 0xe61   : > { %v7163_v0 = vpop.eup %7162 }
 0xe62   : > { %v2913_v3 = vsel %vm2912_vm5, %v7161_v55, %v2909_v63  ;;  %v3007_v4 = vmul.f32 %v7163_v0, %v3005_v58  ;;  %v3106_v56 = vpop.xlane.xlu0 %3105  ;;  %v2921_v5 = vpop.permute.xlu2 %2920  ;;  %vm3012_vm8 = vweird.f32 %v7163_v0  ;;  %v6917_v63 = vld [vmem:[%s8948_s5 + $0x184] sm:$0xf] }
 0xe63   : > { %v2918_v7 = vsel %vm2915_vm7, %v2917_v1, %v2913_v3  ;;  %7164 = vrcp.f32 %v3106_v56  ;;  %2941 = vmatpush.msra.mxu2 %v2921_v5  ;;  %vm3013_vm10 = vmor %vm3011_vm9, %vm3012_vm8  ;;  %v3118_v23 = vand.u32 2147483648, %v3106_v56  ;;  %vm3112_vm13 = vweird.f32 %v3106_v56  ;;  %v5886_v1 = vld [vmem:[%s8948_s5 + $0x1c0] sm:$0xf0]  ;;  %v5892_v3 = vld [vmem:[%s8948_s5 + $0x188] sm:$0xf] }
 0xe64   : > { %v3008_v8 = vsub.f32 1.0, %v3007_v4  ;;  %v2919_v10 = vmul.f32 %v7155_v41, %v2918_v7  ;;  %v3116_v25 = vand.u32 2147483647, %v3106_v56  ;;  %v6926_v4 = vld [vmem:[%s8948_s5 + $0x1c4] sm:$0xf0] }
 0xe65   : > { %v3119_v29 = vor.u32 1.1754944e-38, %v3118_v23  ;;  %v5893_v5 = vor.u32 %v6926_v4, %v5892_v3  ;;  %v6918_v7 = vld [vmem:[%s8948_s5 + $0x18c] sm:$0xf]  ;;  %v6930_v3 = vld [vmem:[%s8948_s5 + $0x1e4] sm:$0xf0] }
 0xe66   : > { %5769 = vmatmul.msk.f32.vlgmr.msra.gmra.mxu2 %vm538_vm1, %v2919_v10  ;;  %v3009_v11 = vmul.f32 %v7163_v0, %v3008_v8  ;;  %vm3117_vm15 = vcmp.eq.f32.partialorder %v3116_v25, 8.507059e+37  ;;  %v5894_v8 = vld [vmem:[%s8948_s5 + $0x1c8] sm:$0xf0]  ;;  %v5900_v25 = vld [vmem:[%s8948_s5 + $0x190] sm:$0xf] }
 0xe67   : > { %v5897_v10 = vor.u32 %v6918_v7, %v5894_v8  ;;  %3471 = vmatpush.bf16.msra.mxu3 %v5893_v5  ;;  %v6922_v4 = vld [vmem:[%s8948_s5 + $0x1ac] sm:$0xf] }
 0xe68   : > { %v3010_v2 = vadd.f32 %v7163_v0, %v3009_v11  ;;  %v5820_v11 = vld [vmem:[%s8948_s5 + $0x100] sm:$0xf] }
 0xe69   : > { %v7165_v12 = vpop.eup %7164 }
 0xe6a   : > { %v3108_v13 = vmul.f32 %v7165_v12, %v3106_v56  ;;  %v3014_v18 = vsel %vm3013_vm10, %v7163_v0, %v3010_v2  ;;  %vm3113_vm12 = vweird.f32 %v7165_v12  ;;  %v5889_v56 = vor.u32 %v6917_v63, %v5886_v1  ;;  %v6921_v63 = vld [vmem:[%s8948_s5 + $0x1a4] sm:$0xf] }
 0xe6b   : > { %v3019_v21 = vsel %vm3016_vm11, %v3018_v14, %v3014_v18  ;;  %vm3114_vm14 = vmor %vm3112_vm13, %vm3113_vm12  ;;  %v6902_v14 = vld [vmem:[%s8948_s5 + $0x10c] sm:$0xf] }
 0xe6c   : > { %v3109_v16 = vsub.f32 1.0, %v3108_v13  ;;  %v3020_v24 = vmul.f32 %v7157_v48, %v3019_v21  ;;  %v6901_v13 = vld [vmem:[%s8948_s5 + $0x104] sm:$0xf]  ;;  %v5830_v21 = vld [vmem:[%s8948_s5 + $0x148] sm:$0xf0] }
 0xe6d   : > { %v5825_v18 = vor.u32 %v6901_v13, %v5822_v15  ;;  %v5854_v15 = vld [vmem:[%s8948_s5 + $0x160] sm:$0xf0] }
 0xe6e   : > { %v3110_v19 = vmul.f32 %v7165_v12, %v3109_v16  ;;  %v5828_v16 = vld [vmem:[%s8948_s5 + $0x108] sm:$0xf] }
 0xe70   : > { %v3111_v22 = vadd.f32 %v7165_v12, %v3110_v19  ;;  %v5829_v19 = vor.u32 %v6910_v17, %v5828_v16  ;;  %v5860_v16 = vld [vmem:[%s8948_s5 + $0x128] sm:$0xf] }
 0xe71   : > { %v6914_v17 = vld [vmem:[%s8948_s5 + $0x164] sm:$0xf0] }
 0xe72   : > { %v3115_v28 = vsel %vm3114_vm14, %v7165_v12, %v3111_v22  ;;  %v6909_v12 = vld [vmem:[%s8948_s5 + $0x13c] sm:$0xf0]  ;;  %v5833_v22 = vor.u32 %v6902_v14, %v5830_v21  ;;  %3472 = vmatpush.bf16.msra.mxu3 %v5829_v19  ;;  %v5862_v19 = vld [vmem:[%s8948_s5 + $0x168] sm:$0xf0] }
 0xe73   : > { %v3120_v30 = vsel %vm3117_vm15, %v3119_v29, %v3115_v28  ;;  %v5821_v2 = vor.u32 %v6909_v12, %v5820_v11  ;;  %v5902_v29 = vld [vmem:[%s8948_s5 + $0x1d0] sm:$0xf0]  ;;  %v6913_v11 = vld [vmem:[%s8948_s5 + $0x15c] sm:$0xf0] }
 0xe74   : > { %v3121_v31 = vmul.f32 %v8199_v51, %v3120_v30  ;;  %v5908_v30 = vld [vmem:[%s8948_s5 + $0x198] sm:$0xf] }
 0xe75   : > { %v3022_v26 = vpop.permute.xlu0 %3021 }
 0xe76   : > { %3042 = vmatpush.msrb.mxu2 %v3022_v26  ;;  %v6927_v26 = vld [vmem:[%s8948_s5 + $0x1cc] sm:$0xf0] }
 0xe77   : > { %5774 = vmatmul.msk.f32.vlgmr.msrb.gmra.mxu2 %vm538_vm1, %v3020_v24  ;;  %v6919_v24 = vld [vmem:[%s8948_s5 + $0x194] sm:$0xf]  ;;  %v5901_v28 = vor.u32 %v6927_v26, %v5900_v25  ;;  %v5932_v25 = vld [vmem:[%s8948_s5 + $0x1b0] sm:$0xf] }
 0xe78   : > { %3143 = vmatpush.msra.mxu2 %v3123_v27  ;;  %v5905_v32 = vor.u32 %v6919_v24, %v5902_v29  ;;  %v6931_v26 = vld [vmem:[%s8948_s5 + $0x1ec] sm:$0xf0]  ;;  %v6923_v24 = vld [vmem:[%s8948_s5 + $0x1b4] sm:$0xf]  ;;  %v6932_v29 = vld [vmem:[%s8948_s5 + $0x1f4] sm:$0xf0] }
 0xe7a   : > { %3458 = vmatpush.bf16.msrb.mxu2 %v5889_v56  ;;  %v5926_v56 = vld [vmem:[%s8948_s5 + $0x1e8] sm:$0xf0] }
 0xe7b   : > { %v5929_v13 = vor.u32 %v6922_v4, %v5926_v56  ;;  %v6952_v4 = vld [vmem:[%s8950_s7 + $0x498] sm:$0xff]  ;;  %v6935_v56 = vld [vmem:[%s8950_s7 + $0x410] sm:$0xff] }
 0xe7e   : > { %3459 = vmatpush.bf16.msrb.mxu2 %v5825_v18  ;;  %v6906_v18 = vld [vmem:[%s8948_s5 + $0x12c] sm:$0xf] }
 0xe7f   : > { %5779 = vmatmul.msk.f32.vlgmr.msra.gmra.mxu2 %vm538_vm1, %v3121_v31  ;;  %v6928_v31 = vld [vmem:[%s8948_s5 + $0x1d4] sm:$0xf0] }
 0xe80   : > { %v5909_v9 = vor.u32 %v6928_v31, %v5908_v30  ;;  %v6924_v30 = vld [vmem:[%s8948_s5 + $0x1bc] sm:$0xf] }
 0xe81   : > { %v5942_v31 = vld [vmem:[%s8948_s5 + $0x1f8] sm:$0xf0] }
 0xe82   : > { %3510 = vmatpush.bf16.msra.mxu2 %v5905_v32  ;;  %v5933_v32 = vor.u32 %v6931_v26, %v5932_v25  ;;  %v6979_v25 = vld [vmem:[%s8950_s7 + $0x570] sm:$0xff] }
 0xe83   : > { %v6987_v26 = vld [vmem:[%s8950_s7 + $0x5b0] sm:$0xff] }
 0xee9   : > { %v2943_v6 = vpop.f32.mrf.mxu2 }
 0xeea   : > { %v2946_v20 = vpack.c.bf16 %v2943_v6, %v2943_v6  ;;  %v5913_v6 = vor.u32 %v6920_v33, %v5910_v34  ;;  %v5868_v33 = vld [vmem:[%s8948_s5 + $0x130] sm:$0xf] }
 0xeeb   : > { %v6915_v34 = vld [vmem:[%s8948_s5 + $0x16c] sm:$0xf0] }
 0xeec   : > { %5771 = vmatmul.msk.bf16.vlgmr.msra.gmra.mxu1 %vm538_vm1, %v2946_v20  ;;  %v6911_v20 = vld [vmem:[%s8948_s5 + $0x14c] sm:$0xf0] }
 0xeed   : > { %3484 = vmatpush.bf16.msra.mxu1 %v5897_v10  ;;  %v5852_v10 = vld [vmem:[%s8948_s5 + $0x120] sm:$0xf] }
 0xeee   : > { %v5853_v14 = vor.u32 %v6913_v11, %v5852_v10  ;;  %v6934_v10 = vld [vmem:[%s8950_s7 + $0x408] sm:$0xff] }
 0xeef   : > { %v6958_v11 = vld [vmem:[%s8950_s7 + $0x4c8] sm:$0xff] }
 0xef1   : > { %3485 = vmatpush.bf16.msra.mxu1 %v5833_v22  ;;  %v5861_v22 = vor.u32 %v6914_v17, %v5860_v16  ;;  %v6972_v16 = vld [vmem:[%s8950_s7 + $0x538] sm:$0xff] }
 0xef2   : > { %v6996_v17 = vld [vmem:[%s8950_s7 + $0x5f8] sm:$0xff] }
 0xefa   : > { %v3044_v37 = vpop.f32.mrf.mxu2 }
 0xefb   : > { %v3047_v39 = vpack.c.bf16 %v3044_v37, %v3044_v37  ;;  %v6903_v37 = vld [vmem:[%s8948_s5 + $0x114] sm:$0xf] }
 0xefd   : > { %5776 = vmatmul.msk.bf16.vlgmr.msrb.gmra.mxu3 %vm538_vm1, %v3047_v39  ;;  %v5837_v39 = vor.u32 %v6911_v20, %v5836_v35  ;;  %v5870_v20 = vld [vmem:[%s8948_s5 + $0x170] sm:$0xf0] }
 0xefe   : > { %3523 = vmatpush.bf16.msrb.mxu3 %v5909_v9 }
 0xf02   : > { %v3145_v40 = vpop.f32.mrf.mxu2 }
 0xf03   : > { %v3148_v41 = vpack.c.bf16 %v3145_v40, %v3145_v40  ;;  %v5838_v40 = vld [vmem:[%s8948_s5 + $0x150] sm:$0xf0] }
 0xf05   : > { %5781 = vmatmul.msk.bf16.vlgmr.msrb.gmra.mxu1 %vm538_vm1, %v3148_v41  ;;  %v5844_v41 = vld [vmem:[%s8948_s5 + $0x118] sm:$0xf] }
 0xf06   : > { %3536 = vmatpush.bf16.msrb.mxu1 %v5913_v6  ;;  %v6907_v6 = vld [vmem:[%s8948_s5 + $0x134] sm:$0xf] }
 0xf69   : > { %v2963_v42 = vpop.f32.mrf.mxu1 }
 0xf6a   : > { %v2967_v47 = vadd.f32 %v2963_v42, %v2866_v46  ;;  %v6912_v42 = vld [vmem:[%s8948_s5 + $0x154] sm:$0xf0]  ;;  %v6904_v46 = vld [vmem:[%s8948_s5 + $0x11c] sm:$0xf] }
 0xf6b   : > { %v5845_v45 = vor.u32 %v6912_v42, %v5844_v41  ;;  %v5878_v41 = vld [vmem:[%s8948_s5 + $0x178] sm:$0xf0]  ;;  %v5869_v42 = vor.u32 %v6915_v34, %v5868_v33 }
 0xf6c   : > { %v6968_v33 = vld [vmem:[%s8950_s7 + $0x518] sm:$0xff] }
 0xf6d   : > { %3524 = vmatpush.bf16.msrb.mxu3 %v5845_v45  ;;  %v6992_v34 = vld [vmem:[%s8950_s7 + $0x5d8] sm:$0xff] }
 0xf71   : > { %v2965_v44 = vpop.f32.mrf.mxu1 }
 0xf72   : > { %v5841_v44 = vor.u32 %v6903_v37, %v5838_v40  ;;  %v5876_v37 = vld [vmem:[%s8948_s5 + $0x138] sm:$0xf]  ;;  %v6908_v40 = vld [vmem:[%s8948_s5 + $0x13c] sm:$0xf] }
 0xf74   : > { %3511 = vmatpush.bf16.msra.mxu2 %v5841_v44  ;;  %v5873_v44 = vor.u32 %v6907_v6, %v5870_v20  ;;  %v6976_v6 = vld [vmem:[%s8950_s7 + $0x558] sm:$0xff] }
 0xf75   : > { %v6984_v20 = vld [vmem:[%s8950_s7 + $0x598] sm:$0xff] }
 0xf80   : > { %v3064_v48 = vpop.f32.mrf.mxu3 }
 0xf81   : > { %v3068_v49 = vadd.f32 %v3064_v48, %v2967_v47  ;;  %v5846_v47 = vld [vmem:[%s8948_s5 + $0x158] sm:$0xf0] }
 0xf82   : > { %v3165_v50 = vpop.f32.mrf.mxu1  ;;  %v5849_v48 = vor.u32 %v6904_v46, %v5846_v47  ;;  %v5881_v46 = vor.u32 %v6908_v40, %v5878_v41  ;;  %v6940_v47 = vld [vmem:[%s8950_s7 + $0x438] sm:$0xff]  ;;  %v6975_v40 = vld [vmem:[%s8950_s7 + $0x550] sm:$0xff] }
 0xf83   : > { %v3169_v51 = vadd.f32 %v3165_v50, %v3068_v49  ;;  %v6983_v41 = vld [vmem:[%s8950_s7 + $0x590] sm:$0xff] }
 0xf84   : > { %3537 = vmatpush.bf16.msrb.mxu1 %v5849_v48  ;;  %v6964_v48 = vld [vmem:[%s8950_s7 + $0x4f8] sm:$0xff] }
 0xf85   : > { %v3170_v53 = vadd.f32 %v3169_v51, %v8147_v52  ;;  %v5884_v52 = vld [vmem:[%s8948_s5 + $0x180] sm:$0xf] }
 0xf86   : > { %v5885_v0 = vor.u32 %v6925_v62, %v5884_v52  ;;  %v5916_v52 = vld [vmem:[%s8948_s5 + $0x1a0] sm:$0xf] }
 0xf87   : > { %v3175_v54 = vsel %vm513_vm0, %v3170_v53, 0.0  ;;  %v6929_v62 = vld [vmem:[%s8948_s5 + $0x1dc] sm:$0xf0] }
 0xf88   : > { %v3066_v55 = vpop.f32.mrf.mxu3  ;;  %3176 = vadd.xlane.f32.xlu2 %v3175_v54  ;;  %3445 = vmatpush.bf16.msrb.mxu0 %v5885_v0  ;;  %v5918_v0 = vld [vmem:[%s8948_s5 + $0x1e0] sm:$0xf0]  ;;  %v5917_v7 = vor.u32 %v6929_v62, %v5916_v52 }
 0xf89   : > { %v5921_v8 = vor.u32 %v6921_v63, %v5918_v0  ;;  %v6961_v52 = vld [vmem:[%s8950_s7 + $0x4e0] sm:$0xff]  ;;  %v6936_v0 = vld [vmem:[%s8950_s7 + $0x418] sm:$0xff] }
 0xf8a   : > { %v3167_v57 = vpop.f32.mrf.mxu1  ;;  %v6945_v62 = vld [vmem:[%s8950_s7 + $0x460] sm:$0xff] }
 0xf8b   : > { %v7121_v57 = vld [vmem:[%s8952_s9 + $0x1] ss:$0 sm:$0xff] }
 0xf8c   : > { %3446 = vmatpush.bf16.msrb.mxu0 %v5821_v2  ;;  %v6905_v2 = vld [vmem:[%s8948_s5 + $0x124] sm:$0xf] }
 0xf8d   : > { %v5857_v21 = vor.u32 %v6905_v2, %v5854_v15  ;;  %v6953_v63 = vld [vmem:[%s8950_s7 + $0x4a0] sm:$0xff] }
 0xf8e   : > { %v6933_v2 = vld [vmem:[%s8950_s7 + $0x400] sm:$0xff] }
 0xf8f   : > { %v6957_v15 = vld [vmem:[%s8950_s7 + $0x4c0] sm:$0xff] }
 0xf90   : > { %3497 = vmatpush.bf16.msra.mxu0 %v5901_v28  ;;  %v5940_v28 = vld [vmem:[%s8948_s5 + $0x1b8] sm:$0xf] }
 0xf91   : > { %v5941_v35 = vor.u32 %v6932_v29, %v5940_v28  ;;  %v6978_v28 = vld [vmem:[%s8950_s7 + $0x568] sm:$0xff] }
 0xf92   : > { %v6986_v29 = vld [vmem:[%s8950_s7 + $0x5a8] sm:$0xff] }
 0xf94   : > { %3498 = vmatpush.bf16.msra.mxu0 %v5837_v39  ;;  %v6916_v39 = vld [vmem:[%s8948_s5 + $0x174] sm:$0xf0] }
 0xf95   : > { %v5877_v45 = vor.u32 %v6916_v39, %v5876_v37  ;;  %v6966_v37 = vld [vmem:[%s8950_s7 + $0x508] sm:$0xff] }
 0xf96   : > { %v6990_v39 = vld [vmem:[%s8950_s7 + $0x5c8] sm:$0xff] }
 0xffb   : > { %v3177_v58 = vpop.xlane.xlu2 %3176 }
 0xffc   : > { %v3178_v59 = vmul.f32 %v3177_v58, %v7471_v43 }
 0xffe   : > { %v8233_v60 = vsub.f32 %v3170_v53, %v3178_v59  ;;  %v7122_v59 = vld [vmem:[%s8953_s10 + $0x1] ss:$0 sm:$0xff] }
0x1000   : > { %v3180_v38 = vmul.f32 %v8233_v60, %v8233_v60 }
0x1002   : > { %v3181_v61 = vsel %vm513_vm0, %v3180_v38, 0.0 }
0x1003   : > { %3182 = vadd.xlane.f32.xlu0 %v3181_v61 }
0x1076   : > { %v3183_v23 = vpop.xlane.xlu0 %3182 }
0x1077   : > { %v3184_v27 = vmul.f32 %v3183_v23, %v7471_v43  ;;  %v5865_v23 = vor.u32 %v6906_v18, %v5862_v19  ;;  %v6941_v18 = vld [vmem:[%s8950_s7 + $0x440] sm:$0xff] }
0x1078   : > { %v6949_v19 = vld [vmem:[%s8950_s7 + $0x480] sm:$0xff] }
0x1079   : > { %v3185_v36 = vadd.f32 1e-05, %v3184_v27  ;;  %v5934_v27 = vld [vmem:[%s8948_s5 + $0x1f0] sm:$0xf0] }
0x107a   : > { %v5937_v9 = vor.u32 %v6923_v24, %v5934_v27  ;;  %v6970_v24 = vld [vmem:[%s8950_s7 + $0x528] sm:$0xff] }
0x107b   : > { %7166 = vrsqrt.f32 %v3185_v36  ;;  %vm3192_vm6 = vweird.f32 %v3185_v36  ;;  %v6994_v27 = vld [vmem:[%s8950_s7 + $0x5e8] sm:$0xff] }
0x1081   : > { %v7167_v49 = vpop.eup %7166 }
0x1082   : > { %v3187_v50 = vmul.f32 %v7167_v49, %v3185_v36  ;;  %vm3193_vm1 = vweird.f32 %v7167_v49  ;;  %v5945_v36 = vor.u32 %v6924_v30, %v5942_v31  ;;  %v6969_v30 = vld [vmem:[%s8950_s7 + $0x520] sm:$0xff] }
0x1083   : > { %vm3194_vm2 = vmor %vm3192_vm6, %vm3193_vm1  ;;  %v6993_v31 = vld [vmem:[%s8950_s7 + $0x5e0] sm:$0xff] }
0x1084   : > { %v3188_v51 = vmul.f32 %v7167_v49, %v3187_v50  ;;  %v6956_v50 = vld [vmem:[%s8950_s7 + $0x4b8] sm:$0xff] }
0x1086   : > { %v3189_v53 = vmul.f32 0.5, %v3188_v51  ;;  %v6939_v51 = vld [vmem:[%s8950_s7 + $0x430] sm:$0xff] }
0x1088   : > { %v3190_v54 = vsub.f32 1.5, %v3189_v53  ;;  %v6963_v53 = vld [vmem:[%s8950_s7 + $0x4f0] sm:$0xff] }
0x108a   : > { %v3191_v55 = vmul.f32 %v7167_v49, %v3190_v54  ;;  %v6947_v54 = vld [vmem:[%s8950_s7 + $0x470] sm:$0xff] }
0x108c   : > { %v3195_v58 = vsel %vm3194_vm2, %v7167_v49, %v3191_v55  ;;  %v6948_v49 = vld [vmem:[%s8950_s7 + $0x478] sm:$0xff]  ;;  %v6955_v55 = vld [vmem:[%s8950_s7 + $0x4b0] sm:$0xff] }
0x108d   : > { %v3196_v38 = vmul.f32 %v3195_v58, %v8233_v60  ;;  %v5924_v60 = vld [vmem:[%s8948_s5 + $0x1a8] sm:$0xf] }
0x108e   : > { %v5925_v12 = vor.u32 %v6930_v3, %v5924_v60  ;;  %v6962_v58 = vld [vmem:[%s8950_s7 + $0x4e8] sm:$0xff]  ;;  %v6960_v60 = vld [vmem:[%s8950_s7 + $0x4d8] sm:$0xff] }
0x108f   : > { %v3200_v61 = vmul.f32 %v7121_v57, %v3196_v38  ;;  %v6938_v57 = vld [vmem:[%s8950_s7 + $0x428] sm:$0xff]  ;;  %v6944_v3 = vld [vmem:[%s8950_s7 + $0x458] sm:$0xff] }
0x1090   : > { %v6954_v38 = vld [vmem:[%s8950_s7 + $0x4a8] sm:$0xff] }
0x1091   : > { %v8357_v1 = vadd.f32 %v7122_v59, %v3200_v61  ;;  %v6946_v59 = vld [vmem:[%s8950_s7 + $0x468] sm:$0xff]  ;;  %v6937_v61 = vld [vmem:[%s8950_s7 + $0x420] sm:$0xff] }
0x1093   : > { %v8370_v5 = vpack.c.bf16 %v8357_v1, %v8357_v1 }
0x1095   : > { %5946 = vmatmul.msk.bf16.vlgmr.msrb.gmra.mxu0 %vm513_vm0, %v8370_v5  ;;  %5947 = vmatmul.msk.bf16.vlgmr.msrb.gmra.mxu2 %vm513_vm0, %v8370_v5 }
0x1096   : > { %5948 = vmatmul.msk.bf16.vlgmr.msra.gmra.mxu3 %vm513_vm0, %v8370_v5  ;;  %5949 = vmatmul.msk.bf16.vlgmr.msra.gmra.mxu1 %vm513_vm0, %v8370_v5 }
0x1097   : > { %3549 = vmatpush.bf16.msrb.mxu0 %v5917_v7  ;;  %3562 = vmatpush.bf16.msrb.mxu2 %v5921_v8  ;;  %v6959_v7 = vld [vmem:[%s8950_s7 + $0x4d0] sm:$0xff] }
0x1098   : > { %3575 = vmatpush.bf16.msra.mxu3 %v5925_v12  ;;  %3588 = vmatpush.bf16.msra.mxu1 %v5929_v13  ;;  %v6943_v8 = vld [vmem:[%s8950_s7 + $0x450] sm:$0xff]  ;;  %v6942_v12 = vld [vmem:[%s8950_s7 + $0x448] sm:$0xff] }
0x1099   : > { %v6950_v13 = vld [vmem:[%s8950_s7 + $0x488] sm:$0xff] }
0x109b   : > { %3550 = vmatpush.bf16.msrb.mxu0 %v5853_v14  ;;  %3563 = vmatpush.bf16.msrb.mxu2 %v5857_v21  ;;  %v6980_v14 = vld [vmem:[%s8950_s7 + $0x578] sm:$0xff] }
0x109c   : > { %3576 = vmatpush.bf16.msra.mxu3 %v5861_v22  ;;  %3589 = vmatpush.bf16.msra.mxu1 %v5865_v23  ;;  %v6988_v21 = vld [vmem:[%s8950_s7 + $0x5b8] sm:$0xff]  ;;  %v6971_v22 = vld [vmem:[%s8950_s7 + $0x530] sm:$0xff] }
0x109d   : > { %v6995_v23 = vld [vmem:[%s8950_s7 + $0x5f0] sm:$0xff] }
0x10a5   : > { %5950 = vmatmul.msk.bf16.vlgmr.msra.gmra.mxu0 %vm513_vm0, %v8370_v5  ;;  %5951 = vmatmul.msk.bf16.vlgmr.msra.gmra.mxu2 %vm513_vm0, %v8370_v5 }
0x10a6   : > { %5952 = vmatmul.msk.bf16.vlgmr.msrb.gmra.mxu3 %vm513_vm0, %v8370_v5  ;;  %5953 = vmatmul.msk.bf16.vlgmr.msrb.gmra.mxu1 %vm513_vm0, %v8370_v5 }
0x10a7   : > { %3601 = vmatpush.bf16.msra.mxu0 %v5933_v32  ;;  %3614 = vmatpush.bf16.msra.mxu2 %v5937_v9  ;;  %v6977_v32 = vld [vmem:[%s8950_s7 + $0x560] sm:$0xff] }
0x10a8   : > { %3627 = vmatpush.bf16.msrb.mxu3 %v5941_v35  ;;  %3640 = vmatpush.bf16.msrb.mxu1 %v5945_v36  ;;  %v6985_v9 = vld [vmem:[%s8950_s7 + $0x5a0] sm:$0xff]  ;;  %v6967_v35 = vld [vmem:[%s8950_s7 + $0x510] sm:$0xff] }
0x10a9   : > { %v6991_v36 = vld [vmem:[%s8950_s7 + $0x5d0] sm:$0xff] }
0x10ab   : > { %3602 = vmatpush.bf16.msra.mxu0 %v5869_v42  ;;  %3615 = vmatpush.bf16.msra.mxu2 %v5873_v44  ;;  %v6965_v42 = vld [vmem:[%s8950_s7 + $0x500] sm:$0xff] }
0x10ac   : > { %3628 = vmatpush.bf16.msrb.mxu3 %v5877_v45  ;;  %3641 = vmatpush.bf16.msrb.mxu1 %v5881_v46  ;;  %v6989_v44 = vld [vmem:[%s8950_s7 + $0x5c0] sm:$0xff]  ;;  %v6974_v45 = vld [vmem:[%s8950_s7 + $0x548] sm:$0xff] }
0x10ad   : > { %v6982_v46 = vld [vmem:[%s8950_s7 + $0x588] sm:$0xff] }
0x10b5   : > { %5954 = vmatmul.msk.bf16.vlgmr.msrb.gmra.mxu0 %vm513_vm0, %v8370_v5  ;;  %5955 = vmatmul.msk.bf16.vlgmr.msrb.gmra.mxu2 %vm513_vm0, %v8370_v5 }
0x10b6   : > { %5956 = vmatmul.msk.bf16.vlgmr.msra.gmra.mxu3 %vm513_vm0, %v8370_v5  ;;  %5957 = vmatmul.msk.bf16.vlgmr.msra.gmra.mxu1 %vm513_vm0, %v8370_v5 }
0x10b7   : > { %4709 = vmatpush.bf16.msrb.mxu0 %v6940_v47  ;;  %4748 = vmatpush.bf16.msra.mxu1 %v6964_v48  ;;  %v6973_v47 = vld [vmem:[%s8950_s7 + $0x540] sm:$0xff] }
0x10b8   : > { %4722 = vmatpush.bf16.msrb.mxu2 %v6948_v49  ;;  %4735 = vmatpush.bf16.msra.mxu3 %v6956_v50  ;;  %v6981_v48 = vld [vmem:[%s8950_s7 + $0x580] sm:$0xff]  ;;  %v8671_v49 = vld [vmem:[%s8949_s6 + $0x10] sm:$0xff] }
0x10b9   : > { %v3244_v50 = vperm.slane %v8671_v49, 0 }
0x10bb   : > { %4710 = vmatpush.bf16.msrb.mxu0 %v6939_v51  ;;  %4749 = vmatpush.bf16.msra.mxu1 %v6963_v53  ;;  %v3247_v51 = vperm.slane %v8671_v49, 3 }
0x10bc   : > { %4723 = vmatpush.bf16.msrb.mxu2 %v6947_v54  ;;  %4736 = vmatpush.bf16.msra.mxu3 %v6955_v55 }
0x10bf   : > { %4711 = vmatpush.bf16.msrb.mxu0 %v6938_v57  ;;  %4750 = vmatpush.bf16.msra.mxu1 %v6962_v58 }
0x10c0   : > { %4724 = vmatpush.bf16.msrb.mxu2 %v6946_v59  ;;  %4737 = vmatpush.bf16.msra.mxu3 %v6954_v38  ;;  %v3245_v59 = vperm.slane %v8671_v49, 1 }
0x10c3   : > { %4712 = vmatpush.bf16.msrb.mxu0 %v6937_v61  ;;  %4751 = vmatpush.bf16.msra.mxu1 %v6961_v52  ;;  %v3246_v61 = vperm.slane %v8671_v49, 2  ;;  %v7004_v52 = vld [vmem:[%s8950_s7 + $0x638] sm:$0xff] }
0x10c4   : > { %4725 = vmatpush.bf16.msrb.mxu2 %v6945_v62  ;;  %4738 = vmatpush.bf16.msra.mxu3 %v6953_v63  ;;  %v7028_v63 = vld [vmem:[%s8950_s7 + $0x6f8] sm:$0xff] }
0x10c5   : > { %5958 = vmatmul.msk.bf16.vlgmr.msra.gmra.mxu0 %vm513_vm0, %v8370_v5  ;;  %5959 = vmatmul.msk.bf16.vlgmr.msra.gmra.mxu2 %vm513_vm0, %v8370_v5 }
0x10c6   : > { %5960 = vmatmul.msk.bf16.vlgmr.msrb.gmra.mxu3 %vm513_vm0, %v8370_v5  ;;  %5961 = vmatmul.msk.bf16.vlgmr.msrb.gmra.mxu1 %vm513_vm0, %v8370_v5  ;;  %v6951_v5 = vld [vmem:[%s8950_s7 + $0x490] sm:$0xff] }
0x10c7   : > { %4713 = vmatpush.bf16.msrb.mxu0 %v6936_v0  ;;  %4752 = vmatpush.bf16.msra.mxu1 %v6960_v60 }
0x10c8   : > { %4726 = vmatpush.bf16.msrb.mxu2 %v6944_v3  ;;  %4739 = vmatpush.bf16.msra.mxu3 %v6952_v4 }
0x10cb   : > { %4714 = vmatpush.bf16.msrb.mxu0 %v6935_v56  ;;  %4753 = vmatpush.bf16.msra.mxu1 %v6959_v7 }
0x10cc   : > { %4727 = vmatpush.bf16.msrb.mxu2 %v6943_v8  ;;  %4740 = vmatpush.bf16.msra.mxu3 %v6951_v5  ;;  %v7003_v8 = vld [vmem:[%s8950_s7 + $0x630] sm:$0xff] }
0x10cf   : > { %4715 = vmatpush.bf16.msrb.mxu0 %v6934_v10  ;;  %4754 = vmatpush.bf16.msra.mxu1 %v6958_v11  ;;  %v7027_v11 = vld [vmem:[%s8950_s7 + $0x6f0] sm:$0xff] }
0x10d0   : > { %4728 = vmatpush.bf16.msrb.mxu2 %v6942_v12  ;;  %4741 = vmatpush.bf16.msra.mxu3 %v6950_v13  ;;  %v7012_v13 = vld [vmem:[%s8950_s7 + $0x678] sm:$0xff] }
0x10d3   : > { %4716 = vmatpush.bf16.msrb.mxu0 %v6933_v2  ;;  %4755 = vmatpush.bf16.msra.mxu1 %v6957_v15  ;;  %v7020_v15 = vld [vmem:[%s8950_s7 + $0x6b8] sm:$0xff] }
0x10d4   : > { %4729 = vmatpush.bf16.msrb.mxu2 %v6941_v18  ;;  %4742 = vmatpush.bf16.msra.mxu3 %v6949_v19  ;;  %v7026_v18 = vld [vmem:[%s8950_s7 + $0x6e8] sm:$0xff]  ;;  %v3248_v19 = vperm.slane %v8671_v49, 4 }
0x10d7   : > { %4761 = vmatpush.bf16.msra.mxu0 %v6972_v16  ;;  %4800 = vmatpush.bf16.msrb.mxu1 %v6996_v17  ;;  %v7002_v17 = vld [vmem:[%s8950_s7 + $0x628] sm:$0xff] }
0x10d8   : > { %4774 = vmatpush.bf16.msra.mxu2 %v6980_v14  ;;  %4787 = vmatpush.bf16.msrb.mxu3 %v6988_v21  ;;  %v3251_v21 = vperm.slane %v8671_v49, 7 }
0x10db   : > { %4762 = vmatpush.bf16.msra.mxu0 %v6971_v22  ;;  %4801 = vmatpush.bf16.msrb.mxu1 %v6995_v23  ;;  %v7011_v22 = vld [vmem:[%s8950_s7 + $0x670] sm:$0xff] }
0x10dc   : > { %4775 = vmatpush.bf16.msra.mxu2 %v6979_v25  ;;  %4788 = vmatpush.bf16.msrb.mxu3 %v6987_v26  ;;  %v7019_v25 = vld [vmem:[%s8950_s7 + $0x6b0] sm:$0xff] }
0x10df   : > { %4763 = vmatpush.bf16.msra.mxu0 %v6970_v24  ;;  %4802 = vmatpush.bf16.msrb.mxu1 %v6994_v27  ;;  %v7001_v24 = vld [vmem:[%s8950_s7 + $0x620] sm:$0xff] }
0x10e0   : > { %4776 = vmatpush.bf16.msra.mxu2 %v6978_v28  ;;  %4789 = vmatpush.bf16.msrb.mxu3 %v6986_v29  ;;  %v7025_v29 = vld [vmem:[%s8950_s7 + $0x6e0] sm:$0xff] }
0x10e3   : > { %4764 = vmatpush.bf16.msra.mxu0 %v6969_v30  ;;  %4803 = vmatpush.bf16.msrb.mxu1 %v6993_v31  ;;  %v7010_v31 = vld [vmem:[%s8950_s7 + $0x668] sm:$0xff] }
0x10e4   : > { %4777 = vmatpush.bf16.msra.mxu2 %v6977_v32  ;;  %4790 = vmatpush.bf16.msrb.mxu3 %v6985_v9  ;;  %v7018_v9 = vld [vmem:[%s8950_s7 + $0x6a8] sm:$0xff] }
0x10e7   : > { %4765 = vmatpush.bf16.msra.mxu0 %v6968_v33  ;;  %4804 = vmatpush.bf16.msrb.mxu1 %v6992_v34  ;;  %v3249_v33 = vperm.slane %v8671_v49, 5 }
0x10e8   : > { %4778 = vmatpush.bf16.msra.mxu2 %v6976_v6  ;;  %4791 = vmatpush.bf16.msrb.mxu3 %v6984_v20  ;;  %v7024_v20 = vld [vmem:[%s8950_s7 + $0x6d8] sm:$0xff] }
0x10eb   : > { %4766 = vmatpush.bf16.msra.mxu0 %v6967_v35  ;;  %4805 = vmatpush.bf16.msrb.mxu1 %v6991_v36  ;;  %v3250_v35 = vperm.slane %v8671_v49, 6  ;;  %v7000_v36 = vld [vmem:[%s8950_s7 + $0x618] sm:$0xff] }
0x10ec   : > { %4779 = vmatpush.bf16.msra.mxu2 %v6975_v40  ;;  %4792 = vmatpush.bf16.msrb.mxu3 %v6983_v41  ;;  %v7009_v40 = vld [vmem:[%s8950_s7 + $0x660] sm:$0xff] }
0x10ef   : > { %4767 = vmatpush.bf16.msra.mxu0 %v6966_v37  ;;  %4806 = vmatpush.bf16.msrb.mxu1 %v6990_v39 }
0x10f0   : > { %4780 = vmatpush.bf16.msra.mxu2 %v6974_v45  ;;  %4793 = vmatpush.bf16.msrb.mxu3 %v6982_v46 }
0x10f3   : > { %4768 = vmatpush.bf16.msra.mxu0 %v6965_v42  ;;  %4807 = vmatpush.bf16.msrb.mxu1 %v6989_v44  ;;  %v7017_v44 = vld [vmem:[%s8950_s7 + $0x6a0] sm:$0xff] }
0x10f4   : > { %4781 = vmatpush.bf16.msra.mxu2 %v6973_v47  ;;  %4794 = vmatpush.bf16.msrb.mxu3 %v6981_v48  ;;  %v6999_v47 = vld [vmem:[%s8950_s7 + $0x610] sm:$0xff] }
0x1112   : > { %v3448_v53 = vpop.f32.mrf.mxu0 }
0x1113   : > { %v3449_v54 = vadd.f32 %v3448_v53, %v3244_v50  ;;  %v3487_v55 = vpop.f32.mrf.mxu1  ;;  %v7023_v50 = vld [vmem:[%s8950_s7 + $0x6d0] sm:$0xff]  ;;  %v7008_v53 = vld [vmem:[%s8950_s7 + $0x658] sm:$0xff] }
0x1114   : > { %v3488_v57 = vadd.f32 %v3487_v55, %v3247_v51 }
0x1115   : > { %v3647_v58 = vmax.f32 %v3449_v54, 0.0  ;;  %v8747_v54 = vld [vmem:[%s8949_s6 + $0x18] sm:$0xff] }
0x1116   : > { %v3650_v38 = vmax.f32 %v3488_v57, 0.0  ;;  %v7016_v57 = vld [vmem:[%s8950_s7 + $0x698] sm:$0xff] }
0x1117   : > { %v3663_v62 = vpack.c.bf16 %v3647_v58, %v3647_v58 }
0x1118   : > { %v3666_v0 = vpack.c.bf16 %v3650_v38, %v3650_v38  ;;  %v3461_v60 = vpop.f32.mrf.mxu2  ;;  %v7022_v38 = vld [vmem:[%s8950_s7 + $0x6c8] sm:$0xff] }
0x1119   : > { %v3462_v3 = vadd.f32 %v3461_v60, %v3245_v59  ;;  %v3474_v4 = vpop.f32.mrf.mxu3  ;;  %4717 = vmatmul.bf16.vlgmr.msrb.gmra.mxu0 %v3663_v62  ;;  %v6998_v59 = vld [vmem:[%s8950_s7 + $0x608] sm:$0xff]  ;;  %v3255_v62 = vperm.slane %v8747_v54, 3  ;;  %v7015_v60 = vld [vmem:[%s8950_s7 + $0x690] sm:$0xff] }
0x111a   : > { %v3475_v56 = vadd.f32 %v3474_v4, %v3246_v61  ;;  %4756 = vmatmul.bf16.vlgmr.msra.gmra.mxu1 %v3666_v0  ;;  %4813 = vmatpush.bf16.msrb.mxu0 %v7004_v52  ;;  %v3450_v7 = vpop.f32.mrf.mxu0  ;;  %v3252_v61 = vperm.slane %v8747_v54, 0  ;;  %v6997_v4 = vld [vmem:[%s8950_s7 + $0x600] sm:$0xff] }
0x111b   : > { %v3648_v5 = vmax.f32 %v3462_v3, 0.0  ;;  %4852 = vmatpush.bf16.msra.mxu1 %v7028_v63  ;;  %v3489_v10 = vpop.f32.mrf.mxu1  ;;  %v7007_v63 = vld [vmem:[%s8950_s7 + $0x650] sm:$0xff] }
0x111c   : > { %v3649_v12 = vmax.f32 %v3475_v56, 0.0 }
0x111d   : > { %v3664_v2 = vpack.c.bf16 %v3648_v5, %v3648_v5  ;;  %v7036_v5 = vld [vmem:[%s8950_s7 + $0x738] sm:$0xff] }
0x111e   : > { %v3665_v16 = vpack.c.bf16 %v3649_v12, %v3649_v12  ;;  %4814 = vmatpush.bf16.msrb.mxu0 %v7003_v8  ;;  %v7021_v8 = vld [vmem:[%s8950_s7 + $0x6c0] sm:$0xff]  ;;  %v7006_v12 = vld [vmem:[%s8950_s7 + $0x648] sm:$0xff] }
0x111f   : > { %4853 = vmatpush.bf16.msra.mxu1 %v7027_v11  ;;  %4730 = vmatmul.bf16.vlgmr.msrb.gmra.mxu2 %v3664_v2  ;;  %v7060_v11 = vld [vmem:[%s8950_s7 + $0x7f8] sm:$0xff]  ;;  %v7014_v2 = vld [vmem:[%s8950_s7 + $0x688] sm:$0xff] }
0x1120   : > { %4743 = vmatmul.bf16.vlgmr.msra.gmra.mxu3 %v3665_v16  ;;  %4826 = vmatpush.bf16.msrb.mxu2 %v7012_v13  ;;  %v3463_v14 = vpop.f32.mrf.mxu2 }
0x1121   : > { %4839 = vmatpush.bf16.msra.mxu3 %v7020_v15  ;;  %v3476_v23 = vpop.f32.mrf.mxu3  ;;  %v3253_v15 = vperm.slane %v8747_v54, 1 }
0x1122   : > { %4815 = vmatpush.bf16.msrb.mxu0 %v7002_v17  ;;  %v3500_v26 = vpop.f32.mrf.mxu0  ;;  %v3254_v17 = vperm.slane %v8747_v54, 2  ;;  %v7005_v23 = vld [vmem:[%s8950_s7 + $0x640] sm:$0xff] }
0x1123   : > { %4854 = vmatpush.bf16.msra.mxu1 %v7026_v18  ;;  %v3501_v27 = vadd.f32 %v3500_v26, %v3248_v19  ;;  %v3539_v28 = vpop.f32.mrf.mxu1  ;;  %v7035_v19 = vld [vmem:[%s8950_s7 + $0x730] sm:$0xff] }
0x1124   : > { %v3540_v30 = vadd.f32 %v3539_v28, %v3251_v21  ;;  %4827 = vmatpush.bf16.msrb.mxu2 %v7011_v22  ;;  %v7059_v22 = vld [vmem:[%s8950_s7 + $0x7f0] sm:$0xff] }
0x1125   : > { %v3651_v32 = vmax.f32 %v3501_v27, 0.0  ;;  %4840 = vmatpush.bf16.msra.mxu3 %v7019_v25  ;;  %v7044_v27 = vld [vmem:[%s8950_s7 + $0x778] sm:$0xff] }
0x1126   : > { %v3654_v34 = vmax.f32 %v3540_v30, 0.0  ;;  %4816 = vmatpush.bf16.msrb.mxu0 %v7001_v24  ;;  %v7013_v24 = vld [vmem:[%s8950_s7 + $0x680] sm:$0xff]  ;;  %v7052_v30 = vld [vmem:[%s8950_s7 + $0x7b8] sm:$0xff] }
0x1127   : > { %v3667_v6 = vpack.c.bf16 %v3651_v32, %v3651_v32  ;;  %4855 = vmatpush.bf16.msra.mxu1 %v7025_v29 }
0x1128   : > { %v3670_v37 = vpack.c.bf16 %v3654_v34, %v3654_v34  ;;  %4828 = vmatpush.bf16.msrb.mxu2 %v7010_v31  ;;  %v3513_v39 = vpop.f32.mrf.mxu2  ;;  %v7058_v34 = vld [vmem:[%s8950_s7 + $0x7e8] sm:$0xff] }
0x1129   : > { %4841 = vmatpush.bf16.msra.mxu3 %v7018_v9  ;;  %v3514_v41 = vadd.f32 %v3513_v39, %v3249_v33  ;;  %v3526_v42 = vpop.f32.mrf.mxu3  ;;  %4769 = vmatmul.bf16.vlgmr.msra.gmra.mxu0 %v3667_v6  ;;  %v7034_v9 = vld [vmem:[%s8950_s7 + $0x728] sm:$0xff] }
0x112a   : > { %v3527_v45 = vadd.f32 %v3526_v42, %v3250_v35  ;;  %4808 = vmatmul.bf16.vlgmr.msrb.gmra.mxu1 %v3670_v37  ;;  %4817 = vmatpush.bf16.msrb.mxu0 %v7000_v36  ;;  %v3502_v46 = vpop.f32.mrf.mxu0  ;;  %v7043_v36 = vld [vmem:[%s8950_s7 + $0x770] sm:$0xff]  ;;  %v7033_v37 = vld [vmem:[%s8950_s7 + $0x720] sm:$0xff]  ;;  %v7042_v42 = vld [vmem:[%s8950_s7 + $0x768] sm:$0xff] }
0x112b   : > { %v3652_v48 = vmax.f32 %v3514_v41, 0.0  ;;  %4856 = vmatpush.bf16.msra.mxu1 %v7024_v20  ;;  %v3541_v49 = vpop.f32.mrf.mxu1  ;;  %v7051_v20 = vld [vmem:[%s8950_s7 + $0x7b0] sm:$0xff] }
0x112c   : > { %v3653_v51 = vmax.f32 %v3527_v45, 0.0  ;;  %4829 = vmatpush.bf16.msrb.mxu2 %v7009_v40  ;;  %v7057_v40 = vld [vmem:[%s8950_s7 + $0x7e0] sm:$0xff]  ;;  %v7050_v45 = vld [vmem:[%s8950_s7 + $0x7a8] sm:$0xff] }
0x112d   : > { %v3668_v55 = vpack.c.bf16 %v3652_v48, %v3652_v48  ;;  %4842 = vmatpush.bf16.msra.mxu3 %v7017_v44  ;;  %v7056_v48 = vld [vmem:[%s8950_s7 + $0x7d8] sm:$0xff]  ;;  %v7041_v49 = vld [vmem:[%s8950_s7 + $0x760] sm:$0xff] }
0x112e   : > { %v3669_v58 = vpack.c.bf16 %v3653_v51, %v3653_v51  ;;  %4818 = vmatpush.bf16.msrb.mxu0 %v6999_v47  ;;  %v7032_v47 = vld [vmem:[%s8950_s7 + $0x718] sm:$0xff]  ;;  %v7031_v51 = vld [vmem:[%s8950_s7 + $0x710] sm:$0xff] }
0x112f   : > { %4857 = vmatpush.bf16.msra.mxu1 %v7023_v50  ;;  %4782 = vmatmul.bf16.vlgmr.msra.gmra.mxu2 %v3668_v55  ;;  %v7049_v50 = vld [vmem:[%s8950_s7 + $0x7a0] sm:$0xff] }
0x1130   : > { %4795 = vmatmul.bf16.vlgmr.msrb.gmra.mxu3 %v3669_v58  ;;  %4830 = vmatpush.bf16.msrb.mxu2 %v7008_v53  ;;  %v3515_v52 = vpop.f32.mrf.mxu2  ;;  %v3256_v53 = vperm.slane %v8747_v54, 4  ;;  %v3259_v58 = vperm.slane %v8747_v54, 7 }
0x1131   : > { %4843 = vmatpush.bf16.msra.mxu3 %v7016_v57  ;;  %v3528_v0 = vpop.f32.mrf.mxu3  ;;  %v7055_v57 = vld [vmem:[%s8950_s7 + $0x7d0] sm:$0xff]  ;;  %v7048_v52 = vld [vmem:[%s8950_s7 + $0x798] sm:$0xff] }
0x1132   : > { %4819 = vmatpush.bf16.msrb.mxu0 %v6998_v59  ;;  %v3552_v3 = vpop.f32.mrf.mxu0 }
0x1133   : > { %4858 = vmatpush.bf16.msra.mxu1 %v7022_v38  ;;  %v3553_v56 = vadd.f32 %v3552_v3, %v3252_v61  ;;  %v3591_v7 = vpop.f32.mrf.mxu1  ;;  %v7040_v38 = vld [vmem:[%s8950_s7 + $0x758] sm:$0xff] }
0x1134   : > { %v3592_v10 = vadd.f32 %v3591_v7, %v3255_v62  ;;  %4831 = vmatpush.bf16.msrb.mxu2 %v7007_v63  ;;  %v7030_v63 = vld [vmem:[%s8950_s7 + $0x708] sm:$0xff]  ;;  %v7047_v7 = vld [vmem:[%s8950_s7 + $0x790] sm:$0xff] }
0x1135   : > { %v3655_v13 = vmax.f32 %v3553_v56, 0.0  ;;  %4844 = vmatpush.bf16.msra.mxu3 %v7015_v60  ;;  %v7054_v60 = vld [vmem:[%s8950_s7 + $0x7c8] sm:$0xff]  ;;  %v3257_v56 = vperm.slane %v8747_v54, 5 }
0x1136   : > { %v3658_v16 = vmax.f32 %v3592_v10, 0.0  ;;  %4820 = vmatpush.bf16.msrb.mxu0 %v6997_v4  ;;  %v7039_v4 = vld [vmem:[%s8950_s7 + $0x750] sm:$0xff] }
0x1137   : > { %v3671_v18 = vpack.c.bf16 %v3655_v13, %v3655_v13  ;;  %4859 = vmatpush.bf16.msra.mxu1 %v7021_v8  ;;  %v3258_v8 = vperm.slane %v8747_v54, 6 }
0x1138   : > { %v3674_v14 = vpack.c.bf16 %v3658_v16, %v3658_v16  ;;  %4832 = vmatpush.bf16.msrb.mxu2 %v7006_v12  ;;  %v3565_v21 = vpop.f32.mrf.mxu2  ;;  %v7053_v12 = vld [vmem:[%s8950_s7 + $0x7c0] sm:$0xff]  ;;  %v7046_v16 = vld [vmem:[%s8950_s7 + $0x788] sm:$0xff] }
0x1139   : > { %4845 = vmatpush.bf16.msra.mxu3 %v7014_v2  ;;  %v3566_v25 = vadd.f32 %v3565_v21, %v3253_v15  ;;  %v3578_v26 = vpop.f32.mrf.mxu3  ;;  %4821 = vmatmul.bf16.vlgmr.msrb.gmra.mxu0 %v3671_v18  ;;  %v7038_v15 = vld [vmem:[%s8950_s7 + $0x748] sm:$0xff] }
0x113a   : > { %4865 = vmatpush.bf16.msra.mxu0 %v7036_v5  ;;  %v3579_v28 = vadd.f32 %v3578_v26, %v3254_v17  ;;  %4860 = vmatmul.bf16.vlgmr.msra.gmra.mxu1 %v3674_v14  ;;  %v3554_v29 = vpop.f32.mrf.mxu0  ;;  %v7029_v5 = vld [vmem:[%s8950_s7 + $0x700] sm:$0xff] }
0x113b   : > { %4904 = vmatpush.bf16.msrb.mxu1 %v7060_v11  ;;  %v3656_v31 = vmax.f32 %v3566_v25, 0.0  ;;  %v3593_v32 = vpop.f32.mrf.mxu1  ;;  %v7037_v14 = vld [vmem:[%s8950_s7 + $0x740] sm:$0xff] }
0x113c   : > { %v3657_v33 = vmax.f32 %v3579_v28, 0.0  ;;  %4833 = vmatpush.bf16.msrb.mxu2 %v7005_v23 }
0x113d   : > { %v3672_v35 = vpack.c.bf16 %v3656_v31, %v3656_v31  ;;  %4846 = vmatpush.bf16.msra.mxu3 %v7013_v24 }
0x113e   : > { %4866 = vmatpush.bf16.msra.mxu0 %v7035_v19  ;;  %v3673_v6 = vpack.c.bf16 %v3657_v33, %v3657_v33 }
0x113f   : > { %4905 = vmatpush.bf16.msrb.mxu1 %v7059_v22  ;;  %4834 = vmatmul.bf16.vlgmr.msrb.gmra.mxu2 %v3672_v35  ;;  %v7045_v22 = vld [vmem:[%s8950_s7 + $0x780] sm:$0xff] }
0x1140   : > { %4878 = vmatpush.bf16.msra.mxu2 %v7044_v27  ;;  %4847 = vmatmul.bf16.vlgmr.msra.gmra.mxu3 %v3673_v6  ;;  %v3567_v39 = vpop.f32.mrf.mxu2  ;;  %v7123_v6 = vld [vmem:[%s8951_s8 + $0x1] ss:$0 sm:$0xff] }
0x1141   : > { %4891 = vmatpush.bf16.msrb.mxu3 %v7052_v30  ;;  %v3580_v41 = vpop.f32.mrf.mxu3 }
0x1142   : > { %4867 = vmatpush.bf16.msra.mxu0 %v7034_v9  ;;  %v3604_v44 = vpop.f32.mrf.mxu0 }
0x1143   : > { %4906 = vmatpush.bf16.msrb.mxu1 %v7058_v34  ;;  %v3643_v46 = vpop.f32.mrf.mxu1  ;;  %v3605_v0 = vadd.f32 %v3604_v44, %v3256_v53 }
0x1144   : > { %4879 = vmatpush.bf16.msra.mxu2 %v7043_v36  ;;  %v3644_v3 = vadd.f32 %v3643_v46, %v3259_v58 }
0x1145   : > { %4892 = vmatpush.bf16.msrb.mxu3 %v7051_v20  ;;  %v3659_v10 = vmax.f32 %v3605_v0, 0.0 }
0x1146   : > { %4868 = vmatpush.bf16.msra.mxu0 %v7033_v37  ;;  %v3662_v13 = vmax.f32 %v3644_v3, 0.0 }
0x1147   : > { %4907 = vmatpush.bf16.msrb.mxu1 %v7057_v40  ;;  %v3675_v18 = vpack.c.bf16 %v3659_v10, %v3659_v10 }
0x1148   : > { %4880 = vmatpush.bf16.msra.mxu2 %v7042_v42  ;;  %v3617_v55 = vpop.f32.mrf.mxu2  ;;  %v3678_v19 = vpack.c.bf16 %v3662_v13, %v3662_v13 }
0x1149   : > { %4893 = vmatpush.bf16.msrb.mxu3 %v7050_v45  ;;  %v3630_v59 = vpop.f32.mrf.mxu3  ;;  %v3618_v54 = vadd.f32 %v3617_v55, %v3257_v56 }
0x114a   : > { %4869 = vmatpush.bf16.msra.mxu0 %v7032_v47  ;;  %v3606_v61 = vpop.f32.mrf.mxu0  ;;  %v3631_v17 = vadd.f32 %v3630_v59, %v3258_v8 }
0x114b   : > { %4908 = vmatpush.bf16.msrb.mxu1 %v7056_v48  ;;  %v3645_v62 = vpop.f32.mrf.mxu1  ;;  %v3660_v21 = vmax.f32 %v3618_v54, 0.0 }
0x114c   : > { %4881 = vmatpush.bf16.msra.mxu2 %v7041_v49  ;;  %v3661_v23 = vmax.f32 %v3631_v17, 0.0 }
0x114d   : > { %4894 = vmatpush.bf16.msrb.mxu3 %v7049_v50  ;;  %v3676_v25 = vpack.c.bf16 %v3660_v21, %v3660_v21 }
0x114e   : > { %4870 = vmatpush.bf16.msra.mxu0 %v7031_v51  ;;  %v3677_v26 = vpack.c.bf16 %v3661_v23, %v3661_v23 }
0x114f   : > { %4909 = vmatpush.bf16.msrb.mxu1 %v7055_v57 }
0x1150   : > { %4882 = vmatpush.bf16.msra.mxu2 %v7040_v38  ;;  %v3619_v11 = vpop.f32.mrf.mxu2 }
0x1151   : > { %4895 = vmatpush.bf16.msrb.mxu3 %v7048_v52  ;;  %v3632_v2 = vpop.f32.mrf.mxu3 }
0x1152   : > { %4871 = vmatpush.bf16.msra.mxu0 %v7030_v63 }
0x1153   : > { %4910 = vmatpush.bf16.msrb.mxu1 %v7054_v60 }
0x1154   : > { %4883 = vmatpush.bf16.msra.mxu2 %v7039_v4 }
0x1155   : > { %4896 = vmatpush.bf16.msrb.mxu3 %v7047_v7 }
0x1156   : > { %4872 = vmatpush.bf16.msra.mxu0 %v7029_v5 }
0x1157   : > { %4911 = vmatpush.bf16.msrb.mxu1 %v7053_v12 }
0x1158   : > { %4884 = vmatpush.bf16.msra.mxu2 %v7038_v15 }
0x1159   : > { %4897 = vmatpush.bf16.msrb.mxu3 %v7046_v16  ;;  %4873 = vmatmul.bf16.vlgmr.msra.gmra.mxu0 %v3675_v18 }
0x115a   : > { %4912 = vmatmul.bf16.vlgmr.msrb.gmra.mxu1 %v3678_v19 }
0x115c   : > { %4885 = vmatpush.bf16.msra.mxu2 %v7037_v14 }
0x115d   : > { %4898 = vmatpush.bf16.msrb.mxu3 %v7045_v22 }
0x115f   : > { %4886 = vmatmul.bf16.vlgmr.msra.gmra.mxu2 %v3676_v25 }
0x1160   : > { %4899 = vmatmul.bf16.vlgmr.msrb.gmra.mxu3 %v3677_v26 }
0x1196   : > { %v4718_v24 = vpop.f32.mrf.mxu0 }
0x1197   : > { %v4757_v27 = vpop.f32.mrf.mxu1  ;;  %v4719_v39 = vadd.f32 %v7123_v6, %v4718_v24 }
0x119e   : > { %v4720_v28 = vpop.f32.mrf.mxu0 }
0x119f   : > { %v4759_v29 = vpop.f32.mrf.mxu1  ;;  %v7124_v28 = vld [vmem:[%s8954_s11 + $0x1] ss:$0 sm:$0xff] }
0x11a2   : > { %v4731_v30 = vpop.f32.mrf.mxu2 }
0x11a3   : > { %v4744_v31 = vpop.f32.mrf.mxu3  ;;  %v4732_v42 = vadd.f32 %v4731_v30, %v4719_v39 }
0x11a5   : > { %v4745_v46 = vadd.f32 %v4744_v31, %v4732_v42  ;;  %v7125_v31 = vld [vmem:[%s8955_s12 + $0x1] ss:$0 sm:$0xff] }
0x11a6   : > { %v4770_v32 = vpop.f32.mrf.mxu0 }
0x11a7   : > { %v4809_v9 = vpop.f32.mrf.mxu1  ;;  %v4758_v49 = vadd.f32 %v4757_v27, %v4745_v46 }
0x11a9   : > { %v4771_v53 = vadd.f32 %v4770_v32, %v4758_v49 }
0x11aa   : > { %v4733_v33 = vpop.f32.mrf.mxu2 }
0x11ab   : > { %v4746_v34 = vpop.f32.mrf.mxu3 }
0x11ae   : > { %v4772_v35 = vpop.f32.mrf.mxu0 }
0x11af   : > { %v4811_v36 = vpop.f32.mrf.mxu1 }
0x11b2   : > { %v4783_v20 = vpop.f32.mrf.mxu2 }
0x11b3   : > { %v4796_v37 = vpop.f32.mrf.mxu3  ;;  %v4784_v55 = vadd.f32 %v4783_v20, %v4771_v53 }
0x11b5   : > { %v4797_v57 = vadd.f32 %v4796_v37, %v4784_v55 }
0x11b6   : > { %v4822_v40 = vpop.f32.mrf.mxu0 }
0x11b7   : > { %v4861_v41 = vpop.f32.mrf.mxu1  ;;  %v4810_v38 = vadd.f32 %v4809_v9, %v4797_v57 }
0x11b9   : > { %v4823_v61 = vadd.f32 %v4822_v40, %v4810_v38 }
0x11ba   : > { %v4785_v44 = vpop.f32.mrf.mxu2 }
0x11bb   : > { %v4798_v45 = vpop.f32.mrf.mxu3 }
0x11be   : > { %v4824_v47 = vpop.f32.mrf.mxu0 }
0x11bf   : > { %v4863_v48 = vpop.f32.mrf.mxu1 }
0x11c0   : > { %v7126_v48 = vld [vmem:[%s8956_s13] ss:$0 sm:$0xff] }
0x11c2   : > { %v4835_v50 = vpop.f32.mrf.mxu2 }
0x11c3   : > { %v4848_v51 = vpop.f32.mrf.mxu3  ;;  %v4836_v62 = vadd.f32 %v4835_v50, %v4823_v61  ;;  %v7127_v50 = vld [vmem:[%s8957_s14] ss:$0 sm:$0xff] }
0x11c5   : > { %v4849_v0 = vadd.f32 %v4848_v51, %v4836_v62 }
0x11c7   : > { %v4862_v3 = vadd.f32 %v4861_v41, %v4849_v0 }
0x11ca   : > { %v4837_v58 = vpop.f32.mrf.mxu2 }
0x11cb   : > { %v4850_v59 = vpop.f32.mrf.mxu3 }
0x11d6   : > { %v4874_v52 = vpop.f32.mrf.mxu0 }
0x11d7   : > { %v4913_v63 = vpop.f32.mrf.mxu1  ;;  %v4875_v56 = vadd.f32 %v4874_v52, %v4862_v3 }
0x11de   : > { %v4876_v60 = vpop.f32.mrf.mxu0 }
0x11df   : > { %v4915_v4 = vpop.f32.mrf.mxu1 }
0x11e2   : > { %v4887_v7 = vpop.f32.mrf.mxu2 }
0x11e3   : > { %v4888_v8 = vadd.f32 %v4887_v7, %v4875_v56  ;;  %v4900_v5 = vpop.f32.mrf.mxu3 }
0x11e5   : > { %v4901_v10 = vadd.f32 %v4900_v5, %v4888_v8 }
0x11e7   : > { %v4914_v11 = vadd.f32 %v4913_v63, %v4901_v10 }
0x11e9   : > { %v4917_v12 = vadd.f32 %v4914_v11, %v8357_v1 }
0x11ea   : > { %v4889_v13 = vpop.f32.mrf.mxu2 }
0x11eb   : > { %v4902_v2 = vpop.f32.mrf.mxu3  ;;  %v4922_v15 = vsel %vm513_vm0, %v4917_v12, 0.0 }
0x11ec   : > { %4923 = vadd.xlane.f32.xlu1 %v4922_v15 }
0x125f   : > { %v4924_v54 = vpop.xlane.xlu1 %4923 }
0x1260   : > { %v4925_v16 = vmul.f32 %v4924_v54, %v7471_v43 }
0x1262   : > { %v4926_v17 = vsub.f32 %v4917_v12, %v4925_v16 }
0x1264   : > { %v4927_v18 = vmul.f32 %v4926_v17, %v4926_v17 }
0x1266   : > { %v4928_v19 = vsel %vm513_vm0, %v4927_v18, 0.0 }
0x1267   : > { %4929 = vadd.xlane.f32.xlu2 %v4928_v19 }
0x12da   : > { %v4930_v14 = vpop.xlane.xlu2 %4929 }
0x12db   : > { %v4931_v21 = vmul.f32 %v4930_v14, %v7471_v43 }
0x12dd   : > { %v4932_v22 = vadd.f32 1e-05, %v4931_v21 }
0x12df   : > { %7168 = vrsqrt.f32 %v4932_v22  ;;  %vm4939_vm4 = vweird.f32 %v4932_v22 }
0x12e5   : > { %v7169_v23 = vpop.eup %7168 }
0x12e6   : > { %v4934_v1 = vmul.f32 %v7169_v23, %v4932_v22  ;;  %vm4940_vm3 = vweird.f32 %v7169_v23 }
0x12e7   : > { %vm4941_vm5 = vmor %vm4939_vm4, %vm4940_vm3 }
0x12e8   : > { %v4935_v25 = vmul.f32 %v7169_v23, %v4934_v1 }
0x12ea   : > { %v4936_v26 = vmul.f32 0.5, %v4935_v25 }
0x12ec   : > { %v4937_v24 = vsub.f32 1.5, %v4936_v26 }
0x12ee   : > { %v4938_v27 = vmul.f32 %v7169_v23, %v4937_v24 }
0x12f0   : > { %v4942_v29 = vsel %vm4941_vm5, %v7169_v23, %v4938_v27 }
0x12f1   : > { %v4943_v30 = vmul.f32 %v4942_v29, %v4926_v17 }
0x12f3   : > { %v4947_v32 = vmul.f32 %v7124_v28, %v4943_v30 }
0x12f5   : > { %v4951_v9 = vadd.f32 %v7125_v31, %v4947_v32 }
0x12f7   : > { %v4954_v33 = vsel %vm513_vm0, %v4951_v9, 0.0 }
0x12f8   : > { %4955 = vadd.xlane.f32.xlu0 %v4954_v33 }
0x136b   : > { %v4956_v34 = vpop.xlane.xlu0 %4955 }
0x136c   : > { %v4957_v35 = vmul.f32 %v4956_v34, %v7471_v43 }
0x136e   : > { %v4958_v36 = vsub.f32 %v4951_v9, %v4957_v35 }
0x1370   : > { %v4959_v6 = vmul.f32 %v4958_v36, %v4958_v36 }
0x1372   : > { %v4960_v20 = vsel %vm513_vm0, %v4959_v6, 0.0 }
0x1373   : > { %4961 = vadd.xlane.f32.xlu2 %v4960_v20 }
0x13e6   : > { %v4962_v37 = vpop.xlane.xlu2 %4961 }
0x13e7   : > { %v4963_v39 = vmul.f32 %v4962_v37, %v7471_v43 }
0x13e9   : > { %v4964_v40 = vadd.f32 1e-05, %v4963_v39 }
0x13eb   : > { %7170 = vrsqrt.f32 %v4964_v40  ;;  %vm4971_vm8 = vweird.f32 %v4964_v40 }
0x13f1   : > { %v7171_v41 = vpop.eup %7170 }
0x13f2   : > { %v4966_v42 = vmul.f32 %v7171_v41, %v4964_v40  ;;  %vm4972_vm7 = vweird.f32 %v7171_v41 }
0x13f3   : > { %vm4973_vm9 = vmor %vm4971_vm8, %vm4972_vm7 }
0x13f4   : > { %v4967_v44 = vmul.f32 %v7171_v41, %v4966_v42 }
0x13f6   : > { %v4968_v45 = vmul.f32 0.5, %v4967_v44 }
0x13f8   : > { %v4969_v46 = vsub.f32 1.5, %v4968_v45 }
0x13fa   : > { %v4970_v47 = vmul.f32 %v7171_v41, %v4969_v46 }
0x13fc   : > { %v4974_v43 = vsel %vm4973_vm9, %v7171_v41, %v4970_v47 }
0x13fd   : > { %v4975_v49 = vmul.f32 %v4974_v43, %v4958_v36 }
0x13ff   : > { %v4979_v51 = vmul.f32 %v7126_v48, %v4975_v49 }
0x1401   : > { %v4983_v53 = vadd.f32 %v7127_v50, %v4979_v51 }
0x1403   : > { %4984 = vst.msk [vmem:[%s485_s23] sm:$0xff] %vm513_vm0, %v4983_v53 }
0x1404   : > { %7199 = shalt.err (!%p7196_p3)
}
0x1405   : > { %7061 = dma.vmem_to_hbm [thread:$0]  (%p7366_p5), %s4999_s22, 128, %s5001_s24, %s4986_s29  }
0x1406 PF: > { %s8995_s27 = sld [smem:[#allocation5_spill]]  ;;  %p7067_p4 = scmp.ge.s32.totalorder %s7234_s21, 2 }
0x1408   : > { %p7064_p7 = pnand %p7067_p4, %p7370_p6 }
0x140a   : > { %p7065_p8 = pneg %p7064_p7 }
0x140c   : > { %s5012_s23 = sand.u32 1, %s8995_s27  }
0x140d   : > { %s5013_s18 = scalar_lea.sflag [#allocation3], %s5012_s23 }
0x140e   : > { %7217 = dma.done.wait (%p7065_p8), %s5013_s18, 128  }
0x140f   : > { %7219 = vsyncadd (%p7065_p8), %s5013_s18, 4294967168  ;;  %s8997_s21 = sld [smem:[#allocation7_spill]]  ;;  %s9000_s18 = smov %s7226_s19 }
0x1410   : > { %s8998_s20 = sld [smem:[#allocation6_spill]] }
0x1411   : > { %s8999_s17 = sld [smem:[#allocation8_spill]] }
0x1415   : > { %p25_p9 = scmp.ge.s32.totalorder %s8997_s21, 4  }
0x1416   : > { %s9001_s19 = smov %s8998_s20 }
0x1417   : > { %s9002_s20 = smov %s8999_s17  ;;  %27 = sbr.rel (!%p25_p9) target bundleno = 5 (0x5), region = 127 }
0x141c   :  { %5019 = vsyncpa [#allocation3], 1 }
0x141d   :  { %5021 = vsyncpa [#allocation3 + $0x1], 1 }

</bundles_post_ra>
